<compile_context>
chip_gen: v7x
topology: tpu7x:2x2x1
jax: 0.10.0
libtpu: 0.0.40
codegen_flags: <defaults>
</compile_context>

<pallas_src>
import functools

import jax
import jax.numpy as jnp
from jax.experimental import pallas as pl
from jax.experimental.pallas import tpu as pltpu

_EPS = 1e-5
_INV_SQRT2 = 0.7071067811865476


def _round_up(x, m):
    return ((x + m - 1) // m) * m


def _gelu(t):
    # exact (erf) GELU, matching PyTorch nn.GELU() default
    return 0.5 * t * (1.0 + jax.lax.erf(t * _INV_SQRT2))


def _shift2d(a, oy, ox):
    """out[:, y, x, :] = a[:, y+oy, x+ox, :], zero outside bounds (static oy/ox)."""
    B, H, W, C = a.shape
    if oy > 0:
        a = jnp.concatenate([a[:, oy:], jnp.zeros((B, oy, W, C), a.dtype)], axis=1)
    elif oy < 0:
        a = jnp.concatenate([jnp.zeros((B, -oy, W, C), a.dtype), a[:, :H + oy]], axis=1)
    if ox > 0:
        a = jnp.concatenate([a[:, :, ox:], jnp.zeros((B, H, ox, C), a.dtype)], axis=2)
    elif ox < 0:
        a = jnp.concatenate([jnp.zeros((B, H, -ox, C), a.dtype), a[:, :, :W + ox]], axis=2)
    return a


def _conv_block_kernel(x_ref, w0_ref, b0_ref, w1_ref, b1_ref, w2_ref, b2_ref,
                       nw_ref, nb_ref, gamma_ref, o_ref, col_ref, *, n_valid):
    # x_ref: (B, H, W, Cp) bf16; col_ref scratch: (B*H*W, 9*Cmp) bf16
    B, H, W, Cp = x_ref.shape
    Cmp = w0_ref.shape[1]
    R = B * H * W

    def group_norm(t):                               # t: (R, Cmp) f32
        # GroupNorm(num_groups=1): per-sample stats over all of (H*W, Cmid).
        # Single pass: sum + sum-of-squares. Padded channels are exactly zero and
        # the divisor is the REAL element count, so padding does not bias stats.
        t3 = t.reshape(B, H * W, Cmp)
        s1 = jnp.sum(jnp.sum(t3, axis=2, keepdims=True), axis=1, keepdims=True)
        s2 = jnp.sum(jnp.sum(t3 * t3, axis=2, keepdims=True), axis=1, keepdims=True)
        inv_n = 1.0 / n_valid
        mu = s1 * inv_n
        var = s2 * inv_n - mu * mu
        tn = (t3 - mu) * jax.lax.rsqrt(var + _EPS)
        # padded channels of nw/nb are zero -> padded lanes stay exactly zero
        return tn.reshape(R, Cmp) * nw_ref[...] + nb_ref[...]

    # ---- conv0: 1x1, dim -> dim//4 (bf16 MXU matmul, f32 accumulation)
    xb = x_ref[...].reshape(R, Cp)
    h = jnp.dot(xb, w0_ref[...], preferred_element_type=jnp.float32) + b0_ref[...]
    h = _gelu(group_norm(h))

    # ---- conv1: 3x3, stride 1, pad 1 -> single im2col matmul with K = 9*Cmp
    hb = h.astype(jnp.bfloat16).reshape(B, H, W, Cmp)
    for dy in range(3):
        for dx in range(3):
            t = dy * 3 + dx
            col_ref[:, t * Cmp:(t + 1) * Cmp] = (
                _shift2d(hb, dy - 1, dx - 1).reshape(R, Cmp))
    h = jnp.dot(col_ref[...], w1_ref[...],
                preferred_element_type=jnp.float32) + b1_ref[...]
    h = _gelu(group_norm(h))

    # ---- conv2: 1x1, dim//4 -> dim
    y = jnp.dot(h.astype(jnp.bfloat16), w2_ref[...],
                preferred_element_type=jnp.float32) + b2_ref[...]

    # ---- layer scale + residual (drop_path is Identity at rate 0.0)
    y = y * gamma_ref[...]
    x_res = x_ref[...].reshape(R, Cp).astype(jnp.float32)   # re-read, don't keep live
    o_ref[...] = (x_res + y).reshape(B, H, W, Cp)


def _vmem_limit_bytes():
    try:
        cap = getattr(pltpu.get_tpu_info(), "vmem_capacity_bytes", None)
    except Exception:
        cap = None
    if cap is None:
        cap = 64 * 1024 * 1024
    return min(int(cap * 3 // 4), 100 * 1024 * 1024)


def _choose_b_tile(n, h, w, cp, cmp_):
    # rough per-sample VMEM bytes: double-buffered bf16 in + f32 out tiles,
    # im2col scratch (bf16) and ~4 live f32 activation temporaries.
    per_sample = ((h * w * cp * 2) * 2 + (h * w * cp * 4) * 2
                  + h * w * 9 * cmp_ * 2 + 4 * h * w * cmp_ * 4)
    budget = 20 * 1024 * 1024       # conservative: fits v7x's default scoped VMEM
    best = 1
    for cand in range(1, n + 1):
        if n % cand:
            continue
        if cand * per_sample > budget:
            continue
        if n >= 2 and n // cand < 2:
            continue                # keep grid >= 2 so both v7x TensorCores get work
        best = cand
    return best


def conv_block_forward(x_nchw, params):
    """Pallas implementation of ConvBlock.forward. Returns (out_nchw, None)."""
    N, C, H, W = x_nchw.shape
    Cmid = C // 4
    Cp = _round_up(C, 128)          # lane-dense channel padding
    Cmp = _round_up(Cmid, 128)

    # NHWC, bf16 matmul operands, zero-padded channels
    x = jnp.transpose(x_nchw, (0, 2, 3, 1)).astype(jnp.bfloat16)
    x = jnp.pad(x, ((0, 0), (0, 0), (0, 0), (0, Cp - C)))

    def pad2(a, r, c):
        return jnp.pad(a, ((0, r - a.shape[0]), (0, c - a.shape[1])))

    def padrow(a, c):               # (n,) -> (1, c), zero-padded
        return jnp.pad(a.reshape(1, -1), ((0, 0), (0, c - a.shape[0])))

    w0 = pad2(params["w0"], Cp, Cmp).astype(jnp.bfloat16)
    w1 = jnp.pad(params["w1_hwio"],
                 ((0, 0), (0, 0), (0, Cmp - Cmid), (0, Cmp - Cmid))
                 ).reshape(9 * Cmp, Cmp).astype(jnp.bfloat16)
    w2 = pad2(params["w2"], Cmp, Cp).astype(jnp.bfloat16)
    b0 = padrow(params["b0"], Cmp)
    b1 = padrow(params["b1"], Cmp)
    b2 = padrow(params["b2"], Cp)
    nw = padrow(params["nw"], Cmp)      # zero on padded channels (NOT one)
    nb = padrow(params["nb"], Cmp)
    gamma = padrow(params["gamma"], Cp)

    b_tile = _choose_b_tile(N, H, W, Cp, Cmp)
    grid = (N // b_tile,)

    kernel = functools.partial(_conv_block_kernel, n_valid=float(H * W * Cmid))

    def rep(shape):
        return pl.BlockSpec(shape, lambda b: (0,) * len(shape))

    # TODO(synk): for very large H*W*C tiles that exceed VMEM, add spatial tiling
    # with a two-pass GroupNorm (stats pass, then normalize pass).
    out_nhwc = pl.pallas_call(
        kernel,
        out_shape=jax.ShapeDtypeStruct((N, H, W, Cp), jnp.float32),
        grid_spec=pltpu.PrefetchScalarGridSpec(
            num_scalar_prefetch=0,
            grid=grid,
            in_specs=[
                pl.BlockSpec((b_tile, H, W, Cp), lambda b: (b, 0, 0, 0)),  # x
                rep((Cp, Cmp)),          # w0 (1x1)
                rep((1, Cmp)),           # b0
                rep((9 * Cmp, Cmp)),     # w1 (3x3 flattened HWIO)
                rep((1, Cmp)),           # b1
                rep((Cmp, Cp)),          # w2 (1x1)
                rep((1, Cp)),            # b2
                rep((1, Cmp)),           # norm weight
                rep((1, Cmp)),           # norm bias
                rep((1, Cp)),            # gamma (layer scale)
            ],
            out_specs=pl.BlockSpec((b_tile, H, W, Cp), lambda b: (b, 0, 0, 0)),
            scratch_shapes=[pltpu.VMEM((b_tile * H * W, 9 * Cmp), jnp.bfloat16)],
        ),
        compiler_params=pltpu.CompilerParams(
            dimension_semantics=("parallel",),
            vmem_limit_bytes=_vmem_limit_bytes(),
        ),
    )(x, w0, b0, w1, b1, w2, b2, nw, nb, gamma)

    out = jnp.transpose(out_nhwc[..., :C], (0, 3, 1, 2))
    return out, None


def _ref_forward(x_nchw, params):
    """Pure-JAX reference with the same bf16-operand / f32-accumulate policy."""
    def bf(a):
        return a.astype(jnp.bfloat16).astype(jnp.float32)

    x = bf(jnp.transpose(x_nchw, (0, 2, 3, 1)))
    w0, w1, w2 = bf(params["w0"]), bf(params["w1_hwio"]), bf(params["w2"])

    def gn(t):
        mu = jnp.mean(t, axis=(1, 2, 3), keepdims=True)
        var = jnp.mean((t - mu) ** 2, axis=(1, 2, 3), keepdims=True)
        tn = (t - mu) * jax.lax.rsqrt(var + _EPS)
        return tn * params["nw"].reshape(1, 1, 1, -1) + params["nb"].reshape(1, 1, 1, -1)

    h = jnp.einsum("nhwc,cd->nhwd", x, w0) + params["b0"].reshape(1, 1, 1, -1)
    h = _gelu(gn(h))
    h = jax.lax.conv_general_dilated(
        bf(h), w1, window_strides=(1, 1), padding="SAME",
        dimension_numbers=("NHWC", "HWIO", "NHWC"),
    ) + params["b1"].reshape(1, 1, 1, -1)
    h = _gelu(gn(h))
    y = jnp.einsum("nhwc,cd->nhwd", bf(h), w2) + params["b2"].reshape(1, 1, 1, -1)
    y = y * params["gamma"].reshape(1, 1, 1, -1)
    return jnp.transpose(x + y, (0, 3, 1, 2))


def make_params(dim, key, layer_scale_init_value=1e-6):
    Cmid = dim // 4
    ks = jax.random.split(key, 6)
    return {
        "w0": 0.2 * jax.random.normal(ks[0], (dim, Cmid), jnp.float32),
        "b0": 0.1 * jax.random.normal(ks[1], (Cmid,), jnp.float32),
        "w1_hwio": 0.2 * jax.random.normal(ks[2], (3, 3, Cmid, Cmid), jnp.float32),
        "b1": 0.1 * jax.random.normal(ks[3], (Cmid,), jnp.float32),
        "w2": 0.2 * jax.random.normal(ks[4], (Cmid, dim), jnp.float32),
        "b2": 0.1 * jax.random.normal(ks[5], (dim,), jnp.float32),
        "nw": jnp.ones((Cmid,), jnp.float32),       # GroupNorm affine defaults
        "nb": jnp.zeros((Cmid,), jnp.float32),
        "gamma": layer_scale_init_value * jnp.ones((dim,), jnp.float32),
    }


if __name__ == "__main__":
    key = jax.random.PRNGKey(0)
    k_x, k_p = jax.random.split(key)

    N, dim, H, W = 2, 32, 16, 16          # dim must be divisible by 4
    x = jax.random.normal(k_x, (N, dim, H, W), jnp.float32)
    # Use a non-trivial layer-scale value so the conv path actually shows up in the
    # numeric check (the default 1e-6 init would hide it under the residual).
    params = make_params(dim, k_p, layer_scale_init_value=0.5)

    out, aux = conv_block_forward(x, params)
    out = jax.block_until_ready(out)
    assert aux is None
    assert out.shape == x.shape

    ref = jax.block_until_ready(_ref_forward(x, params))
    assert jnp.allclose(out, ref, atol=2e-3, rtol=2e-3), "mismatch vs JAX reference"

    print("KERNEL_OK")
</pallas_src>

<mosaic_0001>
module attributes {stable_mosaic.version = 11 : i64} {
  func.func @_conv_block_kernel(%arg0: i32, %arg1: memref<1x16x16x128xbf16, #tpu.memory_space<vmem>>, %arg2: memref<128x128xbf16, #tpu.memory_space<vmem>>, %arg3: memref<1x128xf32, #tpu.memory_space<vmem>>, %arg4: memref<1152x128xbf16, #tpu.memory_space<vmem>>, %arg5: memref<1x128xf32, #tpu.memory_space<vmem>>, %arg6: memref<128x128xbf16, #tpu.memory_space<vmem>>, %arg7: memref<1x128xf32, #tpu.memory_space<vmem>>, %arg8: memref<1x128xf32, #tpu.memory_space<vmem>>, %arg9: memref<1x128xf32, #tpu.memory_space<vmem>>, %arg10: memref<1x128xf32, #tpu.memory_space<vmem>>, %arg11: memref<1x16x16x128xf32, #tpu.memory_space<vmem>>, %arg12: memref<256x1152xbf16, #tpu.memory_space<vmem>>) attributes {dimension_semantics = [#tpu.dimension_semantics<parallel>], iteration_bounds = array<i64: 2>, scalar_prefetch = 0 : i64, scratch_operands = 1 : i64, tpu.core_type = #tpu.core_type<tc>, window_params = [{transform_indices = @transform_0, window_bounds = array<i64: 1, 16, 16, 128>}, {pipeline_mode = #tpu.pipeline_mode<synchronous>, transform_indices = @transform_1, window_bounds = array<i64: 128, 128>}, {pipeline_mode = #tpu.pipeline_mode<synchronous>, transform_indices = @transform_2, window_bounds = array<i64: 1, 128>}, {pipeline_mode = #tpu.pipeline_mode<synchronous>, transform_indices = @transform_3, window_bounds = array<i64: 1152, 128>}, {pipeline_mode = #tpu.pipeline_mode<synchronous>, transform_indices = @transform_4, window_bounds = array<i64: 1, 128>}, {pipeline_mode = #tpu.pipeline_mode<synchronous>, transform_indices = @transform_5, window_bounds = array<i64: 128, 128>}, {pipeline_mode = #tpu.pipeline_mode<synchronous>, transform_indices = @transform_6, window_bounds = array<i64: 1, 128>}, {pipeline_mode = #tpu.pipeline_mode<synchronous>, transform_indices = @transform_7, window_bounds = array<i64: 1, 128>}, {pipeline_mode = #tpu.pipeline_mode<synchronous>, transform_indices = @transform_8, window_bounds = array<i64: 1, 128>}, {pipeline_mode = #tpu.pipeline_mode<synchronous>, transform_indices = @transform_9, window_bounds = array<i64: 1, 128>}, {transform_indices = @transform_10, window_bounds = array<i64: 1, 16, 16, 128>}]} {
    %c0 = arith.constant 0 : index
    %c0_0 = arith.constant 0 : index
    %c0_1 = arith.constant 0 : index
    %c0_2 = arith.constant 0 : index
    %0 = vector.load %arg1[%c0, %c0_0, %c0_1, %c0_2] : memref<1x16x16x128xbf16, #tpu.memory_space<vmem>>, vector<1x16x16x128xbf16>
    %1 = vector.shape_cast %0 : vector<1x16x16x128xbf16> to vector<256x128xbf16>
    %c0_3 = arith.constant 0 : index
    %c0_4 = arith.constant 0 : index
    %2 = vector.load %arg2[%c0_3, %c0_4] : memref<128x128xbf16, #tpu.memory_space<vmem>>, vector<128x128xbf16>
    %cst = arith.constant dense<0.000000e+00> : vector<256x128xf32>
    %3 = tpu.matmul %1, %2, %cst {dimension_numbers = #tpu.dot_dimension_numbers<[1], [0], [0], [1], [0, 0, 1, 1], [], []>} : vector<256x128xbf16>, vector<128x128xbf16>, vector<256x128xf32> -> vector<256x128xf32>
    %c0_5 = arith.constant 0 : index
    %c0_6 = arith.constant 0 : index
    %4 = vector.load %arg3[%c0_5, %c0_6] : memref<1x128xf32, #tpu.memory_space<vmem>>, vector<1x128xf32>
    %5 = vector.broadcast %4 : vector<1x128xf32> to vector<256x128xf32>
    %6 = arith.addf %3, %5 : vector<256x128xf32>
    %7 = vector.shape_cast %6 : vector<256x128xf32> to vector<1x256x128xf32>
    %cst_7 = arith.constant dense<0.000000e+00> : vector<1x256xf32>
    %8 = vector.multi_reduction <add>, %7, %cst_7 [2] : vector<1x256x128xf32> to vector<1x256xf32>
    %9 = vector.shape_cast %8 : vector<1x256xf32> to vector<1x256x1xf32>
    %cst_8 = arith.constant dense<0.000000e+00> : vector<1x1xf32>
    %10 = vector.multi_reduction <add>, %9, %cst_8 [1] : vector<1x256x1xf32> to vector<1x1xf32>
    %11 = vector.shape_cast %10 : vector<1x1xf32> to vector<1x1x1xf32>
    %12 = arith.mulf %7, %7 : vector<1x256x128xf32>
    %cst_9 = arith.constant dense<0.000000e+00> : vector<1x256xf32>
    %13 = vector.multi_reduction <add>, %12, %cst_9 [2] : vector<1x256x128xf32> to vector<1x256xf32>
    %14 = vector.shape_cast %13 : vector<1x256xf32> to vector<1x256x1xf32>
    %cst_10 = arith.constant dense<0.000000e+00> : vector<1x1xf32>
    %15 = vector.multi_reduction <add>, %14, %cst_10 [1] : vector<1x256x1xf32> to vector<1x1xf32>
    %16 = vector.shape_cast %15 : vector<1x1xf32> to vector<1x1x1xf32>
    %cst_11 = arith.constant 4.8828125E-4 : f32
    %17 = vector.broadcast %cst_11 : f32 to vector<1x1x1xf32>
    %18 = arith.mulf %11, %17 : vector<1x1x1xf32>
    %cst_12 = arith.constant 4.8828125E-4 : f32
    %19 = vector.broadcast %cst_12 : f32 to vector<1x1x1xf32>
    %20 = arith.mulf %16, %19 : vector<1x1x1xf32>
    %21 = arith.mulf %18, %18 : vector<1x1x1xf32>
    %22 = arith.subf %20, %21 : vector<1x1x1xf32>
    %23 = vector.broadcast %18 : vector<1x1x1xf32> to vector<1x256x128xf32>
    %24 = arith.subf %7, %23 : vector<1x256x128xf32>
    %cst_13 = arith.constant 9.99999974E-6 : f32
    %25 = vector.broadcast %cst_13 : f32 to vector<1x1x1xf32>
    %26 = arith.addf %22, %25 : vector<1x1x1xf32>
    %27 = math.rsqrt %26 : vector<1x1x1xf32>
    %28 = vector.broadcast %27 : vector<1x1x1xf32> to vector<1x256x128xf32>
    %29 = arith.mulf %24, %28 : vector<1x256x128xf32>
    %30 = vector.shape_cast %29 : vector<1x256x128xf32> to vector<256x128xf32>
    %c0_14 = arith.constant 0 : index
    %c0_15 = arith.constant 0 : index
    %31 = vector.load %arg8[%c0_14, %c0_15] : memref<1x128xf32, #tpu.memory_space<vmem>>, vector<1x128xf32>
    %32 = vector.broadcast %31 : vector<1x128xf32> to vector<256x128xf32>
    %33 = arith.mulf %30, %32 : vector<256x128xf32>
    %c0_16 = arith.constant 0 : index
    %c0_17 = arith.constant 0 : index
    %34 = vector.load %arg9[%c0_16, %c0_17] : memref<1x128xf32, #tpu.memory_space<vmem>>, vector<1x128xf32>
    %35 = vector.broadcast %34 : vector<1x128xf32> to vector<256x128xf32>
    %36 = arith.addf %33, %35 : vector<256x128xf32>
    %cst_18 = arith.constant 5.000000e-01 : f32
    %37 = vector.broadcast %cst_18 : f32 to vector<256x128xf32>
    %38 = arith.mulf %37, %36 : vector<256x128xf32>
    %cst_19 = arith.constant 0.707106769 : f32
    %39 = vector.broadcast %cst_19 : f32 to vector<256x128xf32>
    %40 = arith.mulf %36, %39 : vector<256x128xf32>
    %41 = math.erf %40 : vector<256x128xf32>
    %cst_20 = arith.constant 1.000000e+00 : f32
    %42 = vector.broadcast %cst_20 : f32 to vector<256x128xf32>
    %43 = arith.addf %42, %41 : vector<256x128xf32>
    %44 = arith.mulf %38, %43 : vector<256x128xf32>
    %45 = arith.truncf %44 : vector<256x128xf32> to vector<256x128xbf16>
    %46 = vector.shape_cast %45 : vector<256x128xbf16> to vector<1x16x16x128xbf16>
    %cst_21 = arith.constant 0.000000e+00 : bf16
    %47 = vector.broadcast %cst_21 : bf16 to vector<1x1x16x128xbf16>
    %48 = vector.extract_strided_slice %46 {offsets = [0, 0, 0, 0], sizes = [1, 15, 16, 128], strides = [1, 1, 1, 1]} : vector<1x16x16x128xbf16> to vector<1x15x16x128xbf16>
    %49 = tpu.concatenate %47, %48 in 1 : vector<1x1x16x128xbf16>, vector<1x15x16x128xbf16> -> vector<1x16x16x128xbf16>
    %cst_22 = arith.constant 0.000000e+00 : bf16
    %50 = vector.broadcast %cst_22 : bf16 to vector<1x16x1x128xbf16>
    %51 = vector.extract_strided_slice %49 {offsets = [0, 0, 0, 0], sizes = [1, 16, 15, 128], strides = [1, 1, 1, 1]} : vector<1x16x16x128xbf16> to vector<1x16x15x128xbf16>
    %52 = tpu.concatenate %50, %51 in 2 : vector<1x16x1x128xbf16>, vector<1x16x15x128xbf16> -> vector<1x16x16x128xbf16>
    %53 = vector.shape_cast %52 : vector<1x16x16x128xbf16> to vector<256x128xbf16>
    %c0_23 = arith.constant 0 : index
    %c0_24 = arith.constant 0 : index
    %54 = vector.load %arg12[%c0_23, %c0_24] : memref<256x1152xbf16, #tpu.memory_space<vmem>>, vector<256x128xbf16>
    tpu.vector_store %arg12[%c0_23, %c0_24], %53 {strides = array<i32>} : memref<256x1152xbf16, #tpu.memory_space<vmem>>, vector<256x128xbf16>,
    %cst_25 = arith.constant 0.000000e+00 : bf16
    %55 = vector.broadcast %cst_25 : bf16 to vector<1x1x16x128xbf16>
    %56 = vector.extract_strided_slice %46 {offsets = [0, 0, 0, 0], sizes = [1, 15, 16, 128], strides = [1, 1, 1, 1]} : vector<1x16x16x128xbf16> to vector<1x15x16x128xbf16>
    %57 = tpu.concatenate %55, %56 in 1 : vector<1x1x16x128xbf16>, vector<1x15x16x128xbf16> -> vector<1x16x16x128xbf16>
    %58 = vector.shape_cast %57 : vector<1x16x16x128xbf16> to vector<256x128xbf16>
    %c0_26 = arith.constant 0 : index
    %c128 = arith.constant 128 : index
    %59 = vector.load %arg12[%c0_26, %c128] : memref<256x1152xbf16, #tpu.memory_space<vmem>>, vector<256x128xbf16>
    tpu.vector_store %arg12[%c0_26, %c128], %58 {strides = array<i32>} : memref<256x1152xbf16, #tpu.memory_space<vmem>>, vector<256x128xbf16>,
    %cst_27 = arith.constant 0.000000e+00 : bf16
    %60 = vector.broadcast %cst_27 : bf16 to vector<1x1x16x128xbf16>
    %61 = vector.extract_strided_slice %46 {offsets = [0, 0, 0, 0], sizes = [1, 15, 16, 128], strides = [1, 1, 1, 1]} : vector<1x16x16x128xbf16> to vector<1x15x16x128xbf16>
    %62 = tpu.concatenate %60, %61 in 1 : vector<1x1x16x128xbf16>, vector<1x15x16x128xbf16> -> vector<1x16x16x128xbf16>
    %63 = vector.extract_strided_slice %62 {offsets = [0, 0, 1, 0], sizes = [1, 16, 15, 128], strides = [1, 1, 1, 1]} : vector<1x16x16x128xbf16> to vector<1x16x15x128xbf16>
    %cst_28 = arith.constant 0.000000e+00 : bf16
    %64 = vector.broadcast %cst_28 : bf16 to vector<1x16x1x128xbf16>
    %65 = tpu.concatenate %63, %64 in 2 : vector<1x16x15x128xbf16>, vector<1x16x1x128xbf16> -> vector<1x16x16x128xbf16>
    %66 = vector.shape_cast %65 : vector<1x16x16x128xbf16> to vector<256x128xbf16>
    %c0_29 = arith.constant 0 : index
    %c256 = arith.constant 256 : index
    %67 = vector.load %arg12[%c0_29, %c256] : memref<256x1152xbf16, #tpu.memory_space<vmem>>, vector<256x128xbf16>
    tpu.vector_store %arg12[%c0_29, %c256], %66 {strides = array<i32>} : memref<256x1152xbf16, #tpu.memory_space<vmem>>, vector<256x128xbf16>,
    %cst_30 = arith.constant 0.000000e+00 : bf16
    %68 = vector.broadcast %cst_30 : bf16 to vector<1x16x1x128xbf16>
    %69 = vector.extract_strided_slice %46 {offsets = [0, 0, 0, 0], sizes = [1, 16, 15, 128], strides = [1, 1, 1, 1]} : vector<1x16x16x128xbf16> to vector<1x16x15x128xbf16>
    %70 = tpu.concatenate %68, %69 in 2 : vector<1x16x1x128xbf16>, vector<1x16x15x128xbf16> -> vector<1x16x16x128xbf16>
    %71 = vector.shape_cast %70 : vector<1x16x16x128xbf16> to vector<256x128xbf16>
    %c0_31 = arith.constant 0 : index
    %c384 = arith.constant 384 : index
    %72 = vector.load %arg12[%c0_31, %c384] : memref<256x1152xbf16, #tpu.memory_space<vmem>>, vector<256x128xbf16>
    tpu.vector_store %arg12[%c0_31, %c384], %71 {strides = array<i32>} : memref<256x1152xbf16, #tpu.memory_space<vmem>>, vector<256x128xbf16>,
    %73 = vector.shape_cast %46 : vector<1x16x16x128xbf16> to vector<256x128xbf16>
    %c0_32 = arith.constant 0 : index
    %c512 = arith.constant 512 : index
    %74 = vector.load %arg12[%c0_32, %c512] : memref<256x1152xbf16, #tpu.memory_space<vmem>>, vector<256x128xbf16>
    tpu.vector_store %arg12[%c0_32, %c512], %73 {strides = array<i32>} : memref<256x1152xbf16, #tpu.memory_space<vmem>>, vector<256x128xbf16>,
    %75 = vector.extract_strided_slice %46 {offsets = [0, 0, 1, 0], sizes = [1, 16, 15, 128], strides = [1, 1, 1, 1]} : vector<1x16x16x128xbf16> to vector<1x16x15x128xbf16>
    %cst_33 = arith.constant 0.000000e+00 : bf16
    %76 = vector.broadcast %cst_33 : bf16 to vector<1x16x1x128xbf16>
    %77 = tpu.concatenate %75, %76 in 2 : vector<1x16x15x128xbf16>, vector<1x16x1x128xbf16> -> vector<1x16x16x128xbf16>
    %78 = vector.shape_cast %77 : vector<1x16x16x128xbf16> to vector<256x128xbf16>
    %c0_34 = arith.constant 0 : index
    %c640 = arith.constant 640 : index
    %79 = vector.load %arg12[%c0_34, %c640] : memref<256x1152xbf16, #tpu.memory_space<vmem>>, vector<256x128xbf16>
    tpu.vector_store %arg12[%c0_34, %c640], %78 {strides = array<i32>} : memref<256x1152xbf16, #tpu.memory_space<vmem>>, vector<256x128xbf16>,
    %80 = vector.extract_strided_slice %46 {offsets = [0, 1, 0, 0], sizes = [1, 15, 16, 128], strides = [1, 1, 1, 1]} : vector<1x16x16x128xbf16> to vector<1x15x16x128xbf16>
    %cst_35 = arith.constant 0.000000e+00 : bf16
    %81 = vector.broadcast %cst_35 : bf16 to vector<1x1x16x128xbf16>
    %82 = tpu.concatenate %80, %81 in 1 : vector<1x15x16x128xbf16>, vector<1x1x16x128xbf16> -> vector<1x16x16x128xbf16>
    %cst_36 = arith.constant 0.000000e+00 : bf16
    %83 = vector.broadcast %cst_36 : bf16 to vector<1x16x1x128xbf16>
    %84 = vector.extract_strided_slice %82 {offsets = [0, 0, 0, 0], sizes = [1, 16, 15, 128], strides = [1, 1, 1, 1]} : vector<1x16x16x128xbf16> to vector<1x16x15x128xbf16>
    %85 = tpu.concatenate %83, %84 in 2 : vector<1x16x1x128xbf16>, vector<1x16x15x128xbf16> -> vector<1x16x16x128xbf16>
    %86 = vector.shape_cast %85 : vector<1x16x16x128xbf16> to vector<256x128xbf16>
    %c0_37 = arith.constant 0 : index
    %c768 = arith.constant 768 : index
    %87 = vector.load %arg12[%c0_37, %c768] : memref<256x1152xbf16, #tpu.memory_space<vmem>>, vector<256x128xbf16>
    tpu.vector_store %arg12[%c0_37, %c768], %86 {strides = array<i32>} : memref<256x1152xbf16, #tpu.memory_space<vmem>>, vector<256x128xbf16>,
    %88 = vector.extract_strided_slice %46 {offsets = [0, 1, 0, 0], sizes = [1, 15, 16, 128], strides = [1, 1, 1, 1]} : vector<1x16x16x128xbf16> to vector<1x15x16x128xbf16>
    %cst_38 = arith.constant 0.000000e+00 : bf16
    %89 = vector.broadcast %cst_38 : bf16 to vector<1x1x16x128xbf16>
    %90 = tpu.concatenate %88, %89 in 1 : vector<1x15x16x128xbf16>, vector<1x1x16x128xbf16> -> vector<1x16x16x128xbf16>
    %91 = vector.shape_cast %90 : vector<1x16x16x128xbf16> to vector<256x128xbf16>
    %c0_39 = arith.constant 0 : index
    %c896 = arith.constant 896 : index
    %92 = vector.load %arg12[%c0_39, %c896] : memref<256x1152xbf16, #tpu.memory_space<vmem>>, vector<256x128xbf16>
    tpu.vector_store %arg12[%c0_39, %c896], %91 {strides = array<i32>} : memref<256x1152xbf16, #tpu.memory_space<vmem>>, vector<256x128xbf16>,
    %93 = vector.extract_strided_slice %46 {offsets = [0, 1, 0, 0], sizes = [1, 15, 16, 128], strides = [1, 1, 1, 1]} : vector<1x16x16x128xbf16> to vector<1x15x16x128xbf16>
    %cst_40 = arith.constant 0.000000e+00 : bf16
    %94 = vector.broadcast %cst_40 : bf16 to vector<1x1x16x128xbf16>
    %95 = tpu.concatenate %93, %94 in 1 : vector<1x15x16x128xbf16>, vector<1x1x16x128xbf16> -> vector<1x16x16x128xbf16>
    %96 = vector.extract_strided_slice %95 {offsets = [0, 0, 1, 0], sizes = [1, 16, 15, 128], strides = [1, 1, 1, 1]} : vector<1x16x16x128xbf16> to vector<1x16x15x128xbf16>
    %cst_41 = arith.constant 0.000000e+00 : bf16
    %97 = vector.broadcast %cst_41 : bf16 to vector<1x16x1x128xbf16>
    %98 = tpu.concatenate %96, %97 in 2 : vector<1x16x15x128xbf16>, vector<1x16x1x128xbf16> -> vector<1x16x16x128xbf16>
    %99 = vector.shape_cast %98 : vector<1x16x16x128xbf16> to vector<256x128xbf16>
    %c0_42 = arith.constant 0 : index
    %c1024 = arith.constant 1024 : index
    %100 = vector.load %arg12[%c0_42, %c1024] : memref<256x1152xbf16, #tpu.memory_space<vmem>>, vector<256x128xbf16>
    tpu.vector_store %arg12[%c0_42, %c1024], %99 {strides = array<i32>} : memref<256x1152xbf16, #tpu.memory_space<vmem>>, vector<256x128xbf16>,
    %c0_43 = arith.constant 0 : index
    %c0_44 = arith.constant 0 : index
    %101 = vector.load %arg12[%c0_43, %c0_44] : memref<256x1152xbf16, #tpu.memory_space<vmem>>, vector<256x1152xbf16>
    %c0_45 = arith.constant 0 : index
    %c0_46 = arith.constant 0 : index
    %102 = vector.load %arg4[%c0_45, %c0_46] : memref<1152x128xbf16, #tpu.memory_space<vmem>>, vector<1152x128xbf16>
    %cst_47 = arith.constant dense<0.000000e+00> : vector<256x128xf32>
    %103 = tpu.matmul %101, %102, %cst_47 {dimension_numbers = #tpu.dot_dimension_numbers<[1], [0], [0], [1], [0, 0, 1, 1], [], []>} : vector<256x1152xbf16>, vector<1152x128xbf16>, vector<256x128xf32> -> vector<256x128xf32>
    %c0_48 = arith.constant 0 : index
    %c0_49 = arith.constant 0 : index
    %104 = vector.load %arg5[%c0_48, %c0_49] : memref<1x128xf32, #tpu.memory_space<vmem>>, vector<1x128xf32>
    %105 = vector.broadcast %104 : vector<1x128xf32> to vector<256x128xf32>
    %106 = arith.addf %103, %105 : vector<256x128xf32>
    %107 = vector.shape_cast %106 : vector<256x128xf32> to vector<1x256x128xf32>
    %cst_50 = arith.constant dense<0.000000e+00> : vector<1x256xf32>
    %108 = vector.multi_reduction <add>, %107, %cst_50 [2] : vector<1x256x128xf32> to vector<1x256xf32>
    %109 = vector.shape_cast %108 : vector<1x256xf32> to vector<1x256x1xf32>
    %cst_51 = arith.constant dense<0.000000e+00> : vector<1x1xf32>
    %110 = vector.multi_reduction <add>, %109, %cst_51 [1] : vector<1x256x1xf32> to vector<1x1xf32>
    %111 = vector.shape_cast %110 : vector<1x1xf32> to vector<1x1x1xf32>
    %112 = arith.mulf %107, %107 : vector<1x256x128xf32>
    %cst_52 = arith.constant dense<0.000000e+00> : vector<1x256xf32>
    %113 = vector.multi_reduction <add>, %112, %cst_52 [2] : vector<1x256x128xf32> to vector<1x256xf32>
    %114 = vector.shape_cast %113 : vector<1x256xf32> to vector<1x256x1xf32>
    %cst_53 = arith.constant dense<0.000000e+00> : vector<1x1xf32>
    %115 = vector.multi_reduction <add>, %114, %cst_53 [1] : vector<1x256x1xf32> to vector<1x1xf32>
    %116 = vector.shape_cast %115 : vector<1x1xf32> to vector<1x1x1xf32>
    %cst_54 = arith.constant 4.8828125E-4 : f32
    %117 = vector.broadcast %cst_54 : f32 to vector<1x1x1xf32>
    %118 = arith.mulf %111, %117 : vector<1x1x1xf32>
    %cst_55 = arith.constant 4.8828125E-4 : f32
    %119 = vector.broadcast %cst_55 : f32 to vector<1x1x1xf32>
    %120 = arith.mulf %116, %119 : vector<1x1x1xf32>
    %121 = arith.mulf %118, %118 : vector<1x1x1xf32>
    %122 = arith.subf %120, %121 : vector<1x1x1xf32>
    %123 = vector.broadcast %118 : vector<1x1x1xf32> to vector<1x256x128xf32>
    %124 = arith.subf %107, %123 : vector<1x256x128xf32>
    %cst_56 = arith.constant 9.99999974E-6 : f32
    %125 = vector.broadcast %cst_56 : f32 to vector<1x1x1xf32>
    %126 = arith.addf %122, %125 : vector<1x1x1xf32>
    %127 = math.rsqrt %126 : vector<1x1x1xf32>
    %128 = vector.broadcast %127 : vector<1x1x1xf32> to vector<1x256x128xf32>
    %129 = arith.mulf %124, %128 : vector<1x256x128xf32>
    %130 = vector.shape_cast %129 : vector<1x256x128xf32> to vector<256x128xf32>
    %c0_57 = arith.constant 0 : index
    %c0_58 = arith.constant 0 : index
    %131 = vector.load %arg8[%c0_57, %c0_58] : memref<1x128xf32, #tpu.memory_space<vmem>>, vector<1x128xf32>
    %132 = vector.broadcast %131 : vector<1x128xf32> to vector<256x128xf32>
    %133 = arith.mulf %130, %132 : vector<256x128xf32>
    %c0_59 = arith.constant 0 : index
    %c0_60 = arith.constant 0 : index
    %134 = vector.load %arg9[%c0_59, %c0_60] : memref<1x128xf32, #tpu.memory_space<vmem>>, vector<1x128xf32>
    %135 = vector.broadcast %134 : vector<1x128xf32> to vector<256x128xf32>
    %136 = arith.addf %133, %135 : vector<256x128xf32>
    %cst_61 = arith.constant 5.000000e-01 : f32
    %137 = vector.broadcast %cst_61 : f32 to vector<256x128xf32>
    %138 = arith.mulf %137, %136 : vector<256x128xf32>
    %cst_62 = arith.constant 0.707106769 : f32
    %139 = vector.broadcast %cst_62 : f32 to vector<256x128xf32>
    %140 = arith.mulf %136, %139 : vector<256x128xf32>
    %141 = math.erf %140 : vector<256x128xf32>
    %cst_63 = arith.constant 1.000000e+00 : f32
    %142 = vector.broadcast %cst_63 : f32 to vector<256x128xf32>
    %143 = arith.addf %142, %141 : vector<256x128xf32>
    %144 = arith.mulf %138, %143 : vector<256x128xf32>
    %145 = arith.truncf %144 : vector<256x128xf32> to vector<256x128xbf16>
    %c0_64 = arith.constant 0 : index
    %c0_65 = arith.constant 0 : index
    %146 = vector.load %arg6[%c0_64, %c0_65] : memref<128x128xbf16, #tpu.memory_space<vmem>>, vector<128x128xbf16>
    %cst_66 = arith.constant dense<0.000000e+00> : vector<256x128xf32>
    %147 = tpu.matmul %145, %146, %cst_66 {dimension_numbers = #tpu.dot_dimension_numbers<[1], [0], [0], [1], [0, 0, 1, 1], [], []>} : vector<256x128xbf16>, vector<128x128xbf16>, vector<256x128xf32> -> vector<256x128xf32>
    %c0_67 = arith.constant 0 : index
    %c0_68 = arith.constant 0 : index
    %148 = vector.load %arg7[%c0_67, %c0_68] : memref<1x128xf32, #tpu.memory_space<vmem>>, vector<1x128xf32>
    %149 = vector.broadcast %148 : vector<1x128xf32> to vector<256x128xf32>
    %150 = arith.addf %147, %149 : vector<256x128xf32>
    %c0_69 = arith.constant 0 : index
    %c0_70 = arith.constant 0 : index
    %151 = vector.load %arg10[%c0_69, %c0_70] : memref<1x128xf32, #tpu.memory_space<vmem>>, vector<1x128xf32>
    %152 = vector.broadcast %151 : vector<1x128xf32> to vector<256x128xf32>
    %153 = arith.mulf %150, %152 : vector<256x128xf32>
    %c0_71 = arith.constant 0 : index
    %c0_72 = arith.constant 0 : index
    %c0_73 = arith.constant 0 : index
    %c0_74 = arith.constant 0 : index
    %154 = vector.load %arg1[%c0_71, %c0_72, %c0_73, %c0_74] : memref<1x16x16x128xbf16, #tpu.memory_space<vmem>>, vector<1x16x16x128xbf16>
    %155 = vector.shape_cast %154 : vector<1x16x16x128xbf16> to vector<256x128xbf16>
    %156 = arith.extf %155 : vector<256x128xbf16> to vector<256x128xf32>
    %157 = arith.addf %156, %153 : vector<256x128xf32>
    %158 = vector.shape_cast %157 : vector<256x128xf32> to vector<1x16x16x128xf32>
    %c0_75 = arith.constant 0 : index
    %c0_76 = arith.constant 0 : index
    %c0_77 = arith.constant 0 : index
    %c0_78 = arith.constant 0 : index
    %159 = vector.load %arg11[%c0_75, %c0_76, %c0_77, %c0_78] : memref<1x16x16x128xf32, #tpu.memory_space<vmem>>, vector<1x16x16x128xf32>
    tpu.vector_store %arg11[%c0_75, %c0_76, %c0_77, %c0_78], %158 {strides = array<i32>} : memref<1x16x16x128xf32, #tpu.memory_space<vmem>>, vector<1x16x16x128xf32>,
    return
  }
  func.func @transform_0(%arg0: i32) -> (i32, i32, i32, i32) {
    %c0_i32 = arith.constant 0 : i32
    %c0_i32_0 = arith.constant 0 : i32
    %c0_i32_1 = arith.constant 0 : i32
    %c0_i32_2 = arith.constant 0 : i32
    return %arg0, %c0_i32, %c0_i32_0, %c0_i32_1 : i32, i32, i32, i32
  }
  func.func @transform_1(%arg0: i32) -> (i32, i32) {
    %c0_i32 = arith.constant 0 : i32
    %c0_i32_0 = arith.constant 0 : i32
    %c0_i32_1 = arith.constant 0 : i32
    return %c0_i32, %c0_i32_0 : i32, i32
  }
  func.func @transform_2(%arg0: i32) -> (i32, i32) {
    %c0_i32 = arith.constant 0 : i32
    %c0_i32_0 = arith.constant 0 : i32
    %c0_i32_1 = arith.constant 0 : i32
    return %c0_i32, %c0_i32_0 : i32, i32
  }
  func.func @transform_3(%arg0: i32) -> (i32, i32) {
    %c0_i32 = arith.constant 0 : i32
    %c0_i32_0 = arith.constant 0 : i32
    %c0_i32_1 = arith.constant 0 : i32
    return %c0_i32, %c0_i32_0 : i32, i32
  }
  func.func @transform_4(%arg0: i32) -> (i32, i32) {
    %c0_i32 = arith.constant 0 : i32
    %c0_i32_0 = arith.constant 0 : i32
    %c0_i32_1 = arith.constant 0 : i32
    return %c0_i32, %c0_i32_0 : i32, i32
  }
  func.func @transform_5(%arg0: i32) -> (i32, i32) {
    %c0_i32 = arith.constant 0 : i32
    %c0_i32_0 = arith.constant 0 : i32
    %c0_i32_1 = arith.constant 0 : i32
    return %c0_i32, %c0_i32_0 : i32, i32
  }
  func.func @transform_6(%arg0: i32) -> (i32, i32) {
    %c0_i32 = arith.constant 0 : i32
    %c0_i32_0 = arith.constant 0 : i32
    %c0_i32_1 = arith.constant 0 : i32
    return %c0_i32, %c0_i32_0 : i32, i32
  }
  func.func @transform_7(%arg0: i32) -> (i32, i32) {
    %c0_i32 = arith.constant 0 : i32
    %c0_i32_0 = arith.constant 0 : i32
    %c0_i32_1 = arith.constant 0 : i32
    return %c0_i32, %c0_i32_0 : i32, i32
  }
  func.func @transform_8(%arg0: i32) -> (i32, i32) {
    %c0_i32 = arith.constant 0 : i32
    %c0_i32_0 = arith.constant 0 : i32
    %c0_i32_1 = arith.constant 0 : i32
    return %c0_i32, %c0_i32_0 : i32, i32
  }
  func.func @transform_9(%arg0: i32) -> (i32, i32) {
    %c0_i32 = arith.constant 0 : i32
    %c0_i32_0 = arith.constant 0 : i32
    %c0_i32_1 = arith.constant 0 : i32
    return %c0_i32, %c0_i32_0 : i32, i32
  }
  func.func @transform_10(%arg0: i32) -> (i32, i32, i32, i32) {
    %c0_i32 = arith.constant 0 : i32
    %c0_i32_0 = arith.constant 0 : i32
    %c0_i32_1 = arith.constant 0 : i32
    %c0_i32_2 = arith.constant 0 : i32
    return %arg0, %c0_i32, %c0_i32_0, %c0_i32_1 : i32, i32, i32, i32
  }
}

</mosaic_0001>

<bundles_post_ra>
// kernel: tpu_custom_call.1
= control target key start
LH: loop header
LB: loop body
LE: loop exit
PB: predicated region body
PF: predicated region fallthrough
CT: control target
= control target key end

     0   :  { %s7838_s0 = inlined_call_operand.hbm [shape: bf16[2,16,16,128], index: 0, kind: input, shape index: {}]   ;;  %s7839_s1 = inlined_call_operand.hbm [shape: bf16[128,128], index: 1, kind: input, shape index: {}]   ;;  %s7840_s2 = inlined_call_operand.vmem [shape: f32[1,128], index: 2, kind: input, shape index: {}]   ;;  %s7841_s3 = inlined_call_operand.hbm [shape: bf16[1152,128], index: 3, kind: input, shape index: {}]   ;;  %s7842_s4 = inlined_call_operand.vmem [shape: f32[1,128], index: 4, kind: input, shape index: {}]   ;;  %s7843_s5 = inlined_call_operand.hbm [shape: bf16[128,128], index: 5, kind: input, shape index: {}]   ;;  %s7844_s6 = inlined_call_operand.vmem [shape: f32[1,128], index: 6, kind: input, shape index: {}]   ;;  %s7845_s7 = inlined_call_operand.vmem [shape: f32[1,128], index: 7, kind: input, shape index: {}]   ;;  %s7846_s8 = inlined_call_operand.vmem [shape: f32[1,128], index: 8, kind: input, shape index: {}]   ;;  %s7847_s9 = inlined_call_operand.vmem [shape: f32[1,128], index: 9, kind: input, shape index: {}]   ;;  %s7848_s10 = inlined_call_operand.hbm [shape: f32[2,16,16,128], index: 10, kind: output, shape index: {}]  }
   0x1   :  { %7880 = sst [smem:[#allocation32_spill]] %s7847_s9 }
   0x2   :  { %7881 = sst [smem:[#allocation33_spill]] %s7848_s10 }
   0x3   :  { %15 = vsyncpa [#allocation4], 0 }
   0x4   :  { %17 = vsyncpa [#allocation4 + $0x1], 0 }
   0x5   :  { %18 = vsyncpa [#allocation7], 0 }
   0x6   :  { %19 = vsyncpa [#allocation10], 0 }
   0x7   :  { %20 = vsyncpa [#allocation5], 0 }
   0x8   :  { %22 = vsyncpa [#allocation5 + $0x1], 0  ;;  %s5783_s13 = smov 0   ;;  %s5785_s14 = smov 0  }
   0x9   :  { %s5787_s15 = smov 0   ;;  %s5789_s16 = smov 0  }
   0xa LB: > { %7882 = sst [smem:[#allocation16_spill]] %s5704_s13  ;;  %s5804_s17 = sadd.s32 4294967295, %s5716_s16   ;;  %s5716_s16 = sphi %s5789_s16, %s7958_s16   ;;  %s5712_s15 = sphi %s5787_s15, %s7957_s15   ;;  %s5708_s14 = sphi %s5785_s14, %s7956_s14   ;;  %s5704_s13 = sphi %s5783_s13, %s7955_s13  }
   0xb   : > { %s4317_s18 = sadd.s32 4294967294, %s5716_s16   ;;  %p48_p0 = scmp.ne.s32.totalorder %s5708_s14, %s5704_s13 }
   0xc   : > { %p7849_p1 = scmp.eq.s32.totalorder %s5804_s17, 0  ;;  %p267_p3 = scmp.eq.s32.totalorder %s4317_s18, 1 }
   0xd   : > { %p4318_p5 = scmp.ge.s32.totalorder %s5716_s16, 1  ;;  %p274_p7 = scmp.lt.s32.totalorder %s5716_s16, 3 }
   0xe   : > { %p5813_p4 = por %p7849_p1, %p48_p0  ;;  %p5818_p6 = por %p267_p3, %p48_p0 }
   0xf   : > { %p5823_p8 = pnand %p4318_p5, %p274_p7  ;;  %s5718_s22 = smov [#allocation6]  }
  0x10   : > { %s7883_s19 = scalar_select %p5813_p4, 1, 0 }
  0x11   : > { %s7884_s20 = scalar_select %p5818_p6, 1, 0 }
  0x12   : > { %s7886_s21 = scalar_select %p5823_p8, 1, 0 }
  0x13   : > { %7885 = sst [smem:[#allocation17_spill]] %s7884_s20  ;;  %s286_s23 = sshll.u32 %s5718_s22, 4  ;;  %s5827_s23 = int_to_ptr.vmem [resolvable:$true] %s286_s23 }
  0x14   : > { %p5226_p9 = pneg %p5823_p8  ;;  %s5719_s25 = smov [#allocation8]  }
  0x15   : > { %s302_s26 = sshll.u32 %s5719_s25, 4  ;;  %s5720_s27 = smov [#allocation9]   ;;  %s5838_s26 = int_to_ptr.vmem [resolvable:$true] %s302_s26 }
  0x16   : > { %p5834_p11 = pnand %p5226_p9, %p7849_p1  ;;  %s5840_s28 = sshll.u32 %s5720_s27, 4  ;;  %s319_s28 = int_to_ptr.vmem [resolvable:$true] %s5840_s28 }
  0x17   : > { %s5528_s11 = scalar_lea.hbm %s7839_s1, 1024 }
  0x18   : > { %p5529_p12 = scmp.ne.s32.totalorder %s7839_s1, %s5528_s11  ;;  %p5850_p13 = pneg %p5834_p11 }
  0x19   : > { %p5535_p5 = scmp.lt.u32.totalorder %s5528_s11, %s7839_s1 }
  0x1a   : > { %p5531_p0 = pnand %p5850_p13, %p5529_p12 }
  0x1c   : > { %p5532_p3 = pneg %p5531_p0 }
  0x1e   : > { %p5537_p7 = pnand %p5535_p5, %p5532_p3 }
  0x20   : > { %5540 = shalt.err (!%p5537_p7)
}
  0x21   : > { %s5541_s29 = scalar_lea.vmem %s5827_s23, 1024  ;;  %p5549_p2 = scmp.lt.s32.totalorder %s5827_s23, %s5827_s23 }
  0x22   : > { %p5542_p9 = scmp.ne.s32.totalorder %s5827_s23, %s5541_s29  ;;  %p5550_p6 = scmp.lt.s32.totalorder %s5541_s29, %s5541_s29 }
  0x24   : > { %p5544_p10 = pnand %p5542_p9, %p5850_p13  ;;  %p5551_p12 = por %p5550_p6, %p5549_p2 }
  0x26   : > { %p5545_p1 = pneg %p5544_p10 }
  0x28   : > { %p5552_p0 = pnand %p5551_p12, %p5545_p1 }
  0x2a   : > { %5555 = shalt.err (!%p5552_p0)
}
  0x2b   : > { %s5721_s30 = smov 64   ;;  %s5722_s11 = smov 4  }
  0x2c   : > { %5229 = dma.hbm_to_vmem [thread:$0]  (!%p5834_p11), %s7839_s1, 1024, %s5827_s23, [#allocation7], %s5721_s30, %s5721_s30, %s5722_s11  }
  0x2d   : > { %s5556_s29 = scalar_lea.hbm %s7841_s3, 9216 }
  0x2e   : > { %p5557_p1 = scmp.ne.s32.totalorder %s7841_s3, %s5556_s29  ;;  %p5563_p10 = scmp.lt.u32.totalorder %s5556_s29, %s7841_s3 }
  0x30   : > { %p5559_p2 = pnand %p5557_p1, %p5850_p13 }
  0x32   : > { %p5560_p6 = pneg %p5559_p2 }
  0x34   : > { %p5565_p3 = pnand %p5563_p10, %p5560_p6 }
  0x36   : > { %5568 = shalt.err (!%p5565_p3)
}
  0x37   : > { %s5569_s23 = scalar_lea.vmem %s5838_s26, 9216  ;;  %p5577_p12 = scmp.lt.s32.totalorder %s5838_s26, %s5838_s26 }
  0x38   : > { %p5570_p5 = scmp.ne.s32.totalorder %s5838_s26, %s5569_s23  ;;  %p5578_p0 = scmp.lt.s32.totalorder %s5569_s23, %s5569_s23 }
  0x3a   : > { %p5572_p7 = pnand %p5570_p5, %p5850_p13  ;;  %p5579_p1 = por %p5578_p0, %p5577_p12 }
  0x3c   : > { %p5573_p9 = pneg %p5572_p7 }
  0x3e   : > { %p5580_p2 = pnand %p5579_p1, %p5573_p9 }
  0x40   : > { %5583 = shalt.err (!%p5580_p2)
}
  0x41   : > { %5232 = dma.hbm_to_vmem [thread:$0]  (!%p5834_p11), %s7841_s3, 9216, %s5838_s26, [#allocation7], %s5721_s30, %s5721_s30, %s5722_s11  }
  0x42   : > { %s5584_s12 = scalar_lea.hbm %s7843_s5, 1024 }
  0x43   : > { %p5585_p6 = scmp.ne.s32.totalorder %s7843_s5, %s5584_s12  ;;  %p5591_p5 = scmp.lt.u32.totalorder %s5584_s12, %s7843_s5 }
  0x45   : > { %p5587_p10 = pnand %p5585_p6, %p5850_p13 }
  0x47   : > { %p5588_p3 = pneg %p5587_p10 }
  0x49   : > { %p5593_p7 = pnand %p5591_p5, %p5588_p3 }
  0x4b   : > { %5596 = shalt.err (!%p5593_p7)
}
  0x4c   : > { %s5597_s23 = scalar_lea.vmem %s319_s28, 1024  ;;  %p5605_p1 = scmp.lt.s32.totalorder %s319_s28, %s319_s28 }
  0x4d   : > { %p5598_p9 = scmp.ne.s32.totalorder %s319_s28, %s5597_s23  ;;  %p5606_p2 = scmp.lt.s32.totalorder %s5597_s23, %s5597_s23 }
  0x4f   : > { %p5600_p12 = pnand %p5598_p9, %p5850_p13  ;;  %p5607_p4 = por %p5606_p2, %p5605_p1 }
  0x51   : > { %p5601_p0 = pneg %p5600_p12 }
  0x53   : > { %p5608_p8 = pnand %p5607_p4, %p5601_p0 }
  0x55   : > { %5611 = shalt.err (!%p5608_p8)
}
  0x56   : > { %5235 = dma.hbm_to_vmem [thread:$0]  (!%p5834_p11), %s7843_s5, 1024, %s319_s28, [#allocation10], %s5721_s30, %s5721_s30, %s5722_s11  }
  0x57   : > { %s5923_s22 = sadd.s32 1, %s5716_s16   ;;  %s35_s10 = sadd.s32 1, %s5712_s15 }
  0x58   : > { %s32_s24 = ssub.s32 %s5716_s16, %s5923_s22  ;;  %p42_p8 = scmp.ne.s32.totalorder %s5712_s15, %s5708_s14 }
  0x59   : > { %p33_p4 = scmp.eq.s32.totalorder %s32_s24, 0  ;;  %p43_p13 = scmp.eq.s32.totalorder %s5716_s16, 0 }
  0x5a   : > { %p5247_p6 = scmp.lt.s32.totalorder %s5716_s16, 2  ;;  %p7889_p3 = scmp.eq.s32.totalorder %s5804_s17, 1 }
  0x5b   : > { %s5933_s13 = scalar_select %p33_p4, %s5712_s15, %s35_s10  }
  0x5c   : > { %p44_p10 = por %p43_p13, %p42_p8  ;;  %p5937_p5 = por %p7889_p3, %p42_p8 }
  0x5d   : > { %s344_s12 = sand.u32 1, %s5712_s15   ;;  %s4449_s18 = sshll.u32 %s5716_s16, 11 }
  0x5e   : > { %s4323_s28 = sshll.u32 %s344_s12, 7  ;;  %s5946_s29 = scalar_lea.hbm %s7838_s0, %s4449_s18 }
  0x5f   : > { %s348_s23 = scalar_lea.vmem [#allocation3], %s4323_s28  ;;  %p5948_p11 = pnand %p5247_p6, %p44_p10 }
  0x60   : > { %s355_s26 = sshll.u32 %s348_s23, 4  ;;  %s5954_s24 = scalar_lea.sflag [#allocation4], %s344_s12  ;;  %s5952_s26 = int_to_ptr.vmem [resolvable:$true] %s355_s26 }
  0x61   : > { %s5612_s10 = scalar_lea.hbm %s5946_s29, 2048  ;;  %p5614_p9 = pneg %p5948_p11 }
  0x62   : > { %p5613_p7 = scmp.ne.s32.totalorder %s5946_s29, %s5612_s10  ;;  %s5617_s25 = scalar_lea.hbm %s7838_s0, 4096 }
  0x63   : > { %p5618_p1 = scmp.lt.u32.totalorder %s5946_s29, %s7838_s0  ;;  %p5619_p2 = scmp.lt.u32.totalorder %s5617_s25, %s5612_s10 }
  0x64   : > { %p5615_p12 = pnand %p5614_p9, %p5613_p7  ;;  %p5621_p8 = scmp.lt.u32.totalorder %s5612_s10, %s5946_s29 }
  0x65   : > { %p5620_p4 = por %p5619_p2, %p5618_p1 }
  0x66   : > { %p5616_p0 = pneg %p5615_p12 }
  0x67   : > { %p5622_p13 = por %p5621_p8, %p5620_p4 }
  0x69   : > { %p5623_p6 = pnand %p5622_p13, %p5616_p0 }
  0x6b   : > { %5626 = shalt.err (!%p5623_p6)
}
  0x6c   : > { %s5627_s12 = scalar_lea.vmem %s5952_s26, 2048  ;;  %s5723_s18 = smov [#allocation3]  }
  0x6d   : > { %p5628_p10 = scmp.ne.s32.totalorder %s5952_s26, %s5627_s12  ;;  %s5632_s28 = sshll.u32 %s5723_s18, 4  ;;  %s5633_s28 = int_to_ptr.vmem [resolvable:$false] %s5632_s28 }
  0x6e   : > { %s5634_s27 = scalar_lea.vmem %s5633_s28, 4096  ;;  %p5635_p12 = scmp.lt.s32.totalorder %s5952_s26, %s5633_s28 }
  0x6f   : > { %p5630_p3 = pnand %p5628_p10, %p5614_p9  ;;  %p5636_p1 = scmp.lt.s32.totalorder %s5634_s27, %s5627_s12 }
  0x71   : > { %p5631_p7 = pneg %p5630_p3  ;;  %p5637_p2 = por %p5636_p1, %p5635_p12 }
  0x73   : > { %p5638_p4 = pnand %p5637_p2, %p5631_p7 }
  0x75   : > { %5641 = shalt.err (!%p5638_p4)
}
  0x76   : > { %5239 = dma.hbm_to_vmem [thread:$0]  (!%p5948_p11), %s5946_s29, 2048, %s5952_s26, %s5954_s24, %s5721_s30, %s5721_s30, %s5722_s11  }
  0x77   : > { %p7892_p9 = scmp.ne.s32.totalorder %s7886_s21, 0 }
  0x79   : > { %367 = sbr.rel (%p7892_p9) target bundleno = 1822 (0x71e), region = 60 }
  0x80   : > { %s5988_s10 = sand.u32 1, %s5708_s14   ;;  %p7893_p0 = scmp.ne.s32.totalorder %s7883_s19, 0 }
  0x81   : > { %s4327_s25 = sshll.u32 %s5988_s10, 7  ;;  %s370_s23 = scalar_lea.sflag [#allocation4], %s5988_s10 }
  0x82   : > { %s5992_s12 = scalar_lea.vmem [#allocation3], %s4327_s25 }
  0x83   : > { %5687 = dma.done.wait (%p7893_p0), %s370_s23, 2048  }
  0x84   : > { %5689 = vsyncadd (%p7893_p0), %s370_s23, 4294965248  ;;  %p7894_p11 = scmp.eq.s32.totalorder %s5804_s17, 0 }
  0x86   : > { %5691 = dma.done.wait (%p7894_p11), [#allocation7], 10240   ;;  %p7895_p8 = pmov %p7894_p11 }
  0x88   : > { %5693 = vsyncadd (%p7895_p8), [#allocation7], 4294957056  ;;  %p7896_p13 = pmov %p7895_p8 }
  0x89   : > { %p7897_p6 = pmov %p7895_p8 }
  0x8a   : > { %5695 = dma.done.wait (%p7896_p13), [#allocation10], 1024  }
  0x8b   : > { %5697 = vsyncadd (%p7897_p6), [#allocation10], 4294966272  ;;  %v5292_v0 = vld [vmem:[#allocation6] sm:$0xff]   ;;  %v5293_v1 = vld [vmem:[#allocation6 + $0x8] sm:$0xff]   ;;  %vm1469_vm0 = vcmask 1040384   ;;  %vm1568_vm3 = vcmask 1047552  }
  0x8c   : > { %5050 = vmatprep.subr.bf16.mxu0 %v5292_v0  ;;  %5194 = vmatprep.subr.bf16.mxu1 %v5292_v0  ;;  %v5294_v2 = vld [vmem:[#allocation6 + $0x10] sm:$0xff]   ;;  %v5295_v3 = vld [vmem:[#allocation6 + $0x18] sm:$0xff]   ;;  %v5300_v4 = vld [vmem:[%s5992_s12] sm:$0xff]   ;;  %vm1470_vm1 = vsmask.f32 256  ;;  %s7948_s11 = sld [smem:[#allocation32_spill]] }
  0x8d   : > { %5051 = vmatpush3.bf16.msra.mxu0 %v5292_v0  ;;  %5202 = vmatpush3.bf16.msra.mxu1 %v5292_v0  ;;  %v5302_v5 = vld [vmem:[%s5992_s12 + $0x40] sm:$0xff]   ;;  %v5297_v7 = vld [vmem:[#allocation6 + $0x28] sm:$0xff]   ;;  %v5298_v8 = vld [vmem:[#allocation6 + $0x30] sm:$0xff]   ;;  %vm1569_vm4 = vsmask.f32 7424  ;;  %s4331_s29 = sshll.u32 %s5988_s10, 8 }
  0x8e   : > { %5052 = vmatprep.subr.bf16.mxu0 %v5293_v1  ;;  %5195 = vmatprep.subr.bf16.mxu1 %v5293_v1  ;;  %v5296_v6 = vld [vmem:[#allocation6 + $0x20] sm:$0xff]   ;;  %v5299_v9 = vld [vmem:[#allocation6 + $0x38] sm:$0xff]   ;;  %v5301_v10 = vld [vmem:[%s5992_s12 + $0x8] sm:$0xff]   ;;  %s7684_s26 = scalar_lea.vmem [#allocation11], %s4331_s29  ;;  %s7949_s28 = sld [smem:[#allocation33_spill]] }
  0x8f   : > { %5066 = vmatprep.mubr.bf16.mxu0 %v5300_v4  ;;  %5082 = vmatprep.mubr.bf16.mxu1 %v5302_v5  ;;  %v5303_v11 = vld [vmem:[%s5992_s12 + $0x48] sm:$0xff]   ;;  %v5304_v12 = vld [vmem:[%s5992_s12 + $0x10] sm:$0xff]   ;;  %v5305_v14 = vld [vmem:[%s5992_s12 + $0x18] sm:$0xff]   ;;  %s4215_s9 = sshll.u32 %s7684_s26, 4  ;;  %s5725_s23 = smov [#allocation11]   ;;  %s7791_s9 = int_to_ptr.vmem [resolvable:$true] %s4215_s9 }
  0x90   : > { %v5306_v13 = vld [vmem:[%s5992_s12 + $0x50] sm:$0xff]   ;;  %v5307_v15 = vld [vmem:[%s5992_s12 + $0x58] sm:$0xff]   ;;  %v5308_v16 = vld [vmem:[%s5992_s12 + $0x20] sm:$0xff]   ;;  %s5642_s25 = scalar_lea.vmem %s7791_s9, 4096  ;;  %s5646_s19 = sshll.u32 %s5725_s23, 4  ;;  %s5647_s19 = int_to_ptr.vmem [resolvable:$false] %s5646_s19 }
  0x91   : > { %5053 = vmatpush3.bf16.msra.mxu0 %v5293_v1  ;;  %5203 = vmatpush3.bf16.msra.mxu1 %v5293_v1  ;;  %v5312_v17 = vld [vmem:[%s5992_s12 + $0x60] sm:$0xff]   ;;  %v5309_v18 = vld [vmem:[%s5992_s12 + $0x28] sm:$0xff]   ;;  %v5310_v20 = vld [vmem:[%s5992_s12 + $0x30] sm:$0xff]   ;;  %p5643_p10 = scmp.ne.s32.totalorder %s7791_s9, %s5642_s25  ;;  %s5648_s21 = scalar_lea.vmem %s5647_s19, 8192 }
  0x92   : > { %5054 = vmatprep.subr.bf16.mxu0 %v5294_v2  ;;  %5196 = vmatprep.subr.bf16.mxu1 %v5294_v2  ;;  %v5313_v19 = vld [vmem:[%s5992_s12 + $0x68] sm:$0xff]   ;;  %v5314_v21 = vld [vmem:[%s5992_s12 + $0x70] sm:$0xff]   ;;  %v5311_v22 = vld [vmem:[%s5992_s12 + $0x38] sm:$0xff]   ;;  %p5649_p12 = scmp.lt.s32.totalorder %s7791_s9, %s5647_s19  ;;  %p5650_p1 = scmp.lt.s32.totalorder %s5648_s21, %s5642_s25 }
  0x93   : > { %v5315_v23 = vld [vmem:[%s5992_s12 + $0x78] sm:$0xff]   ;;  %v6025_v24 = vld [vmem:[%s7840_s2] ss:$0 sm:$0xff]  ;;  %vm6281_vm2 = vmand %vm1469_vm0, %vm1470_vm1  ;;  %p5644_p3 = pnand %p5643_p10, %p5937_p5 }
  0x94   : > { %vm6495_vm5 = vmand %vm1568_vm3, %vm1569_vm4  ;;  %p5651_p2 = por %p5650_p1, %p5649_p12 }
  0x95   : > { %5055 = vmatpush3.bf16.msra.mxu0 %v5294_v2  ;;  %5204 = vmatpush3.bf16.msra.mxu1 %v5294_v2  ;;  %p5645_p7 = pneg %p5644_p3 }
  0x96   : > { %5056 = vmatprep.subr.bf16.mxu0 %v5295_v3  ;;  %5197 = vmatprep.subr.bf16.mxu1 %v5295_v3 }
  0x97   : > { %p5652_p4 = pnand %p5651_p2, %p5645_p7 }
  0x99   : > { %5057 = vmatpush3.bf16.msra.mxu0 %v5295_v3  ;;  %5205 = vmatpush3.bf16.msra.mxu1 %v5295_v3 }
  0x9a   : > { %5058 = vmatprep.subr.bf16.mxu0 %v5296_v6  ;;  %5198 = vmatprep.subr.bf16.mxu1 %v5296_v6 }
  0x9d   : > { %5059 = vmatpush3.bf16.msra.mxu0 %v5296_v6  ;;  %5206 = vmatpush3.bf16.msra.mxu1 %v5296_v6 }
  0x9e   : > { %5060 = vmatprep.subr.bf16.mxu0 %v5297_v7  ;;  %5199 = vmatprep.subr.bf16.mxu1 %v5297_v7 }
  0xa1   : > { %5061 = vmatpush3.bf16.msra.mxu0 %v5297_v7  ;;  %5207 = vmatpush3.bf16.msra.mxu1 %v5297_v7 }
  0xa2   : > { %5062 = vmatprep.subr.bf16.mxu0 %v5298_v8  ;;  %5200 = vmatprep.subr.bf16.mxu1 %v5298_v8 }
  0xa5   : > { %5063 = vmatpush3.bf16.msra.mxu0 %v5298_v8  ;;  %5208 = vmatpush3.bf16.msra.mxu1 %v5298_v8 }
  0xa6   : > { %5064 = vmatprep.subr.bf16.mxu0 %v5299_v9  ;;  %5201 = vmatprep.subr.bf16.mxu1 %v5299_v9 }
  0xa9   : > { %5065 = vmatpush3.bf16.msra.mxu0 %v5299_v9  ;;  %5209 = vmatpush3.bf16.msra.mxu1 %v5299_v9 }
  0xac   : > { %5067 = vmatmul.mubr.bf16.vlgmr.msra.gmra.mrb[0].mxu0 %v5301_v10  ;;  %5083 = vmatmul.mubr.bf16.vlgmr.msra.gmra.mrb[0].mxu1 %v5303_v11 }
  0xad   : > { %5070 = vmatprep.mubr.bf16.mxu0 %v5304_v12  ;;  %5086 = vmatprep.mubr.bf16.mxu1 %v5306_v13 }
  0xb4   : > { %5071 = vmatmul.mubr.bf16.gmra.mrb[4].mxu0 %v5305_v14  ;;  %5087 = vmatmul.mubr.bf16.gmra.mrb[4].mxu1 %v5307_v15 }
  0xb5   : > { %5074 = vmatprep.mubr.bf16.mxu0 %v5308_v16  ;;  %5090 = vmatprep.mubr.bf16.mxu1 %v5312_v17 }
  0xbc   : > { %5075 = vmatmul.mubr.bf16.gmra.mrb[8].mxu0 %v5309_v18  ;;  %5091 = vmatmul.mubr.bf16.gmra.mrb[8].mxu1 %v5313_v19 }
  0xbd   : > { %5078 = vmatprep.mubr.bf16.mxu0 %v5310_v20  ;;  %5094 = vmatprep.mubr.bf16.mxu1 %v5314_v21 }
  0xc4   : > { %5079 = vmatmul.mubr.bf16.gmra.mrb[12].mxu0 %v5311_v22  ;;  %5095 = vmatmul.mubr.bf16.gmra.mrb[12].mxu1 %v5315_v23 }
 0x17f   : > { %v5068_v25 = vpop.f32.mrb[0].mxu0  ;;  %v5084_v26 = vpop.f32.mrb[0].mxu1 }
 0x180   : > { %v6028_v27 = vadd.f32 %v5068_v25, %v6025_v24  ;;  %v656_v28 = vpop.f32.mrb[1].mxu0  ;;  %v720_v29 = vpop.f32.mrb[1].mxu1  ;;  %v6035_v34 = vadd.f32 %v5084_v26, %v6025_v24 }
 0x181   : > { %v6031_v30 = vadd.f32 %v6025_v24, %v656_v28  ;;  %v5069_v31 = vpop.f32.mrb[2].mxu0  ;;  %v5085_v32 = vpop.f32.mrb[2].mxu1  ;;  %v6041_v37 = vadd.f32 %v6025_v24, %v720_v29 }
 0x182   : > { %7898 = vst [vmem:[#allocation18_spill] sm:$0xff] %v6028_v27  ;;  %787 = vadd.xlane.f32.xlu1 %v6028_v27  ;;  %v659_v33 = vpop.f32.mrb[3].mxu0  ;;  %v723_v35 = vpop.f32.mrb[3].mxu1  ;;  %v886_v36 = vmul.f32 %v6028_v27, %v6028_v27  ;;  %v902_v38 = vmul.f32 %v6035_v34, %v6035_v34  ;;  %v6061_v48 = vadd.f32 %v5069_v31, %v6025_v24 }
 0x183   : > { %783 = vadd.xlane.f32.xlu0 %v6031_v30  ;;  %v6064_v49 = vadd.f32 %v6025_v24, %v659_v33  ;;  %v6071_v52 = vadd.f32 %v5085_v32, %v6025_v24  ;;  %v900_v56 = vmul.f32 %v6041_v37, %v6041_v37  ;;  %v884_v2 = vmul.f32 %v6031_v30, %v6031_v30 }
 0x184   : > { %7899 = vst [vmem:[#allocation19_spill] sm:$0xff] %v6061_v48  ;;  %v887_v3 = vmul.f32 %v6061_v48, %v6061_v48  ;;  %v6101_v6 = vadd.f32 %v6025_v24, %v723_v35 }
 0x185   : > { %v903_v11 = vmul.f32 %v6071_v52, %v6071_v52  ;;  %v885_v23 = vmul.f32 %v6064_v49, %v6064_v49 }
 0x186   : > { %819 = vadd.xlane.f32.xlu1 %v6035_v34  ;;  %v901_v26 = vmul.f32 %v6101_v6, %v6101_v6 }
 0x187   : > { %920 = vadd.xlane.f32.xlu0 %v886_v36  ;;  %v5072_v39 = vpop.f32.mrb[4].mxu0  ;;  %v5088_v40 = vpop.f32.mrb[4].mxu1 }
 0x188   : > { %v6046_v41 = vpop.f32.mrb[5].mxu0  ;;  %v6048_v42 = vpop.f32.mrb[5].mxu1  ;;  %v6119_v16 = vadd.f32 %v5072_v39, %v6025_v24  ;;  %v6137_v25 = vadd.f32 %v5088_v40, %v6025_v24 }
 0x189   : > { %v6050_v43 = vpop.f32.mrb[6].mxu0  ;;  %v5089_v44 = vpop.f32.mrb[6].mxu1  ;;  %v6144_v28 = vadd.f32 %v6025_v24, %v6046_v41  ;;  %v6151_v31 = vadd.f32 %v6025_v24, %v6048_v42 }
 0x18a   : > { %815 = vadd.xlane.f32.xlu1 %v6041_v37  ;;  %v6053_v45 = vpop.f32.mrb[7].mxu0  ;;  %v6056_v46 = vadd.f32 %v5089_v44, %v6025_v24  ;;  %v6058_v47 = vpop.f32.mrb[7].mxu1  ;;  %7904 = vst [vmem:[#allocation24_spill] sm:$0xff] %v6119_v16  ;;  %v890_v29 = vmul.f32 %v6119_v16, %v6119_v16  ;;  %v6158_v33 = vadd.f32 %v6050_v43, %v6025_v24 }
 0x18b   : > { %952 = vadd.xlane.f32.xlu0 %v902_v38  ;;  %7907 = vst [vmem:[#allocation27_spill] sm:$0xff] %v6144_v28  ;;  %v888_v32 = vmul.f32 %v6144_v28, %v6144_v28  ;;  %v904_v35 = vmul.f32 %v6151_v31, %v6151_v31  ;;  %v6165_v36 = vadd.f32 %v6025_v24, %v6053_v45 }
 0x18c   : > { %7908 = vst [vmem:[#allocation28_spill] sm:$0xff] %v6158_v33  ;;  %v891_v38 = vmul.f32 %v6158_v33, %v6158_v33  ;;  %v6172_v39 = vadd.f32 %v6025_v24, %v6058_v47 }
 0x18d   : > { %7909 = vst [vmem:[#allocation29_spill] sm:$0xff] %v6165_v36  ;;  %v889_v40 = vmul.f32 %v6165_v36, %v6165_v36 }
 0x18e   : > { %789 = vadd.xlane.f32.xlu1 %v6061_v48  ;;  %v905_v42 = vmul.f32 %v6172_v39, %v6172_v39 }
 0x18f   : > { %785 = vadd.xlane.f32.xlu0 %v6064_v49  ;;  %v6068_v50 = vpop.f32.mrb[8].mxu0  ;;  %v5092_v51 = vpop.f32.mrb[8].mxu1 }
 0x190   : > { %v6073_v53 = vpop.f32.mrb[9].mxu0  ;;  %v6076_v54 = vadd.f32 %v5092_v51, %v6025_v24  ;;  %v752_v55 = vpop.f32.mrb[9].mxu1  ;;  %v6179_v41 = vadd.f32 %v6068_v50, %v6025_v24 }
 0x191   : > { %v5077_v57 = vpop.f32.mrb[10].mxu0  ;;  %v6081_v58 = vadd.f32 %v6025_v24, %v752_v55  ;;  %v5093_v59 = vpop.f32.mrb[10].mxu1  ;;  %v6185_v43 = vadd.f32 %v6025_v24, %v6073_v53 }
 0x192   : > { %821 = vadd.xlane.f32.xlu1 %v6071_v52  ;;  %v6085_v60 = vadd.f32 %v5077_v57, %v6025_v24  ;;  %v691_v61 = vpop.f32.mrb[11].mxu0  ;;  %v6088_v62 = vadd.f32 %v5093_v59, %v6025_v24  ;;  %v755_v63 = vpop.f32.mrb[11].mxu1  ;;  %7910 = vst [vmem:[#allocation30_spill] sm:$0xff] %v6179_v41  ;;  %v894_v44 = vmul.f32 %v6179_v41, %v6179_v41 }
 0x193   : > { %948 = vadd.xlane.f32.xlu0 %v900_v56  ;;  %v6091_v0 = vadd.f32 %v6025_v24, %v691_v61  ;;  %v6094_v1 = vadd.f32 %v6025_v24, %v755_v63  ;;  %7911 = vst [vmem:[#allocation31_spill] sm:$0xff] %v6185_v43  ;;  %v892_v45 = vmul.f32 %v6185_v43, %v6185_v43 }
 0x194   : > { %7900 = vst [vmem:[#allocation20_spill] sm:$0xff] %v6085_v60  ;;  %v895_v47 = vmul.f32 %v6085_v60, %v6085_v60  ;;  %v906_v56 = vmul.f32 %v6137_v25, %v6137_v25  ;;  %v907_v57 = vmul.f32 %v6056_v46, %v6056_v46  ;;  %v908_v59 = vmul.f32 %v6081_v58, %v6081_v58 }
 0x195   : > { %7901 = vst [vmem:[#allocation21_spill] sm:$0xff] %v6091_v0  ;;  %v909_v61 = vmul.f32 %v6094_v1, %v6094_v1  ;;  %v910_v63 = vmul.f32 %v6076_v54, %v6076_v54 }
 0x196   : > { %916 = vadd.xlane.f32.xlu1 %v884_v2  ;;  %v911_v2 = vmul.f32 %v6088_v62, %v6088_v62 }
 0x197   : > { %922 = vadd.xlane.f32.xlu0 %v887_v3  ;;  %v5080_v4 = vpop.f32.mrb[12].mxu0  ;;  %v5096_v5 = vpop.f32.mrb[12].mxu1 }
 0x198   : > { %v6104_v7 = vadd.f32 %v5080_v4, %v6025_v24  ;;  %v704_v8 = vpop.f32.mrb[13].mxu0  ;;  %v6107_v9 = vadd.f32 %v5096_v5, %v6025_v24  ;;  %v768_v10 = vpop.f32.mrb[13].mxu1 }
 0x199   : > { %v6112_v12 = vadd.f32 %v6025_v24, %v704_v8  ;;  %v5081_v13 = vpop.f32.mrb[14].mxu0  ;;  %v6115_v14 = vadd.f32 %v6025_v24, %v768_v10  ;;  %v5097_v15 = vpop.f32.mrb[14].mxu1 }
 0x19a   : > { %7902 = vst [vmem:[#allocation22_spill] sm:$0xff] %v6104_v7  ;;  %817 = vadd.xlane.f32.xlu1 %v6101_v6  ;;  %v6122_v17 = vadd.f32 %v5081_v13, %v6025_v24  ;;  %v707_v18 = vpop.f32.mrb[15].mxu0  ;;  %v6125_v19 = vadd.f32 %v5097_v15, %v6025_v24  ;;  %v771_v20 = vpop.f32.mrb[15].mxu1  ;;  %v898_v50 = vmul.f32 %v6104_v7, %v6104_v7 }
 0x19b   : > { %7903 = vst [vmem:[#allocation23_spill] sm:$0xff] %v6112_v12  ;;  %954 = vadd.xlane.f32.xlu0 %v903_v11  ;;  %v6128_v21 = vadd.f32 %v6025_v24, %v707_v18  ;;  %v6131_v22 = vadd.f32 %v6025_v24, %v771_v20  ;;  %v893_v24 = vmul.f32 %v6091_v0, %v6091_v0 }
 0x19c   : > { %7905 = vst [vmem:[#allocation25_spill] sm:$0xff] %v6122_v17  ;;  %v896_v51 = vmul.f32 %v6112_v12, %v6112_v12  ;;  %v899_v53 = vmul.f32 %v6122_v17, %v6122_v17  ;;  %v912_v3 = vmul.f32 %v6115_v14, %v6115_v14  ;;  %v915_v5 = vmul.f32 %v6125_v19, %v6125_v19 }
 0x19d   : > { %7906 = vst [vmem:[#allocation26_spill] sm:$0xff] %v6128_v21  ;;  %v897_v55 = vmul.f32 %v6128_v21, %v6128_v21  ;;  %v913_v4 = vmul.f32 %v6131_v22, %v6131_v22  ;;  %v914_v8 = vmul.f32 %v6107_v9, %v6107_v9 }
 0x19e   : > { %795 = vadd.xlane.f32.xlu1 %v6119_v16 }
 0x19f   : > { %918 = vadd.xlane.f32.xlu0 %v885_v23 }
 0x1a2   : > { %827 = vadd.xlane.f32.xlu1 %v6137_v25 }
 0x1a3   : > { %950 = vadd.xlane.f32.xlu0 %v901_v26 }
 0x1a6   : > { %791 = vadd.xlane.f32.xlu1 %v6144_v28 }
 0x1a7   : > { %928 = vadd.xlane.f32.xlu0 %v890_v29 }
 0x1aa   : > { %823 = vadd.xlane.f32.xlu1 %v6151_v31 }
 0x1ab   : > { %924 = vadd.xlane.f32.xlu0 %v888_v32 }
 0x1ae   : > { %797 = vadd.xlane.f32.xlu1 %v6158_v33 }
 0x1af   : > { %956 = vadd.xlane.f32.xlu0 %v904_v35 }
 0x1b2   : > { %793 = vadd.xlane.f32.xlu1 %v6165_v36 }
 0x1b3   : > { %930 = vadd.xlane.f32.xlu0 %v891_v38 }
 0x1b6   : > { %825 = vadd.xlane.f32.xlu1 %v6172_v39 }
 0x1b7   : > { %926 = vadd.xlane.f32.xlu0 %v889_v40 }
 0x1ba   : > { %803 = vadd.xlane.f32.xlu1 %v6179_v41 }
 0x1bb   : > { %958 = vadd.xlane.f32.xlu0 %v905_v42 }
 0x1be   : > { %799 = vadd.xlane.f32.xlu1 %v6185_v43 }
 0x1bf   : > { %936 = vadd.xlane.f32.xlu0 %v894_v44 }
 0x1c2   : > { %805 = vadd.xlane.f32.xlu1 %v6085_v60 }
 0x1c3   : > { %932 = vadd.xlane.f32.xlu0 %v892_v45 }
 0x1c6   : > { %801 = vadd.xlane.f32.xlu1 %v6091_v0 }
 0x1c7   : > { %938 = vadd.xlane.f32.xlu0 %v895_v47 }
 0x1ca   : > { %811 = vadd.xlane.f32.xlu1 %v6104_v7 }
 0x1cb   : > { %934 = vadd.xlane.f32.xlu0 %v893_v24 }
 0x1ce   : > { %807 = vadd.xlane.f32.xlu1 %v6112_v12 }
 0x1cf   : > { %944 = vadd.xlane.f32.xlu0 %v898_v50 }
 0x1d2   : > { %813 = vadd.xlane.f32.xlu1 %v6122_v17 }
 0x1d3   : > { %940 = vadd.xlane.f32.xlu0 %v896_v51 }
 0x1d6   : > { %809 = vadd.xlane.f32.xlu1 %v6128_v21 }
 0x1d7   : > { %946 = vadd.xlane.f32.xlu0 %v899_v53 }
 0x1da   : > { %829 = vadd.xlane.f32.xlu1 %v6056_v46 }
 0x1db   : > { %942 = vadd.xlane.f32.xlu0 %v897_v55 }
 0x1de   : > { %831 = vadd.xlane.f32.xlu1 %v6081_v58 }
 0x1df   : > { %960 = vadd.xlane.f32.xlu0 %v906_v56 }
 0x1e2   : > { %833 = vadd.xlane.f32.xlu1 %v6094_v1 }
 0x1e3   : > { %962 = vadd.xlane.f32.xlu0 %v907_v57 }
 0x1e6   : > { %835 = vadd.xlane.f32.xlu1 %v6076_v54 }
 0x1e7   : > { %964 = vadd.xlane.f32.xlu0 %v908_v59 }
 0x1ea   : > { %837 = vadd.xlane.f32.xlu1 %v6088_v62 }
 0x1eb   : > { %966 = vadd.xlane.f32.xlu0 %v909_v61 }
 0x1ee   : > { %839 = vadd.xlane.f32.xlu1 %v6115_v14 }
 0x1ef   : > { %968 = vadd.xlane.f32.xlu0 %v910_v63 }
 0x1f2   : > { %841 = vadd.xlane.f32.xlu1 %v6131_v22 }
 0x1f3   : > { %970 = vadd.xlane.f32.xlu0 %v911_v2 }
 0x1f6   : > { %843 = vadd.xlane.f32.xlu1 %v6107_v9 }
 0x1f7   : > { %972 = vadd.xlane.f32.xlu0 %v912_v3 }
 0x1fa   : > { %845 = vadd.xlane.f32.xlu1 %v6125_v19 }
 0x1fb   : > { %974 = vadd.xlane.f32.xlu0 %v913_v4 }
 0x1fe   : > { %978 = vadd.xlane.f32.xlu1 %v915_v5 }
 0x1ff   : > { %976 = vadd.xlane.f32.xlu0 %v914_v8 }
 0x20f   : > { %v788_v10 = vpop.xlane.xlu1 %787 }
 0x210   : > { %v784_v11 = vpop.xlane.xlu0 %783 }
 0x213   : > { %v6240_v13 = vpop.xlane.xlu1 %819 }
 0x214   : > { %v921_v15 = vpop.xlane.xlu0 %920 }
 0x217   : > { %v6242_v18 = vpop.xlane.xlu1 %815 }
 0x218   : > { %v6244_v20 = vpop.xlane.xlu0 %952 }
 0x21b   : > { %v790_v23 = vpop.xlane.xlu1 %789 }
 0x21c   : > { %v786_v26 = vpop.xlane.xlu0 %785 }
 0x21d   : > { %v847_v61 = vadd.f32 %v786_v26, %v784_v11 }
 0x21f   : > { %v6246_v29 = vpop.xlane.xlu1 %821  ;;  %v848_v3 = vadd.f32 %v847_v61, %v788_v10 }
 0x220   : > { %v6248_v32 = vpop.xlane.xlu0 %948 }
 0x221   : > { %v849_v17 = vadd.f32 %v848_v3, %v790_v23 }
 0x223   : > { %v917_v35 = vpop.xlane.xlu1 %916 }
 0x224   : > { %v923_v38 = vpop.xlane.xlu0 %922 }
 0x227   : > { %v6250_v40 = vpop.xlane.xlu1 %817 }
 0x228   : > { %v6252_v42 = vpop.xlane.xlu0 %954 }
 0x22b   : > { %v796_v44 = vpop.xlane.xlu1 %795 }
 0x22c   : > { %v919_v45 = vpop.xlane.xlu0 %918 }
 0x22d   : > { %v980_v5 = vadd.f32 %v919_v45, %v917_v35 }
 0x22f   : > { %v6254_v47 = vpop.xlane.xlu1 %827  ;;  %v981_v21 = vadd.f32 %v980_v5, %v921_v15 }
 0x230   : > { %v6256_v24 = vpop.xlane.xlu0 %950 }
 0x231   : > { %v982_v43 = vadd.f32 %v981_v21, %v923_v38 }
 0x233   : > { %v792_v50 = vpop.xlane.xlu1 %791 }
 0x234   : > { %v929_v51 = vpop.xlane.xlu0 %928  ;;  %v850_v12 = vadd.f32 %v849_v17, %v792_v50 }
 0x237   : > { %v6258_v53 = vpop.xlane.xlu1 %823 }
 0x238   : > { %v925_v55 = vpop.xlane.xlu0 %924 }
 0x239   : > { %v983_v33 = vadd.f32 %v982_v43, %v925_v55 }
 0x23b   : > { %v798_v56 = vpop.xlane.xlu1 %797 }
 0x23c   : > { %v6260_v57 = vpop.xlane.xlu0 %956 }
 0x23f   : > { %v794_v59 = vpop.xlane.xlu1 %793 }
 0x240   : > { %v931_v63 = vpop.xlane.xlu0 %930  ;;  %v851_v41 = vadd.f32 %v850_v12, %v794_v59 }
 0x242   : > { %v852_v36 = vadd.f32 %v851_v41, %v796_v44  ;;  %v5316_v41 = vld [vmem:[#allocation8 + $0x40] sm:$0xff]  }
 0x243   : > { %v6262_v2 = vpop.xlane.xlu1 %825  ;;  %4554 = vmatprep.subr.bf16.mxu1 %v5316_v41 }
 0x244   : > { %v927_v4 = vpop.xlane.xlu0 %926  ;;  %v853_v48 = vadd.f32 %v852_v36, %v798_v56  ;;  %v5319_v56 = vld [vmem:[#allocation8 + $0x8] sm:$0xff]  }
 0x245   : > { %v984_v26 = vadd.f32 %v983_v33, %v927_v4  ;;  %v5317_v33 = vld [vmem:[#allocation8] sm:$0xff]  }
 0x246   : > { %4555 = vmatpush3.bf16.msra.mxu1 %v5317_v33  ;;  %v5329_v33 = vld [vmem:[#allocation8 + $0x88] sm:$0xff]  }
 0x247   : > { %v804_v8 = vpop.xlane.xlu1 %803  ;;  %v985_v61 = vadd.f32 %v984_v26, %v929_v51 }
 0x248   : > { %v6264_v7 = vpop.xlane.xlu0 %958 }
 0x249   : > { %v986_v27 = vadd.f32 %v985_v61, %v931_v63 }
 0x24b   : > { %v800_v60 = vpop.xlane.xlu1 %799 }
 0x24c   : > { %v937_v0 = vpop.xlane.xlu0 %936  ;;  %v854_v35 = vadd.f32 %v853_v48, %v800_v60 }
 0x24f   : > { %v806_v16 = vpop.xlane.xlu1 %805 }
 0x250   : > { %v933_v11 = vpop.xlane.xlu0 %932 }
 0x251   : > { %v987_v15 = vadd.f32 %v986_v27, %v933_v11 }
 0x253   : > { %v802_v28 = vpop.xlane.xlu1 %801 }
 0x254   : > { %v939_v10 = vpop.xlane.xlu0 %938  ;;  %v855_v23 = vadd.f32 %v854_v35, %v802_v28  ;;  %v5318_v28 = vld [vmem:[#allocation8 + $0x48] sm:$0xff]  }
 0x255   : > { %4556 = vmatprep.subr.bf16.mxu1 %v5318_v28 }
 0x256   : > { %v856_v50 = vadd.f32 %v855_v23, %v804_v8  ;;  %4557 = vmatpush3.bf16.msra.mxu1 %v5319_v56  ;;  %v5320_v8 = vld [vmem:[#allocation8 + $0x50] sm:$0xff]  }
 0x257   : > { %v812_v45 = vpop.xlane.xlu1 %811  ;;  %4558 = vmatprep.subr.bf16.mxu1 %v5320_v8  ;;  %v5336_v8 = vld [vmem:[#allocation8 + $0x30] sm:$0xff]  }
 0x258   : > { %v935_v3 = vpop.xlane.xlu0 %934  ;;  %v857_v43 = vadd.f32 %v856_v50, %v806_v16  ;;  %v5325_v50 = vld [vmem:[#allocation8 + $0x80] sm:$0xff]  }
 0x259   : > { %v988_v59 = vadd.f32 %v987_v15, %v935_v3  ;;  %v5322_v3 = vld [vmem:[#allocation8 + $0x58] sm:$0xff]  }
 0x25b   : > { %v808_v17 = vpop.xlane.xlu1 %807  ;;  %v989_v44 = vadd.f32 %v988_v59, %v937_v0  ;;  %v5321_v0 = vld [vmem:[#allocation8 + $0x10] sm:$0xff]  }
 0x25c   : > { %v945_v12 = vpop.xlane.xlu0 %944  ;;  %v858_v55 = vadd.f32 %v857_v43, %v808_v17  ;;  %4559 = vmatpush3.bf16.msra.mxu1 %v5321_v0  ;;  %v5324_v17 = vld [vmem:[#allocation8 + $0x18] sm:$0xff]  }
 0x25d   : > { %v990_v51 = vadd.f32 %v989_v44, %v939_v10  ;;  %4560 = vmatprep.subr.bf16.mxu1 %v5322_v3  ;;  %v5328_v44 = vld [vmem:[#allocation8 + $0x20] sm:$0xff]  }
 0x25f   : > { %v814_v21 = vpop.xlane.xlu1 %813 }
 0x260   : > { %v941_v38 = vpop.xlane.xlu0 %940  ;;  %4561 = vmatpush3.bf16.msra.mxu1 %v5324_v17 }
 0x261   : > { %v991_v63 = vadd.f32 %v990_v51, %v941_v38  ;;  %v5326_v38 = vld [vmem:[#allocation8 + $0x60] sm:$0xff]   ;;  %v5332_v51 = vld [vmem:[#allocation8 + $0x28] sm:$0xff]  }
 0x262   : > { %4562 = vmatprep.subr.bf16.mxu1 %v5326_v38  ;;  %v5343_v38 = vld [vmem:[#allocation8 + $0xa8] sm:$0xff]  }
 0x263   : > { %v810_v36 = vpop.xlane.xlu1 %809 }
 0x264   : > { %v859_v48 = vadd.f32 %v858_v55, %v810_v36  ;;  %v947_v60 = vpop.xlane.xlu0 %946  ;;  %4563 = vmatpush3.bf16.msra.mxu1 %v5328_v44  ;;  %v5345_v44 = vld [vmem:[#allocation8 + $0x100] sm:$0xff]  }
 0x266   : > { %v860_v27 = vadd.f32 %v859_v48, %v812_v45  ;;  %v5323_v45 = vld [vmem:[#allocation8 + $0xc0] sm:$0xff]  }
 0x267   : > { %v830_v4 = vpop.xlane.xlu1 %829  ;;  %4666 = vmatprep.subr.bf16.mxu0 %v5323_v45  ;;  %v5341_v45 = vld [vmem:[#allocation8 + $0xa0] sm:$0xff]  }
 0x268   : > { %v861_v5 = vadd.f32 %v860_v27, %v814_v21  ;;  %v943_v16 = vpop.xlane.xlu0 %942  ;;  %4667 = vmatpush3.bf16.msra.mxu0 %v5325_v50 }
 0x269   : > { %v992_v11 = vadd.f32 %v991_v63, %v943_v16 }
 0x26a   : > { %v862_v26 = vadd.f32 %v861_v5, %v6242_v18  ;;  %v5334_v5 = vld [vmem:[#allocation8 + $0x70] sm:$0xff]  }
 0x26b   : > { %v993_v61 = vadd.f32 %v992_v11, %v945_v12  ;;  %v832_v35 = vpop.xlane.xlu1 %831  ;;  %v5337_v11 = vld [vmem:[#allocation8 + $0x98] sm:$0xff]  }
 0x26c   : > { %v863_v23 = vadd.f32 %v862_v26, %v6250_v40  ;;  %v961_v10 = vpop.xlane.xlu0 %960  ;;  %v5327_v40 = vld [vmem:[#allocation8 + $0xc8] sm:$0xff]  }
 0x26d   : > { %v994_v15 = vadd.f32 %v993_v61, %v947_v60  ;;  %4668 = vmatprep.subr.bf16.mxu0 %v5327_v40  ;;  %v5331_v60 = vld [vmem:[#allocation8 + $0xd0] sm:$0xff]   ;;  %v5338_v61 = vld [vmem:[#allocation8 + $0x78] sm:$0xff]  }
 0x26e   : > { %v864_v59 = vadd.f32 %v863_v23, %v6240_v13  ;;  %4669 = vmatpush3.bf16.msra.mxu0 %v5329_v33  ;;  %v5339_v23 = vld [vmem:[#allocation8 + $0xe0] sm:$0xff]   ;;  %v5346_v33 = vld [vmem:[#allocation8 + $0xf0] sm:$0xff]  }
 0x26f   : > { %v995_v21 = vadd.f32 %v994_v15, %v6248_v32  ;;  %v834_v43 = vpop.xlane.xlu1 %833  ;;  %4670 = vmatprep.subr.bf16.mxu0 %v5331_v60  ;;  %v5350_v60 = vld [vmem:[#allocation8 + $0x148] sm:$0xff]  }
 0x270   : > { %v865_v18 = vadd.f32 %v864_v59, %v6246_v29  ;;  %v963_v12 = vpop.xlane.xlu0 %962  ;;  %v5330_v29 = vld [vmem:[#allocation8 + $0x68] sm:$0xff]  }
 0x271   : > { %v996_v41 = vadd.f32 %v995_v21, %v6256_v24  ;;  %v5333_v24 = vld [vmem:[#allocation8 + $0x90] sm:$0xff]   ;;  %4564 = vmatprep.subr.bf16.mxu1 %v5330_v29  ;;  %v5348_v29 = vld [vmem:[#allocation8 + $0xf8] sm:$0xff]  }
 0x272   : > { %v866_v55 = vadd.f32 %v865_v18, %v6258_v53  ;;  %4565 = vmatpush3.bf16.msra.mxu1 %v5332_v51  ;;  %4671 = vmatpush3.bf16.msra.mxu0 %v5333_v24  ;;  %v5351_v51 = vld [vmem:[#allocation8 + $0x108] sm:$0xff]   ;;  %v5382_v21 = vld [vmem:[#allocation8 + $0x210] sm:$0xff]  }
 0x273   : > { %v997_v13 = vadd.f32 %v996_v41, %v6244_v20  ;;  %v836_v36 = vpop.xlane.xlu1 %835  ;;  %4566 = vmatprep.subr.bf16.mxu1 %v5334_v5  ;;  %v5344_v41 = vld [vmem:[#allocation8 + $0x140] sm:$0xff]  }
 0x274   : > { %v867_v32 = vadd.f32 %v866_v55, %v6262_v2  ;;  %v965_v48 = vpop.xlane.xlu0 %964  ;;  %v5335_v2 = vld [vmem:[#allocation8 + $0xd8] sm:$0xff]  }
 0x275   : > { %v998_v28 = vadd.f32 %v997_v13, %v6252_v42  ;;  %4672 = vmatprep.subr.bf16.mxu0 %v5335_v2  ;;  %v5353_v2 = vld [vmem:[#allocation8 + $0x110] sm:$0xff]  }
 0x276   : > { %v868_v56 = vadd.f32 %v867_v32, %v6254_v47  ;;  %4567 = vmatpush3.bf16.msra.mxu1 %v5336_v8  ;;  %4673 = vmatpush3.bf16.msra.mxu0 %v5337_v11 }
 0x277   : > { %v999_v53 = vadd.f32 %v998_v28, %v6260_v57  ;;  %v838_v27 = vpop.xlane.xlu1 %837  ;;  %4568 = vmatprep.subr.bf16.mxu1 %v5338_v61  ;;  %4674 = vmatprep.subr.bf16.mxu0 %v5339_v23  ;;  %v5354_v23 = vld [vmem:[#allocation8 + $0x158] sm:$0xff]  }
 0x278   : > { %v869_v20 = vadd.f32 %v868_v56, %v830_v4  ;;  %v967_v63 = vpop.xlane.xlu0 %966  ;;  %v5340_v4 = vld [vmem:[#allocation8 + $0x38] sm:$0xff]   ;;  %v5352_v56 = vld [vmem:[#allocation8 + $0x150] sm:$0xff]  }
 0x279   : > { %v1000_v16 = vadd.f32 %v999_v53, %v6264_v7 }
 0x27a   : > { %v870_v42 = vadd.f32 %v869_v20, %v832_v35  ;;  %4569 = vmatpush3.bf16.msra.mxu1 %v5340_v4  ;;  %4675 = vmatpush3.bf16.msra.mxu0 %v5341_v45  ;;  %v7869_v35 = vmov 0   ;;  %v5349_v20 = vld [vmem:[#allocation8 + $0xb8] sm:$0xff]  }
 0x27b   : > { %v1001_v0 = vadd.f32 %v1000_v16, %v961_v10  ;;  %v840_v47 = vpop.xlane.xlu1 %839  ;;  %v1344_v10 = vrot.slane %v7869_v35, 7  ;;  %2471 = vmatprep.mubr.bf16.mxu1 %v7869_v35  ;;  %4778 = vmatprep.subr.bf16.mxu1 %v5344_v41  ;;  %v5355_v45 = vld [vmem:[#allocation8 + $0x118] sm:$0xff]  }
 0x27c   : > { %v871_v26 = vadd.f32 %v870_v42, %v834_v43  ;;  %v969_v57 = vpop.xlane.xlu0 %968  ;;  %v5342_v43 = vld [vmem:[#allocation8 + $0xe8] sm:$0xff]  }
 0x27d   : > { %v1002_v3 = vadd.f32 %v1001_v0, %v963_v12  ;;  %v6287_v12 = vsel %vm6281_vm2, 0, %v1344_v10  ;;  %4676 = vmatprep.subr.bf16.mxu0 %v5342_v43  ;;  %v5356_v43 = vld [vmem:[#allocation8 + $0x160] sm:$0xff]  }
 0x27e   : > { %v872_v15 = vadd.f32 %v871_v26, %v836_v36  ;;  %2472 = vmatmul.mubr.bf16.vlgmr.msra.gmra.mrb[16].mxu1 %v6287_v12  ;;  %4677 = vmatpush3.bf16.msra.mxu0 %v5343_v38  ;;  %v5347_v36 = vld [vmem:[#allocation8 + $0xb0] sm:$0xff]  }
 0x27f   : > { %v1003_v7 = vadd.f32 %v1002_v3, %v965_v48  ;;  %v842_v17 = vpop.xlane.xlu1 %841  ;;  %4678 = vmatprep.subr.bf16.mxu0 %v5346_v33  ;;  %4779 = vmatpush3.bf16.msra.mxu1 %v5345_v44  ;;  %v5357_v44 = vld [vmem:[#allocation8 + $0x120] sm:$0xff]  }
 0x280   : > { %v873_v50 = vadd.f32 %v872_v15, %v838_v27  ;;  %v971_v59 = vpop.xlane.xlu0 %970  ;;  %4780 = vmatprep.subr.bf16.mxu1 %v5350_v60 }
 0x281   : > { %v1004_v18 = vadd.f32 %v1003_v7, %v967_v63 }
 0x282   : > { %v874_v40 = vadd.f32 %v873_v50, %v840_v47  ;;  %4679 = vmatpush3.bf16.msra.mxu0 %v5347_v36 }
 0x283   : > { %v1005_v55 = vadd.f32 %v1004_v18, %v969_v57  ;;  %v844_v13 = vpop.xlane.xlu1 %843  ;;  %4680 = vmatprep.subr.bf16.mxu0 %v5348_v29  ;;  %4781 = vmatpush3.bf16.msra.mxu1 %v5351_v51 }
 0x284   : > { %v875_v32 = vadd.f32 %v874_v40, %v842_v17  ;;  %v973_v48 = vpop.xlane.xlu0 %972  ;;  %4782 = vmatprep.subr.bf16.mxu1 %v5352_v56 }
 0x285   : > { %v1006_v28 = vadd.f32 %v1005_v55, %v971_v59  ;;  %v5358_v55 = vld [vmem:[#allocation8 + $0x168] sm:$0xff]  }
 0x286   : > { %v876_v24 = vadd.f32 %v875_v32, %v844_v13  ;;  %4681 = vmatpush3.bf16.msra.mxu0 %v5349_v20 }
 0x287   : > { %v1007_v53 = vadd.f32 %v1006_v28, %v973_v48  ;;  %v846_v27 = vpop.xlane.xlu1 %845  ;;  %4783 = vmatpush3.bf16.msra.mxu1 %v5353_v2 }
 0x288   : > { %v877_v63 = vadd.f32 %v876_v24, %v846_v27  ;;  %v975_v5 = vpop.xlane.xlu0 %974  ;;  %4784 = vmatprep.subr.bf16.mxu1 %v5354_v23  ;;  %v5359_v24 = vld [vmem:[#allocation8 + $0x128] sm:$0xff]  }
 0x289   : > { %v1008_v8 = vadd.f32 %v1007_v53, %v975_v5 }
 0x28a   : > { %v878_v16 = vrot.slane %v877_v63, 4 }
 0x28b   : > { %v979_v47 = vpop.xlane.xlu1 %978  ;;  %4785 = vmatpush3.bf16.msra.mxu1 %v5355_v45 }
 0x28c   : > { %v879_v11 = vadd.f32 %v878_v16, %v877_v63  ;;  %v977_v42 = vpop.xlane.xlu0 %976  ;;  %4786 = vmatprep.subr.bf16.mxu1 %v5356_v43  ;;  %v7914_v43 = vld [vmem:[#allocation18_spill] sm:$0xff] }
 0x28d   : > { %v1009_v0 = vadd.f32 %v1008_v8, %v977_v42 }
 0x28e   : > { %v880_v57 = vrot.slane %v879_v11, 2 }
 0x28f   : > { %v1010_v26 = vadd.f32 %v1009_v0, %v979_v47  ;;  %4787 = vmatpush3.bf16.msra.mxu1 %v5357_v44  ;;  %v7915_v44 = vld [vmem:[#allocation19_spill] sm:$0xff] }
 0x290   : > { %v881_v3 = vadd.f32 %v880_v57, %v879_v11  ;;  %4788 = vmatprep.subr.bf16.mxu1 %v5358_v55  ;;  %v6351_v11 = vld [vmem:[%s7845_s7] ss:$0 sm:$0xff]  ;;  %v5360_v57 = vld [vmem:[#allocation8 + $0x170] sm:$0xff]   ;;  %v7916_v55 = vld [vmem:[#allocation27_spill] sm:$0xff] }
 0x291   : > { %v1011_v61 = vrot.slane %v1010_v26, 4 }
 0x292   : > { %v882_v15 = vrot.slane %v881_v3, 1 }
 0x293   : > { %v1012_v4 = vadd.f32 %v1011_v61, %v1010_v26  ;;  %4789 = vmatpush3.bf16.msra.mxu1 %v5359_v24 }
 0x294   : > { %v883_v17 = vadd.f32 %v882_v15, %v881_v3  ;;  %4790 = vmatprep.subr.bf16.mxu1 %v5360_v57 }
 0x295   : > { %v1013_v7 = vrot.slane %v1012_v4, 2 }
 0x296   : > { %v6290_v50 = vmul.f32 0.00048828125, %v883_v17 }
 0x297   : > { %v1014_v10 = vadd.f32 %v1013_v7, %v1012_v4 }
 0x298   : > { %v1019_v40 = vmul.f32 %v6290_v50, %v6290_v50  ;;  %v1037_v13 = vsub.f32 %v6041_v37, %v6290_v50  ;;  %v1038_v36 = vsub.f32 %v6101_v6, %v6290_v50  ;;  %v1039_v32 = vsub.f32 %v6035_v34, %v6290_v50 }
 0x299   : > { %v1015_v59 = vrot.slane %v1014_v10, 1  ;;  %v1040_v48 = vsub.f32 %v6071_v52, %v6290_v50  ;;  %v1041_v60 = vsub.f32 %v6151_v31, %v6290_v50  ;;  %v1042_v28 = vsub.f32 %v6172_v39, %v6290_v50 }
 0x29a   : > { %v1043_v37 = vsub.f32 %v6137_v25, %v6290_v50  ;;  %v1044_v6 = vsub.f32 %v6056_v46, %v6290_v50  ;;  %v1045_v34 = vsub.f32 %v6081_v58, %v6290_v50  ;;  %v1046_v52 = vsub.f32 %v6094_v1, %v6290_v50 }
 0x29b   : > { %v1016_v18 = vadd.f32 %v1015_v59, %v1014_v10  ;;  %v1047_v51 = vsub.f32 %v6076_v54, %v6290_v50  ;;  %v1048_v31 = vsub.f32 %v6088_v62, %v6290_v50  ;;  %v1049_v39 = vsub.f32 %v6115_v14, %v6290_v50 }
 0x29c   : > { %v1050_v25 = vsub.f32 %v6131_v22, %v6290_v50  ;;  %v1051_v46 = vsub.f32 %v6107_v9, %v6290_v50  ;;  %v1052_v58 = vsub.f32 %v6125_v19, %v6290_v50  ;;  %v1021_v42 = vsub.f32 %v6031_v30, %v6290_v50 }
 0x29d   : > { %v1018_v38 = vmul.f32 0.00048828125, %v1016_v18  ;;  %v1022_v0 = vsub.f32 %v6064_v49, %v6290_v50  ;;  %v1023_v18 = vsub.f32 %v7914_v43, %v6290_v50 }
 0x29f   : > { %v1020_v41 = vsub.f32 %v1018_v38, %v1019_v40 }
 0x2a1   : > { %v1053_v33 = vadd.f32 1e-05, %v1020_v41  ;;  %v6378_v41 = vld [vmem:[%s7846_s8] ss:$0 sm:$0xff] }
 0x2a3   : > { %5396 = vrsqrt.f32 %v1053_v33  ;;  %v1024_v33 = vsub.f32 %v7915_v44, %v6290_v50  ;;  %v7925_v44 = vld [vmem:[#allocation26_spill] sm:$0xff] }
 0x2ad   : > { %v6302_v29 = vpop.eup %5396 }
 0x2ae   : > { %v6329_v1 = vmul.f32 %v6302_v29, %v1037_v13  ;;  %v6332_v54 = vmul.f32 %v6302_v29, %v1038_v36  ;;  %v1073_v62 = vmul.f32 %v6302_v29, %v1039_v32  ;;  %v1074_v56 = vmul.f32 %v6302_v29, %v1040_v48  ;;  %v7917_v36 = vld [vmem:[#allocation29_spill] sm:$0xff]  ;;  %v7918_v48 = vld [vmem:[#allocation24_spill] sm:$0xff] }
 0x2af   : > { %v1075_v14 = vmul.f32 %v6302_v29, %v1041_v60  ;;  %v1076_v22 = vmul.f32 %v6302_v29, %v1042_v28  ;;  %v1077_v9 = vmul.f32 %v6302_v29, %v1043_v37  ;;  %v1078_v53 = vmul.f32 %v6302_v29, %v1044_v6  ;;  %v7919_v28 = vld [vmem:[#allocation28_spill] sm:$0xff] }
 0x2b0   : > { %v1079_v19 = vmul.f32 %v6302_v29, %v1045_v34  ;;  %v1080_v27 = vmul.f32 %v6302_v29, %v1046_v52  ;;  %v1081_v20 = vmul.f32 %v6302_v29, %v1047_v51  ;;  %v1082_v63 = vmul.f32 %v6302_v29, %v1048_v31  ;;  %v5361_v34 = vld [vmem:[#allocation8 + $0x130] sm:$0xff]  }
 0x2b1   : > { %v1083_v5 = vmul.f32 %v6302_v29, %v1049_v39  ;;  %v1084_v2 = vmul.f32 %v6302_v29, %v1050_v25  ;;  %v1085_v16 = vmul.f32 %v6302_v29, %v1051_v46  ;;  %v1086_v8 = vmul.f32 %v6302_v29, %v1052_v58  ;;  %4791 = vmatpush3.bf16.msra.mxu1 %v5361_v34 }
 0x2b2   : > { %v1112_v47 = vmul.f32 %v6351_v11, %v1073_v62  ;;  %v1113_v26 = vmul.f32 %v6351_v11, %v1074_v56  ;;  %v1114_v61 = vmul.f32 %v6351_v11, %v1075_v14  ;;  %v1115_v23 = vmul.f32 %v6351_v11, %v1076_v22 }
 0x2b3   : > { %v1116_v3 = vmul.f32 %v6351_v11, %v1077_v9  ;;  %v1117_v4 = vmul.f32 %v6351_v11, %v1078_v53  ;;  %v1118_v45 = vmul.f32 %v6351_v11, %v1079_v19  ;;  %v1119_v30 = vmul.f32 %v6351_v11, %v1080_v27 }
 0x2b4   : > { %v1120_v15 = vmul.f32 %v6351_v11, %v1081_v20  ;;  %v1121_v49 = vmul.f32 %v6351_v11, %v1082_v63  ;;  %v1122_v7 = vmul.f32 %v6351_v11, %v1083_v5  ;;  %v1123_v17 = vmul.f32 %v6351_v11, %v1084_v2 }
 0x2b5   : > { %v1124_v10 = vmul.f32 %v6351_v11, %v1085_v16  ;;  %v1125_v59 = vmul.f32 %v6351_v11, %v1086_v8  ;;  %v1055_v38 = vmul.f32 %v6302_v29, %v1021_v42  ;;  %v1056_v40 = vmul.f32 %v6302_v29, %v1022_v0 }
 0x2b6   : > { %v1025_v13 = vsub.f32 %v7916_v55, %v6290_v50  ;;  %v1026_v32 = vsub.f32 %v7917_v36, %v6290_v50  ;;  %v1027_v60 = vsub.f32 %v7918_v48, %v6290_v50  ;;  %v1028_v37 = vsub.f32 %v7919_v28, %v6290_v50  ;;  %v7926_v55 = vld [vmem:[#allocation22_spill] sm:$0xff]  ;;  %v7927_v36 = vld [vmem:[#allocation25_spill] sm:$0xff] }
 0x2b7   : > { %v1057_v6 = vmul.f32 %v6302_v29, %v1023_v18  ;;  %v1058_v52 = vmul.f32 %v6302_v29, %v1024_v33  ;;  %v1094_v39 = vmul.f32 %v6351_v11, %v1055_v38  ;;  %v1095_v25 = vmul.f32 %v6351_v11, %v1056_v40 }
 0x2b8   : > { %v1059_v51 = vmul.f32 %v6302_v29, %v1025_v13  ;;  %v1060_v31 = vmul.f32 %v6302_v29, %v1026_v32  ;;  %v1061_v24 = vmul.f32 %v6302_v29, %v1027_v60  ;;  %v6398_v46 = vadd.f32 %v6378_v41, %v1112_v47  ;;  %v5366_v60 = vld [vmem:[#allocation8 + $0x178] sm:$0xff]  }
 0x2b9   : > { %v6401_v58 = vadd.f32 %v6378_v41, %v1113_v26  ;;  %v6404_v62 = vadd.f32 %v6378_v41, %v1114_v61  ;;  %v6407_v56 = vadd.f32 %v6378_v41, %v1115_v23  ;;  %v6410_v14 = vadd.f32 %v6378_v41, %v1116_v3  ;;  %v7920_v26 = vld [vmem:[#allocation31_spill] sm:$0xff]  ;;  %v7921_v61 = vld [vmem:[#allocation21_spill] sm:$0xff]  ;;  %v7922_v3 = vld [vmem:[#allocation30_spill] sm:$0xff]  ;;  %4792 = vmatprep.subr.bf16.mxu1 %v5366_v60 }
 0x2ba   : > { %v6413_v22 = vadd.f32 %v6378_v41, %v1117_v4  ;;  %v6416_v9 = vadd.f32 %v6378_v41, %v1118_v45  ;;  %v6419_v53 = vadd.f32 %v6378_v41, %v1119_v30  ;;  %v6422_v19 = vadd.f32 %v6378_v41, %v1120_v15  ;;  %v7923_v30 = vld [vmem:[#allocation20_spill] sm:$0xff] }
 0x2bb   : > { %v6425_v27 = vadd.f32 %v6378_v41, %v1121_v49  ;;  %v6428_v20 = vadd.f32 %v6378_v41, %v1122_v7  ;;  %v6431_v63 = vadd.f32 %v6378_v41, %v1123_v17  ;;  %v6434_v5 = vadd.f32 %v6378_v41, %v1124_v10  ;;  %v5362_v10 = vld [vmem:[#allocation8 + $0x1c0] sm:$0xff]  }
 0x2bc   : > { %v6437_v2 = vadd.f32 %v6378_v41, %v1125_v59  ;;  %v1062_v16 = vmul.f32 %v6302_v29, %v1028_v37  ;;  %v1096_v8 = vmul.f32 %v6351_v11, %v1057_v6  ;;  %v1097_v42 = vmul.f32 %v6351_v11, %v1058_v52  ;;  %v7924_v59 = vld [vmem:[#allocation23_spill] sm:$0xff]  ;;  %4890 = vmatprep.subr.bf16.mxu0 %v5362_v10 }
 0x2bd   : > { %v1098_v0 = vmul.f32 %v6351_v11, %v1059_v51  ;;  %v6444_v47 = vrot.slane %v7869_v35, 1  ;;  %v1029_v57 = vsub.f32 %v7920_v26, %v6290_v50  ;;  %v1030_v23 = vsub.f32 %v7921_v61, %v6290_v50 }
 0x2be   : > { %v1031_v4 = vsub.f32 %v7922_v3, %v6290_v50  ;;  %v1099_v45 = vmul.f32 %v6351_v11, %v1060_v31  ;;  %v1032_v15 = vsub.f32 %v7923_v30, %v6290_v50  ;;  %v1100_v49 = vmul.f32 %v6351_v11, %v1061_v24 }
 0x2bf   : > { %v6457_v7 = vadd.f32 %v6378_v41, %v1094_v39  ;;  %v6460_v17 = vadd.f32 %v6378_v41, %v1095_v25  ;;  %v1033_v43 = vsub.f32 %v7924_v59, %v6290_v50  ;;  %v1101_v18 = vmul.f32 %v6351_v11, %v1062_v16 }
 0x2c0   : > { %v1135_v38 = vadd.f32 %v6378_v41, %v1096_v8  ;;  %v1136_v40 = vadd.f32 %v6378_v41, %v1097_v42  ;;  %v1034_v33 = vsub.f32 %v7925_v44, %v6290_v50  ;;  %v1035_v13 = vsub.f32 %v7926_v55, %v6290_v50 }
 0x2c1   : > { %v1036_v32 = vsub.f32 %v7927_v36, %v6290_v50  ;;  %v1137_v48 = vadd.f32 %v6378_v41, %v1098_v0  ;;  %v1063_v28 = vmul.f32 %v6302_v29, %v1029_v57  ;;  %v1064_v37 = vmul.f32 %v6302_v29, %v1030_v23 }
 0x2c2   : > { %v1065_v6 = vmul.f32 %v6302_v29, %v1031_v4  ;;  %v1138_v34 = vadd.f32 %v6378_v41, %v1099_v45  ;;  %v1066_v52 = vmul.f32 %v6302_v29, %v1032_v15  ;;  %v1139_v51 = vadd.f32 %v6378_v41, %v1100_v49 }
 0x2c3   : > { %v1197_v31 = vmul.f32 0.70710677, %v6457_v7  ;;  %v1198_v50 = vmul.f32 0.70710677, %v6460_v17  ;;  %v1067_v24 = vmul.f32 %v6302_v29, %v1033_v43  ;;  %v1140_v39 = vadd.f32 %v6378_v41, %v1101_v18 }
 0x2c4   : > { %v1199_v25 = vmul.f32 0.70710677, %v1135_v38  ;;  %v1200_v16 = vmul.f32 0.70710677, %v1136_v40  ;;  %v1068_v8 = vmul.f32 %v6302_v29, %v1034_v33  ;;  %v1069_v42 = vmul.f32 %v6302_v29, %v1035_v13 }
 0x2c5   : > { %v1201_v0 = vmul.f32 0.70710677, %v1137_v48  ;;  %5398 = verf.f32 %v1197_v31  ;;  %v1070_v26 = vmul.f32 %v6302_v29, %v1036_v32  ;;  %v1202_v57 = vmul.f32 0.70710677, %v1138_v34 }
 0x2c6   : > { %5400 = verf.f32 %v1198_v50  ;;  %v1102_v61 = vmul.f32 %v6351_v11, %v1063_v28  ;;  %v1103_v23 = vmul.f32 %v6351_v11, %v1064_v37  ;;  %v1203_v3 = vmul.f32 0.70710677, %v1139_v51  ;;  %v5367_v37 = vld [vmem:[#allocation8 + $0x138] sm:$0xff]  }
 0x2c7   : > { %5402 = verf.f32 %v1199_v25  ;;  %v1104_v4 = vmul.f32 %v6351_v11, %v1065_v6  ;;  %v1105_v45 = vmul.f32 %v6351_v11, %v1066_v52  ;;  %v1204_v30 = vmul.f32 0.70710677, %v1140_v39  ;;  %4793 = vmatpush3.bf16.msra.mxu1 %v5367_v37 }
 0x2c8   : > { %5404 = verf.f32 %v1200_v16  ;;  %v1106_v15 = vmul.f32 %v6351_v11, %v1067_v24  ;;  %v1107_v49 = vmul.f32 %v6351_v11, %v1068_v8  ;;  %v1108_v29 = vmul.f32 %v6351_v11, %v1069_v42 }
 0x2c9   : > { %5406 = verf.f32 %v1201_v0  ;;  %v1109_v59 = vmul.f32 %v6351_v11, %v1070_v26  ;;  %v1110_v43 = vmul.f32 %v6351_v11, %v6329_v1  ;;  %v1111_v18 = vmul.f32 %v6351_v11, %v6332_v54 }
 0x2ca   : > { %5408 = verf.f32 %v1202_v57  ;;  %v1141_v44 = vadd.f32 %v6378_v41, %v1102_v61  ;;  %v1142_v33 = vadd.f32 %v6378_v41, %v1103_v23  ;;  %v1143_v55 = vadd.f32 %v6378_v41, %v1104_v4  ;;  %v6533_v23 = vld [vmem:[#allocation8 + $0x200] sm:$0xff]  }
 0x2cb   : > { %5410 = verf.f32 %v1203_v3  ;;  %v6510_v13 = vsel %vm6495_vm5, %v6444_v47, 0  ;;  %v1144_v36 = vadd.f32 %v6378_v41, %v1105_v45  ;;  %v1145_v1 = vadd.f32 %v6378_v41, %v1106_v15  ;;  %5098 = vmatprep.subr.bf16.mxu1 %v6533_v23 }
 0x2cc   : > { %5412 = verf.f32 %v1204_v30  ;;  %v6515_v54 = vadd.f32 %v6378_v41, %v1107_v49  ;;  %v6518_v11 = vadd.f32 %v6378_v41, %v1108_v29  ;;  %v6521_v32 = vadd.f32 %v6378_v41, %v1109_v59 }
 0x2cd   : > { %v6524_v60 = vadd.f32 %v6378_v41, %v1110_v43  ;;  %v6527_v28 = vadd.f32 %v6378_v41, %v1111_v18  ;;  %v1167_v47 = vmul.f32 0.5, %v1135_v38  ;;  %v1168_v52 = vmul.f32 0.5, %v1136_v40 }
 0x2ce   : > { %v1169_v31 = vmul.f32 0.5, %v1137_v48  ;;  %v1170_v50 = vmul.f32 0.5, %v1138_v34  ;;  %v1205_v24 = vmul.f32 0.70710677, %v1141_v44  ;;  %v1171_v16 = vmul.f32 0.5, %v1139_v51 }
 0x2cf   : > { %v5399_v6 = vpop.eup %5398  ;;  %v1206_v8 = vmul.f32 0.70710677, %v1142_v33  ;;  %v1165_v42 = vmul.f32 0.5, %v6457_v7  ;;  %v1172_v57 = vmul.f32 0.5, %v1140_v39  ;;  %v6530_v61 = vmul.f32 0.5, %v1141_v44 }
 0x2d0   : > { %v5401_v25 = vpop.eup %5400  ;;  %v1261_v0 = vadd.f32 1.0, %v5399_v6  ;;  %v1166_v41 = vmul.f32 0.5, %v6460_v17  ;;  %v6535_v48 = vmul.f32 0.5, %v1142_v33  ;;  %v6537_v34 = vmul.f32 0.5, %v1143_v55 }
 0x2d1   : > { %v5403_v26 = vpop.eup %5402  ;;  %v1262_v38 = vadd.f32 1.0, %v5401_v25  ;;  %v6539_v7 = vmul.f32 0.5, %v1144_v36  ;;  %5414 = verf.f32 %v1205_v24  ;;  %v6542_v17 = vmul.f32 0.5, %v1145_v1 }
 0x2d2   : > { %v5405_v40 = vpop.eup %5404  ;;  %v1293_v51 = vmul.f32 %v1261_v0, %v1165_v42  ;;  %v1263_v3 = vadd.f32 1.0, %v5403_v26  ;;  %5416 = verf.f32 %v1206_v8  ;;  %v1207_v59 = vmul.f32 0.70710677, %v1143_v55 }
 0x2d3   : > { %v5407_v4 = vpop.eup %5406  ;;  %v1294_v45 = vmul.f32 %v1262_v38, %v1166_v41  ;;  %v1264_v39 = vadd.f32 1.0, %v5405_v40  ;;  %v6547_v37 = vmul.f32 0.5, %v6515_v54  ;;  %v1208_v6 = vmul.f32 0.70710677, %v1144_v36 }
 0x2d4   : > { %v5409_v30 = vpop.eup %5408  ;;  %v1295_v15 = vmul.f32 %v1263_v3, %v1167_v47  ;;  %v1265_v49 = vadd.f32 1.0, %v5407_v4  ;;  %v6550_v42 = vmul.f32 0.5, %v6518_v11  ;;  %v1209_v0 = vmul.f32 0.70710677, %v1145_v1 }
 0x2d5   : > { %v5411_v29 = vpop.eup %5410  ;;  %v6544_v43 = vpack.c.bf16 %v1294_v45, %v1293_v51  ;;  %v1296_v18 = vmul.f32 %v1264_v39, %v1168_v52  ;;  %v1266_v44 = vadd.f32 1.0, %v5409_v30  ;;  %v1213_v52 = vmul.f32 0.70710677, %v6524_v60 }
 0x2d6   : > { %v5413_v33 = vpop.eup %5412  ;;  %v1297_v24 = vmul.f32 %v1265_v49, %v1169_v31  ;;  %v1267_v25 = vadd.f32 1.0, %v5411_v29  ;;  %v1214_v8 = vmul.f32 0.70710677, %v6527_v28  ;;  %5418 = verf.f32 %v1207_v59  ;;  %v5363_v49 = vld [vmem:[#allocation8 + $0x180] sm:$0xff]   ;;  %v5364_v59 = vld [vmem:[#allocation8 + $0x1c8] sm:$0xff]  }
 0x2d7   : > { %2479 = vmatprep.mubr.bf16.mxu1 %v6544_v43  ;;  %v1349_v47 = vshrl.u32 %v6544_v43, 16  ;;  %v6554_v55 = vpack.c.bf16 %v1296_v18, %v1295_v15  ;;  %v1298_v26 = vmul.f32 %v1266_v44, %v1170_v50  ;;  %v1268_v41 = vadd.f32 1.0, %v5413_v33 }
 0x2d8   : > { %v1352_v31 = vshll.u32 %v6544_v43, 16  ;;  %5420 = verf.f32 %v1208_v6  ;;  %v1299_v40 = vmul.f32 %v1267_v25, %v1171_v16  ;;  %v1210_v3 = vmul.f32 0.70710677, %v6515_v54 }
 0x2d9   : > { %v1351_v36 = vrot.slane %v1349_v47, 7  ;;  %v1356_v38 = vshrl.u32 %v6554_v55, 16  ;;  %v6560_v1 = vpack.c.bf16 %v1298_v26, %v1297_v24  ;;  %v1300_v51 = vmul.f32 %v1268_v41, %v1172_v57 }
 0x2da   : > { %v1359_v50 = vshll.u32 %v6554_v55, 16  ;;  %v6567_v39 = vmul.f32 0.5, %v6521_v32  ;;  %v1211_v30 = vmul.f32 0.70710677, %v6518_v11  ;;  %5422 = verf.f32 %v1213_v52 }
 0x2db   : > { %v1354_v4 = vor.u32 %v1352_v31, %v1351_v36  ;;  %v1358_v45 = vrot.slane %v1356_v38, 7  ;;  %v7871_v15 = vshrl.u32 %v6560_v1, 16  ;;  %v5415_v29 = vpop.eup %5414  ;;  %v1212_v16 = vmul.f32 0.70710677, %v6521_v32 }
 0x2dc   : > { %5424 = verf.f32 %v1209_v0  ;;  %v5417_v18 = vpop.eup %5416  ;;  %v1215_v44 = vmul.f32 0.70710677, %v6398_v46  ;;  %v1522_v11 = vrot.slane %v1352_v31, 1  ;;  %v6575_v33 = vpack.c.bf16 %v1300_v51, %v1299_v40  ;;  %v5368_v31 = vld [vmem:[#allocation8 + $0x1d0] sm:$0xff]  }
 0x2dd   : > { %v1473_v54 = vsel %vm6281_vm2, 0, %v1354_v4  ;;  %v1361_v57 = vor.u32 %v1359_v50, %v1358_v45  ;;  %5426 = verf.f32 %v1214_v8  ;;  %v1216_v6 = vmul.f32 0.70710677, %v6401_v58  ;;  %v5365_v8 = vld [vmem:[#allocation8 + $0x188] sm:$0xff]  }
 0x2de   : > { %2480 = vmatmul.mubr.bf16.gmra.mrb[20].mxu1 %v1473_v54  ;;  %2632 = vmatprep.mubr.bf16.mxu0 %v1473_v54  ;;  %5428 = verf.f32 %v1210_v3  ;;  %v1365_v24 = vrot.slane %v7871_v15, 7  ;;  %v6587_v25 = vmul.f32 0.5, %v6524_v60  ;;  %v1217_v0 = vmul.f32 0.70710677, %v6404_v62 }
 0x2df   : > { %2487 = vmatprep.mubr.bf16.mxu1 %v6554_v55  ;;  %2633 = vmatmul.mubr.bf16.vlgmr.msra.gmra.mrb[16].mxu0 %v6510_v13  ;;  %v6582_v32 = vsel %vm6281_vm2, 0, %v1361_v57  ;;  %5430 = verf.f32 %v1211_v30  ;;  %v1269_v52 = vadd.f32 1.0, %v5415_v29  ;;  %v1218_v26 = vmul.f32 0.70710677, %v6407_v56 }
 0x2e0   : > { %2640 = vmatprep.mubr.bf16.mxu0 %v6582_v32  ;;  %4891 = vmatpush3.bf16.msra.mxu0 %v5363_v49  ;;  %5432 = verf.f32 %v1212_v16  ;;  %v1366_v41 = vshll.u32 %v6560_v1, 16  ;;  %v1270_v36 = vadd.f32 1.0, %v5417_v18  ;;  %v1219_v40 = vmul.f32 0.70710677, %v6410_v14  ;;  %v5419_v3 = vpop.eup %5418 }
 0x2e1   : > { %4892 = vmatprep.subr.bf16.mxu0 %v5364_v59  ;;  %5434 = verf.f32 %v1215_v44  ;;  %v1523_v60 = vor.u32 %v1522_v11, %v1349_v47  ;;  %v7870_v51 = vshrl.u32 %v6575_v33, 16  ;;  %v1301_v45 = vmul.f32 %v1269_v52, %v6530_v61  ;;  %v5369_v47 = vld [vmem:[#allocation8 + $0x190] sm:$0xff]  }
 0x2e2   : > { %5436 = verf.f32 %v1216_v6  ;;  %v1368_v4 = vor.u32 %v1366_v41, %v1365_v24  ;;  %v1302_v30 = vmul.f32 %v1270_v36, %v6535_v48  ;;  %v5421_v49 = vpop.eup %5420  ;;  %v6598_v29 = vmul.f32 0.5, %v6527_v28  ;;  %v5370_v48 = vld [vmem:[#allocation8 + $0x1d8] sm:$0xff]  }
 0x2e3   : > { %v6601_v16 = vmul.f32 0.5, %v6398_v46  ;;  %v1220_v54 = vmul.f32 0.70710677, %v6413_v22  ;;  %5438 = verf.f32 %v1217_v0  ;;  %v6605_v57 = vmul.f32 0.5, %v6401_v58  ;;  %v5371_v36 = vld [vmem:[#allocation8 + $0x198] sm:$0xff]  }
 0x2e4   : > { %4893 = vmatpush3.bf16.msra.mxu0 %v5365_v8  ;;  %v1221_v59 = vmul.f32 0.70710677, %v6416_v9  ;;  %5440 = verf.f32 %v1218_v26  ;;  %v1524_v61 = vrot.slane %v1359_v50, 1  ;;  %v5423_v18 = vpop.eup %5422  ;;  %v1222_v28 = vmul.f32 0.70710677, %v6419_v53 }
 0x2e5   : > { %4894 = vmatprep.subr.bf16.mxu0 %v5368_v31  ;;  %5442 = verf.f32 %v1219_v40  ;;  %v6612_v46 = vsel %vm6495_vm5, %v1523_v60, 0  ;;  %v1372_v58 = vrot.slane %v7870_v51, 7  ;;  %v6620_v50 = vsel %vm6281_vm2, 0, %v1368_v4 }
 0x2e6   : > { %2488 = vmatmul.mubr.bf16.gmra.mrb[24].mxu1 %v6582_v32  ;;  %v5425_v44 = vpop.eup %5424  ;;  %v6622_v11 = vpack.c.bf16 %v1302_v30, %v1301_v45  ;;  %v1271_v6 = vadd.f32 1.0, %v5419_v3  ;;  %v1272_v24 = vadd.f32 1.0, %v5421_v49  ;;  %v6625_v52 = vmul.f32 0.5, %v6404_v62  ;;  %v5372_v62 = vld [vmem:[#allocation8 + $0x1e0] sm:$0xff]  }
 0x2e7   : > { %2495 = vmatprep.mubr.bf16.mxu1 %v6560_v1  ;;  %2641 = vmatmul.mubr.bf16.gmra.mrb[20].mxu0 %v6612_v46  ;;  %v5427_v0 = vpop.eup %5426  ;;  %v1223_v8 = vmul.f32 0.70710677, %v6422_v19  ;;  %5444 = verf.f32 %v1220_v54  ;;  %v1373_v26 = vshll.u32 %v6575_v33, 16  ;;  %v1227_v40 = vmul.f32 0.70710677, %v6434_v5 }
 0x2e8   : > { %2648 = vmatprep.mubr.bf16.mxu0 %v6620_v50  ;;  %4895 = vmatpush3.bf16.msra.mxu0 %v5369_v47  ;;  %v5429_v31 = vpop.eup %5428  ;;  %5446 = verf.f32 %v1221_v59  ;;  %v1525_v60 = vor.u32 %v1524_v61, %v1356_v38  ;;  %v1277_v3 = vadd.f32 1.0, %v5423_v18  ;;  %v1228_v45 = vmul.f32 0.70710677, %v6437_v2 }
 0x2e9   : > { %4896 = vmatprep.subr.bf16.mxu0 %v5370_v48  ;;  %v5431_v4 = vpop.eup %5430  ;;  %5448 = verf.f32 %v1222_v28  ;;  %v1375_v30 = vor.u32 %v1373_v26, %v1372_v58  ;;  %v1526_v49 = vrot.slane %v1366_v41, 1  ;;  %v7872_v47 = vshrl.u32 %v6622_v11, 16  ;;  %v5373_v41 = vld [vmem:[#allocation8 + $0x1a0] sm:$0xff]  }
 0x2ea   : > { %v6634_v54 = vpop.eup %5432  ;;  %v1303_v35 = vmul.f32 %v1271_v6, %v6537_v34  ;;  %v1304_v59 = vmul.f32 %v1272_v24, %v6539_v7  ;;  %v1278_v51 = vadd.f32 1.0, %v5427_v0  ;;  %v6640_v38 = vmul.f32 0.5, %v6407_v56  ;;  %v5374_v56 = vld [vmem:[#allocation8 + $0x1e8] sm:$0xff]  }
 0x2eb   : > { %v5435_v15 = vpop.eup %5434  ;;  %v1224_v61 = vmul.f32 0.70710677, %v6425_v27  ;;  %v1225_v48 = vmul.f32 0.70710677, %v6428_v20  ;;  %5450 = verf.f32 %v1223_v8  ;;  %v1226_v28 = vmul.f32 0.70710677, %v6431_v63 }
 0x2ec   : > { %4897 = vmatpush3.bf16.msra.mxu0 %v5371_v36  ;;  %v5437_v18 = vpop.eup %5436  ;;  %5452 = verf.f32 %v1227_v40  ;;  %v6647_v34 = vsel %vm6495_vm5, %v1525_v60, 0  ;;  %v1309_v7 = vmul.f32 %v1277_v3, %v6587_v25  ;;  %v7930_v6 = vshrl.u32 %v6560_v1, 16 }
 0x2ed   : > { %4898 = vmatprep.subr.bf16.mxu0 %v5372_v62  ;;  %v5439_v58 = vpop.eup %5438  ;;  %5454 = verf.f32 %v1228_v45  ;;  %v1273_v0 = vadd.f32 1.0, %v5425_v44  ;;  %v1274_v8 = vadd.f32 1.0, %v5429_v31  ;;  %v6657_v40 = vsel %vm6281_vm2, 0, %v1375_v30  ;;  %v5375_v30 = vld [vmem:[#allocation8 + $0x1a8] sm:$0xff]  }
 0x2ee   : > { %2496 = vmatmul.mubr.bf16.gmra.mrb[28].mxu1 %v6620_v50  ;;  %v1527_v24 = vor.u32 %v1526_v49, %v7930_v6  ;;  %v5441_v36 = vpop.eup %5440  ;;  %v1379_v25 = vrot.slane %v7872_v47, 7  ;;  %v6661_v60 = vpack.c.bf16 %v1304_v59, %v1303_v35  ;;  %v1310_v3 = vmul.f32 %v1278_v51, %v6598_v29  ;;  %v5377_v51 = vld [vmem:[#allocation8 + $0x1f0] sm:$0xff]  }
 0x2ef   : > { %2503 = vmatprep.mubr.bf16.mxu1 %v6575_v33  ;;  %2649 = vmatmul.mubr.bf16.gmra.mrb[24].mxu0 %v6647_v34  ;;  %v5443_v62 = vpop.eup %5442  ;;  %v1187_v44 = vmul.f32 0.5, %v6410_v14  ;;  %v1188_v31 = vmul.f32 0.5, %v6413_v22  ;;  %v6667_v45 = vmul.f32 0.5, %v6416_v9  ;;  %5456 = verf.f32 %v1224_v61 }
 0x2f0   : > { %2656 = vmatprep.mubr.bf16.mxu0 %v6657_v40  ;;  %4899 = vmatpush3.bf16.msra.mxu0 %v5373_v41  ;;  %5458 = verf.f32 %v1225_v48  ;;  %v1380_v49 = vshll.u32 %v6622_v11, 16  ;;  %v1528_v35 = vrot.slane %v1373_v26, 1  ;;  %v6671_v59 = vpack.c.bf16 %v1310_v3, %v1309_v7 }
 0x2f1   : > { %4900 = vmatprep.subr.bf16.mxu0 %v5374_v56  ;;  %v5445_v29 = vpop.eup %5444  ;;  %v1305_v14 = vmul.f32 %v1273_v0, %v6542_v17  ;;  %v1306_v22 = vmul.f32 %v1274_v8, %v6547_v37  ;;  %v1279_v9 = vadd.f32 1.0, %v5435_v15  ;;  %v1280_v6 = vadd.f32 1.0, %v5437_v18  ;;  %v5378_v15 = vld [vmem:[#allocation8 + $0x1b0] sm:$0xff]  }
 0x2f2   : > { %v5447_v61 = vpop.eup %5446  ;;  %5460 = verf.f32 %v1226_v28  ;;  %v6677_v41 = vsel %vm6495_vm5, %v1527_v24, 0  ;;  %v1382_v26 = vor.u32 %v1380_v49, %v1379_v25  ;;  %v1384_v48 = vshrl.u32 %v6661_v60, 16  ;;  %v5379_v25 = vld [vmem:[#allocation8 + $0x1f8] sm:$0xff]  }
 0x2f3   : > { %v5449_v7 = vpop.eup %5448  ;;  %v1275_v56 = vadd.f32 1.0, %v5431_v4  ;;  %v1311_v3 = vmul.f32 %v1279_v9, %v6601_v16  ;;  %v1312_v17 = vmul.f32 %v1280_v6, %v6605_v57  ;;  %v1281_v37 = vadd.f32 1.0, %v5439_v58  ;;  %v5380_v9 = vld [vmem:[#allocation8 + $0x1b8] sm:$0xff]  }
 0x2f4   : > { %4901 = vmatpush3.bf16.msra.mxu0 %v5375_v30  ;;  %v7931_v18 = vshrl.u32 %v6575_v33, 16  ;;  %v1276_v24 = vadd.f32 1.0, %v6634_v54  ;;  %v1282_v0 = vadd.f32 1.0, %v5441_v36  ;;  %v1283_v8 = vadd.f32 1.0, %v5443_v62 }
 0x2f5   : > { %4902 = vmatprep.subr.bf16.mxu0 %v5377_v51  ;;  %v5451_v47 = vpop.eup %5450  ;;  %v6688_v4 = vpack.c.bf16 %v1306_v22, %v1305_v14  ;;  %v6690_v16 = vpack.c.bf16 %v1312_v17, %v1311_v3  ;;  %v1313_v57 = vmul.f32 %v1281_v37, %v6625_v52  ;;  %v1284_v58 = vadd.f32 1.0, %v5445_v29 }
 0x2f6   : > { %v1529_v28 = vor.u32 %v1528_v35, %v7931_v18  ;;  %2504 = vmatmul.mubr.bf16.gmra.mrb[32].mxu1 %v6657_v40  ;;  %v5453_v30 = vpop.eup %5452  ;;  %v6697_v54 = vsel %vm6281_vm2, 0, %v1382_v26  ;;  %v1386_v36 = vrot.slane %v1384_v48, 7  ;;  %v1314_v62 = vmul.f32 %v1282_v0, %v6640_v38 }
 0x2f7   : > { %2511 = vmatprep.mubr.bf16.mxu1 %v6622_v11  ;;  %2657 = vmatmul.mubr.bf16.gmra.mrb[28].mxu0 %v6677_v41  ;;  %v1285_v35 = vadd.f32 1.0, %v5447_v61  ;;  %v5455_v51 = vpop.eup %5454  ;;  %v1190_v14 = vmul.f32 0.5, %v6419_v53  ;;  %v1307_v52 = vmul.f32 %v1275_v56, %v6550_v42  ;;  %v1315_v29 = vmul.f32 %v1283_v8, %v1187_v44 }
 0x2f8   : > { %2664 = vmatprep.mubr.bf16.mxu0 %v6697_v54  ;;  %v1316_v22 = vmul.f32 %v1284_v58, %v1188_v31  ;;  %4903 = vmatpush3.bf16.msra.mxu0 %v5378_v15  ;;  %v1387_v6 = vshll.u32 %v6661_v60, 16  ;;  %v1308_v26 = vmul.f32 %v1276_v24, %v6567_v39  ;;  %v6707_v3 = vpack.c.bf16 %v1314_v62, %v1313_v57 }
 0x2f9   : > { %v1286_v17 = vadd.f32 1.0, %v5449_v7  ;;  %4904 = vmatprep.subr.bf16.mxu0 %v5379_v25  ;;  %v5457_v38 = vpop.eup %5456  ;;  %v1291_v61 = vadd.f32 1.0, %v5453_v30  ;;  %v1391_v53 = vshrl.u32 %v6688_v4, 16  ;;  %v1317_v42 = vmul.f32 %v1285_v35, %v6667_v45 }
 0x2fa   : > { %v6710_v37 = vpack.c.bf16 %v1316_v22, %v1315_v29  ;;  %v5459_v44 = vpop.eup %5458  ;;  %v1292_v31 = vadd.f32 1.0, %v5455_v51  ;;  %v1389_v56 = vor.u32 %v1387_v6, %v1386_v36  ;;  %v1287_v18 = vadd.f32 1.0, %v5451_v47 }
 0x2fb   : > { %v1318_v15 = vmul.f32 %v1286_v17, %v1190_v14  ;;  %v1191_v0 = vmul.f32 0.5, %v6422_v19  ;;  %v1192_v39 = vmul.f32 0.5, %v6425_v27  ;;  %v1195_v24 = vmul.f32 0.5, %v6434_v5 }
 0x2fc   : > { %4905 = vmatpush3.bf16.msra.mxu0 %v5380_v9  ;;  %v5461_v7 = vpop.eup %5460  ;;  %v1196_v8 = vmul.f32 0.5, %v6437_v2  ;;  %v1288_v57 = vadd.f32 1.0, %v5457_v38  ;;  %v6722_v45 = vsel %vm6495_vm5, %v1529_v28, 0  ;;  %v1530_v19 = vrot.slane %v1380_v49, 1 }
 0x2fd   : > { %v6717_v25 = vpack.c.bf16 %v1318_v15, %v1317_v42  ;;  %v6726_v47 = vpack.c.bf16 %v1308_v26, %v1307_v52  ;;  %v1319_v27 = vmul.f32 %v1287_v18, %v1191_v0  ;;  %v1323_v58 = vmul.f32 %v1291_v61, %v1195_v24 }
 0x2fe   : > { %2512 = vmatmul.mubr.bf16.gmra.mrb[36].mxu1 %v6697_v54  ;;  %v1324_v30 = vmul.f32 %v1292_v31, %v1196_v8  ;;  %v6732_v5 = vsel %vm6281_vm2, 0, %v1389_v56  ;;  %v1393_v2 = vrot.slane %v1391_v53, 7  ;;  %v1193_v28 = vmul.f32 0.5, %v6428_v20 }
 0x2ff   : > { %2519 = vmatprep.mubr.bf16.mxu1 %v6661_v60  ;;  %2665 = vmatmul.mubr.bf16.gmra.mrb[32].mxu0 %v6722_v45  ;;  %v1320_v49 = vmul.f32 %v1288_v57, %v1192_v39  ;;  %v1289_v36 = vadd.f32 1.0, %v5459_v44  ;;  %v1194_v62 = vmul.f32 0.5, %v6431_v63  ;;  %v1394_v35 = vshll.u32 %v6688_v4, 16 }
 0x300   : > { %2672 = vmatprep.mubr.bf16.mxu0 %v6732_v5  ;;  %v1290_v51 = vadd.f32 1.0, %v5461_v7  ;;  %v7932_v14 = vshrl.u32 %v6622_v11, 16  ;;  %v1398_v26 = vshrl.u32 %v6726_v47, 16  ;;  %v6745_v20 = vpack.c.bf16 %v1324_v30, %v1323_v58 }
 0x301   : > { %v6742_v29 = vpack.c.bf16 %v1320_v49, %v1319_v27  ;;  %v1321_v22 = vmul.f32 %v1289_v36, %v1193_v28  ;;  %v1396_v9 = vor.u32 %v1394_v35, %v1393_v2  ;;  %v1532_v61 = vrot.slane %v1387_v6, 1 }
 0x302   : > { %v1531_v52 = vor.u32 %v1530_v19, %v7932_v14  ;;  %v1322_v17 = vmul.f32 %v1290_v51, %v1194_v62  ;;  %v1607_v42 = vshll.u32 %v6745_v20, 16  ;;  %v1400_v31 = vrot.slane %v1398_v26, 7 }
 0x303   : > { %v6759_v44 = vsel %vm6281_vm2, 0, %v1396_v9  ;;  %v1604_v56 = vshrl.u32 %v6745_v20, 16  ;;  %v1401_v6 = vshll.u32 %v6726_v47, 16  ;;  %v1533_v18 = vor.u32 %v1532_v61, %v1384_v48 }
 0x304   : > { %v6747_v38 = vpack.c.bf16 %v1322_v17, %v1321_v22  ;;  %v6752_v63 = vsel %vm6495_vm5, %v1531_v52, 0  ;;  %v1644_v15 = vrot.slane %v1607_v42, 1  ;;  %v1405_v7 = vshrl.u32 %v6671_v59, 16 }
 0x305   : > { %v1403_v39 = vor.u32 %v1401_v6, %v1400_v31  ;;  %v6776_v24 = vsel %vm6495_vm5, %v1533_v18, 0  ;;  %v1534_v8 = vrot.slane %v1394_v35, 1  ;;  %v1408_v19 = vshll.u32 %v6671_v59, 16 }
 0x306   : > { %2520 = vmatmul.mubr.bf16.gmra.mrb[40].mxu1 %v6732_v5  ;;  %v6770_v0 = vor.u32 %v1644_v15, %v1604_v56  ;;  %v1407_v57 = vrot.slane %v1405_v7, 7  ;;  %v1412_v30 = vshrl.u32 %v6690_v16, 16  ;;  %v1536_v28 = vrot.slane %v1401_v6, 1 }
 0x307   : > { %2527 = vmatprep.mubr.bf16.mxu1 %v6688_v4  ;;  %2673 = vmatmul.mubr.bf16.gmra.mrb[36].mxu0 %v6752_v63  ;;  %v6782_v48 = vsel %vm6281_vm2, 0, %v1403_v39  ;;  %v1535_v27 = vor.u32 %v1534_v8, %v1391_v53  ;;  %v1415_v53 = vshll.u32 %v6690_v16, 16  ;;  %v1419_v51 = vshrl.u32 %v6707_v3, 16 }
 0x308   : > { %2680 = vmatprep.mubr.bf16.mxu0 %v6759_v44  ;;  %v1410_v58 = vor.u32 %v1408_v19, %v1407_v57  ;;  %v1414_v36 = vrot.slane %v1412_v30, 7  ;;  %v1537_v62 = vor.u32 %v1536_v28, %v1398_v26  ;;  %v1538_v52 = vrot.slane %v1408_v19, 1 }
 0x309   : > { %v6792_v2 = vsel %vm6495_vm5, %v1535_v27, 0  ;;  %v1421_v9 = vrot.slane %v1419_v51, 7  ;;  %v1422_v26 = vshll.u32 %v6707_v3, 16  ;;  %v1426_v31 = vshrl.u32 %v6710_v37, 16 }
 0x30a   : > { %v6798_v49 = vsel %vm6281_vm2, 0, %v1410_v58  ;;  %v1417_v35 = vor.u32 %v1415_v53, %v1414_v36  ;;  %v6806_v14 = vsel %vm6495_vm5, %v1537_v62, 0  ;;  %v1539_v17 = vor.u32 %v1538_v52, %v1405_v7 }
 0x30b   : > { %v1424_v61 = vor.u32 %v1422_v26, %v1421_v9  ;;  %v1540_v6 = vrot.slane %v1415_v53, 1  ;;  %v1428_v39 = vrot.slane %v1426_v31, 7  ;;  %v1429_v7 = vshll.u32 %v6710_v37, 16 }
 0x30c   : > { %v6812_v22 = vsel %vm6281_vm2, 0, %v1417_v35  ;;  %v6820_v15 = vsel %vm6495_vm5, %v1539_v17, 0  ;;  %v1433_v19 = vshrl.u32 %v6717_v25, 16  ;;  %v1542_v58 = vrot.slane %v1422_v26, 1 }
 0x30d   : > { %v6826_v18 = vsel %vm6281_vm2, 0, %v1424_v61  ;;  %v1541_v8 = vor.u32 %v1540_v6, %v1412_v30  ;;  %v1431_v57 = vor.u32 %v1429_v7, %v1428_v39  ;;  %v1436_v30 = vshll.u32 %v6717_v25, 16 }
 0x30e   : > { %2528 = vmatmul.mubr.bf16.gmra.mrb[44].mxu1 %v6759_v44  ;;  %v1435_v36 = vrot.slane %v1433_v19, 7  ;;  %v1543_v53 = vor.u32 %v1542_v58, %v1419_v51  ;;  %v1440_v35 = vshrl.u32 %v6742_v29, 16  ;;  %v1544_v9 = vrot.slane %v1429_v7, 1 }
 0x30f   : > { %2535 = vmatprep.mubr.bf16.mxu1 %v6726_v47  ;;  %2681 = vmatmul.mubr.bf16.gmra.mrb[40].mxu0 %v6776_v24  ;;  %v6834_v27 = vsel %vm6495_vm5, %v1541_v8, 0  ;;  %v6840_v28 = vsel %vm6281_vm2, 0, %v1431_v57  ;;  %v1443_v51 = vshll.u32 %v6742_v29, 16  ;;  %v1447_v39 = vshrl.u32 %v6747_v38, 16 }
 0x310   : > { %2688 = vmatprep.mubr.bf16.mxu0 %v6782_v48  ;;  %v1438_v62 = vor.u32 %v1436_v30, %v1435_v36  ;;  %v6848_v52 = vsel %vm6495_vm5, %v1543_v53, 0  ;;  %v1442_v17 = vrot.slane %v1440_v35, 7  ;;  %v1545_v61 = vor.u32 %v1544_v9, %v1426_v31 }
 0x311   : > { %v1546_v8 = vrot.slane %v1436_v30, 1  ;;  %v1449_v58 = vrot.slane %v1447_v39, 7  ;;  %v1450_v31 = vshll.u32 %v6747_v38, 16 }
 0x312   : > { %v6854_v26 = vsel %vm6281_vm2, 0, %v1438_v62  ;;  %v1445_v6 = vor.u32 %v1443_v51, %v1442_v17  ;;  %v6862_v7 = vsel %vm6495_vm5, %v1545_v61, 0  ;;  %v1548_v17 = vrot.slane %v1443_v51, 1 }
 0x313   : > { %v1547_v36 = vor.u32 %v1546_v8, %v1433_v19  ;;  %v1452_v53 = vor.u32 %v1450_v31, %v1449_v58  ;;  %v1606_v8 = vrot.slane %v1604_v56, 7 }
 0x314   : > { %v6868_v57 = vsel %vm6281_vm2, 0, %v1445_v6  ;;  %v1549_v51 = vor.u32 %v1548_v17, %v1440_v35  ;;  %v5381_v17 = vld [vmem:[#allocation8 + $0x208] sm:$0xff]  }
 0x315   : > { %v6875_v30 = vsel %vm6495_vm5, %v1547_v36, 0  ;;  %v6883_v19 = vsel %vm6281_vm2, 0, %v1452_v53  ;;  %v1550_v53 = vrot.slane %v1450_v31, 1 }
 0x316   : > { %2536 = vmatmul.mubr.bf16.gmra.mrb[48].mxu1 %v6782_v48 }
 0x317   : > { %2543 = vmatprep.mubr.bf16.mxu1 %v6671_v59  ;;  %2689 = vmatmul.mubr.bf16.gmra.mrb[44].mxu0 %v6792_v2  ;;  %v1551_v35 = vor.u32 %v1550_v53, %v1447_v39 }
 0x318   : > { %2696 = vmatprep.mubr.bf16.mxu0 %v6798_v49 }
 0x31e   : > { %2544 = vmatmul.mubr.bf16.gmra.mrb[52].mxu1 %v6798_v49 }
 0x31f   : > { %2551 = vmatprep.mubr.bf16.mxu1 %v6690_v16  ;;  %2697 = vmatmul.mubr.bf16.gmra.mrb[48].mxu0 %v6806_v14 }
 0x320   : > { %2704 = vmatprep.mubr.bf16.mxu0 %v6812_v22 }
 0x326   : > { %2552 = vmatmul.mubr.bf16.gmra.mrb[56].mxu1 %v6812_v22 }
 0x327   : > { %2559 = vmatprep.mubr.bf16.mxu1 %v6707_v3  ;;  %2705 = vmatmul.mubr.bf16.gmra.mrb[52].mxu0 %v6820_v15 }
 0x328   : > { %2712 = vmatprep.mubr.bf16.mxu0 %v6826_v18 }
 0x32e   : > { %2560 = vmatmul.mubr.bf16.gmra.mrb[60].mxu1 %v6826_v18 }
 0x32f   : > { %2567 = vmatprep.mubr.bf16.mxu1 %v6710_v37  ;;  %2713 = vmatmul.mubr.bf16.gmra.mrb[56].mxu0 %v6834_v27 }
 0x330   : > { %2720 = vmatprep.mubr.bf16.mxu0 %v6840_v28 }
 0x336   : > { %2568 = vmatmul.mubr.bf16.gmra.mrb[64].mxu1 %v6840_v28 }
 0x337   : > { %2575 = vmatprep.mubr.bf16.mxu1 %v6717_v25  ;;  %2721 = vmatmul.mubr.bf16.gmra.mrb[60].mxu0 %v6848_v52 }
 0x338   : > { %2728 = vmatprep.mubr.bf16.mxu0 %v6854_v26 }
 0x33e   : > { %2576 = vmatmul.mubr.bf16.gmra.mrb[68].mxu1 %v6854_v26 }
 0x33f   : > { %2583 = vmatprep.mubr.bf16.mxu1 %v6742_v29  ;;  %2729 = vmatmul.mubr.bf16.gmra.mrb[64].mxu0 %v6862_v7 }
 0x340   : > { %2736 = vmatprep.mubr.bf16.mxu0 %v6868_v57 }
 0x346   : > { %2584 = vmatmul.mubr.bf16.gmra.mrb[72].mxu1 %v6868_v57 }
 0x347   : > { %2591 = vmatprep.mubr.bf16.mxu1 %v6747_v38  ;;  %2737 = vmatmul.mubr.bf16.gmra.mrb[68].mxu0 %v6875_v30 }
 0x348   : > { %2744 = vmatprep.mubr.bf16.mxu0 %v6883_v19 }
 0x34e   : > { %2592 = vmatmul.mubr.bf16.gmra.mrb[76].mxu1 %v6883_v19 }
 0x34f   : > { %2793 = vmatprep.mubr.bf16.mxu1 %v6612_v46  ;;  %v5383_v46 = vld [vmem:[#allocation8 + $0x218] sm:$0xff]  }
 0x351   : > { %v4570_v62 = vpop.f32.mrb[16].mxu1 }
 0x352   : > { %v4571_v9 = vpop.f32.mrb[17].mxu1 }
 0x353   : > { %v6877_v61 = vadd.f32 %v4571_v9, %v4570_v62  ;;  %v4573_v6 = vpop.f32.mrb[18].mxu1  ;;  %v1609_v62 = vor.u32 %v1607_v42, %v1606_v8  ;;  %v6895_v9 = vsel %vm6495_vm5, %v1549_v51, 0  ;;  %v6907_v42 = vsel %vm6495_vm5, %v1551_v35, 0 }
 0x354   : > { %v4574_v58 = vpop.f32.mrb[19].mxu1  ;;  %2745 = vmatmul.mubr.bf16.gmra.mrb[72].mxu0 %v6895_v9 }
 0x355   : > { %v6888_v36 = vadd.f32 %v4574_v58, %v4573_v6  ;;  %v6901_v56 = vsel %vm6281_vm2, 0, %v1609_v62 }
 0x356   : > { %2752 = vmatprep.mubr.bf16.mxu0 %v6901_v56  ;;  %2794 = vmatmul.mubr.bf16.vlgmr.msra.gmra.mrb[80].mxu1 %v6544_v43  ;;  %v5385_v43 = vld [vmem:[#allocation8 + $0x228] sm:$0xff]  }
 0x357   : > { %5099 = vmatpush3.bf16.msra.mxu1 %v6533_v23  ;;  %2801 = vmatprep.mubr.bf16.mxu1 %v6647_v34  ;;  %v5384_v23 = vld [vmem:[#allocation8 + $0x220] sm:$0xff]  }
 0x358   : > { %5100 = vmatprep.subr.bf16.mxu1 %v5381_v17 }
 0x35b   : > { %5101 = vmatpush3.bf16.msra.mxu1 %v5381_v17 }
 0x35c   : > { %2753 = vmatmul.mubr.bf16.gmra.mrb[76].mxu0 %v6907_v42  ;;  %5102 = vmatprep.subr.bf16.mxu1 %v5382_v21 }
 0x35d   : > { %2954 = vmatprep.mubr.bf16.mxu0 %v6554_v55 }
 0x35e   : > { %2802 = vmatmul.mubr.bf16.gmra.mrb[84].mxu1 %v6554_v55  ;;  %v5386_v55 = vld [vmem:[#allocation8 + $0x230] sm:$0xff]  }
 0x35f   : > { %2809 = vmatprep.mubr.bf16.mxu1 %v6677_v41  ;;  %5103 = vmatpush3.bf16.msra.mxu1 %v5382_v21 }
 0x360   : > { %5104 = vmatprep.subr.bf16.mxu1 %v5383_v46 }
 0x363   : > { %5105 = vmatpush3.bf16.msra.mxu1 %v5383_v46 }
 0x364   : > { %2955 = vmatmul.mubr.bf16.vlgmr.msra.gmra.mrb[80].mxu0 %v6582_v32  ;;  %5106 = vmatprep.subr.bf16.mxu1 %v5384_v23  ;;  %v5387_v32 = vld [vmem:[#allocation8 + $0x238] sm:$0xff]  }
 0x365   : > { %2962 = vmatprep.mubr.bf16.mxu0 %v6560_v1 }
 0x366   : > { %2810 = vmatmul.mubr.bf16.gmra.mrb[88].mxu1 %v6560_v1  ;;  %v6960_v1 = vld [vmem:[%s7842_s4] ss:$0 sm:$0xff] }
 0x367   : > { %2817 = vmatprep.mubr.bf16.mxu1 %v6722_v45  ;;  %5107 = vmatpush3.bf16.msra.mxu1 %v5384_v23 }
 0x368   : > { %5108 = vmatprep.subr.bf16.mxu1 %v5385_v43 }
 0x36b   : > { %5109 = vmatpush3.bf16.msra.mxu1 %v5385_v43 }
 0x36c   : > { %2963 = vmatmul.mubr.bf16.gmra.mrb[84].mxu0 %v6620_v50  ;;  %5110 = vmatprep.subr.bf16.mxu1 %v5386_v55 }
 0x36d   : > { %2970 = vmatprep.mubr.bf16.mxu0 %v6575_v33 }
 0x36e   : > { %2818 = vmatmul.mubr.bf16.gmra.mrb[92].mxu1 %v6575_v33 }
 0x36f   : > { %2825 = vmatprep.mubr.bf16.mxu1 %v6752_v63  ;;  %5111 = vmatpush3.bf16.msra.mxu1 %v5386_v55 }
 0x370   : > { %5112 = vmatprep.subr.bf16.mxu1 %v5387_v32 }
 0x373   : > { %5113 = vmatpush3.bf16.msra.mxu1 %v5387_v32 }
 0x374   : > { %2971 = vmatmul.mubr.bf16.gmra.mrb[88].mxu0 %v6657_v40 }
 0x375   : > { %2978 = vmatprep.mubr.bf16.mxu0 %v6622_v11 }
 0x376   : > { %2826 = vmatmul.mubr.bf16.gmra.mrb[96].mxu1 %v6622_v11 }
 0x377   : > { %2833 = vmatprep.mubr.bf16.mxu1 %v6776_v24 }
 0x37c   : > { %2979 = vmatmul.mubr.bf16.gmra.mrb[92].mxu0 %v6697_v54 }
 0x37d   : > { %2986 = vmatprep.mubr.bf16.mxu0 %v6661_v60 }
 0x37e   : > { %2834 = vmatmul.mubr.bf16.gmra.mrb[100].mxu1 %v6661_v60 }
 0x37f   : > { %2841 = vmatprep.mubr.bf16.mxu1 %v6792_v2 }
 0x384   : > { %2987 = vmatmul.mubr.bf16.gmra.mrb[96].mxu0 %v6732_v5  ;;  %v2477_v5 = vadd.f32 %v6888_v36, %v6960_v1 }
 0x385   : > { %2994 = vmatprep.mubr.bf16.mxu0 %v6688_v4 }
 0x386   : > { %2842 = vmatmul.mubr.bf16.gmra.mrb[104].mxu1 %v6688_v4  ;;  %v2474_v4 = vadd.f32 %v6877_v61, %v6960_v1 }
 0x387   : > { %2849 = vmatprep.mubr.bf16.mxu1 %v6806_v14 }
 0x38c   : > { %2995 = vmatmul.mubr.bf16.gmra.mrb[100].mxu0 %v6759_v44 }
 0x38d   : > { %3002 = vmatprep.mubr.bf16.mxu0 %v6726_v47 }
 0x38e   : > { %2850 = vmatmul.mubr.bf16.gmra.mrb[108].mxu1 %v6726_v47 }
 0x38f   : > { %2857 = vmatprep.mubr.bf16.mxu1 %v6820_v15 }
 0x394   : > { %3003 = vmatmul.mubr.bf16.gmra.mrb[104].mxu0 %v6782_v48 }
 0x395   : > { %3010 = vmatprep.mubr.bf16.mxu0 %v6671_v59 }
 0x396   : > { %2858 = vmatmul.mubr.bf16.gmra.mrb[112].mxu1 %v6671_v59 }
 0x397   : > { %2865 = vmatprep.mubr.bf16.mxu1 %v6834_v27 }
 0x39c   : > { %3011 = vmatmul.mubr.bf16.gmra.mrb[108].mxu0 %v6798_v49 }
 0x39d   : > { %3018 = vmatprep.mubr.bf16.mxu0 %v6690_v16 }
 0x39e   : > { %2866 = vmatmul.mubr.bf16.gmra.mrb[116].mxu1 %v6690_v16 }
 0x39f   : > { %2873 = vmatprep.mubr.bf16.mxu1 %v6848_v52 }
 0x3a4   : > { %3019 = vmatmul.mubr.bf16.gmra.mrb[112].mxu0 %v6812_v22 }
 0x3a5   : > { %3026 = vmatprep.mubr.bf16.mxu0 %v6707_v3 }
 0x3a6   : > { %2874 = vmatmul.mubr.bf16.gmra.mrb[120].mxu1 %v6707_v3 }
 0x3a7   : > { %2881 = vmatprep.mubr.bf16.mxu1 %v6862_v7 }
 0x3ac   : > { %3027 = vmatmul.mubr.bf16.gmra.mrb[116].mxu0 %v6826_v18 }
 0x3ad   : > { %3034 = vmatprep.mubr.bf16.mxu0 %v6710_v37 }
 0x3ae   : > { %2882 = vmatmul.mubr.bf16.gmra.mrb[124].mxu1 %v6710_v37 }
 0x3af   : > { %2889 = vmatprep.mubr.bf16.mxu1 %v6875_v30 }
 0x3b1   : > { %v4576_v33 = vpop.f32.mrb[20].mxu1 }
 0x3b2   : > { %v4577_v50 = vpop.f32.mrb[21].mxu1  ;;  %v4682_v11 = vpop.f32.mrb[16].mxu0 }
 0x3b3   : > { %v4578_v40 = vadd.f32 %v4577_v50, %v4576_v33  ;;  %v4579_v60 = vpop.f32.mrb[22].mxu1  ;;  %v4683_v59 = vpop.f32.mrb[17].mxu0 }
 0x3b4   : > { %3035 = vmatmul.mubr.bf16.gmra.mrb[120].mxu0 %v6840_v28  ;;  %v4684_v16 = vadd.f32 %v4683_v59, %v4682_v11  ;;  %v4580_v54 = vpop.f32.mrb[23].mxu1  ;;  %v4685_v3 = vpop.f32.mrb[18].mxu0 }
 0x3b5   : > { %3042 = vmatprep.mubr.bf16.mxu0 %v6717_v25  ;;  %v4581_v37 = vadd.f32 %v4580_v54, %v4579_v60  ;;  %v4686_v47 = vpop.f32.mrb[19].mxu0  ;;  %v2482_v6 = vadd.f32 %v4578_v40, %v6960_v1 }
 0x3b6   : > { %v6966_v44 = vadd.f32 %v4684_v16, %v2474_v4  ;;  %v4687_v48 = vadd.f32 %v4686_v47, %v4685_v3  ;;  %2890 = vmatmul.mubr.bf16.gmra.mrb[128].mxu1 %v6717_v25  ;;  %v6992_v4 = vsel %vm6495_vm5, %v6770_v0, 0 }
 0x3b7   : > { %2897 = vmatprep.mubr.bf16.mxu1 %v6895_v9  ;;  %v2485_v62 = vadd.f32 %v4581_v37, %v6960_v1 }
 0x3b8   : > { %v6971_v49 = vadd.f32 %v4687_v48, %v2477_v5 }
 0x3b9   : > { %v4582_v22 = vpop.f32.mrb[24].mxu1 }
 0x3ba   : > { %v4583_v18 = vpop.f32.mrb[25].mxu1  ;;  %v4688_v28 = vpop.f32.mrb[20].mxu0 }
 0x3bb   : > { %v4584_v39 = vadd.f32 %v4583_v18, %v4582_v22  ;;  %v4585_v31 = vpop.f32.mrb[26].mxu1  ;;  %v4689_v61 = vpop.f32.mrb[21].mxu0 }
 0x3bc   : > { %3043 = vmatmul.mubr.bf16.gmra.mrb[124].mxu0 %v6854_v26  ;;  %v4690_v8 = vadd.f32 %v4689_v61, %v4688_v28  ;;  %v4586_v58 = vpop.f32.mrb[27].mxu1  ;;  %v4691_v36 = vpop.f32.mrb[22].mxu0 }
 0x3bd   : > { %3050 = vmatprep.mubr.bf16.mxu0 %v6742_v29  ;;  %v4587_v25 = vadd.f32 %v4586_v58, %v4585_v31  ;;  %v4692_v51 = vpop.f32.mrb[23].mxu0  ;;  %v2490_v32 = vadd.f32 %v4584_v39, %v6960_v1 }
 0x3be   : > { %v6976_v26 = vadd.f32 %v4690_v8, %v2482_v6  ;;  %v4693_v53 = vadd.f32 %v4692_v51, %v4691_v36  ;;  %2898 = vmatmul.mubr.bf16.gmra.mrb[132].mxu1 %v6742_v29  ;;  %v7933_v6 = vmov 0  }
 0x3bf   : > { %2905 = vmatprep.mubr.bf16.mxu1 %v6907_v42  ;;  %v2493_v60 = vadd.f32 %v4587_v25, %v6960_v1 }
 0x3c0   : > { %v6981_v35 = vadd.f32 %v4693_v53, %v2485_v62 }
 0x3c1   : > { %v4588_v17 = vpop.f32.mrb[28].mxu1 }
 0x3c2   : > { %v4589_v21 = vpop.f32.mrb[29].mxu1  ;;  %v4694_v46 = vpop.f32.mrb[24].mxu0 }
 0x3c3   : > { %v4590_v23 = vadd.f32 %v4589_v21, %v4588_v17  ;;  %v4591_v43 = vpop.f32.mrb[30].mxu1  ;;  %v4695_v55 = vpop.f32.mrb[25].mxu0 }
 0x3c4   : > { %3051 = vmatmul.mubr.bf16.gmra.mrb[128].mxu0 %v6868_v57  ;;  %v4696_v33 = vadd.f32 %v4695_v55, %v4694_v46  ;;  %v4592_v50 = vpop.f32.mrb[31].mxu1  ;;  %v4697_v11 = vpop.f32.mrb[26].mxu0 }
 0x3c5   : > { %3058 = vmatprep.mubr.bf16.mxu0 %v6747_v38  ;;  %v4593_v29 = vadd.f32 %v4592_v50, %v4591_v43  ;;  %v4698_v40 = vpop.f32.mrb[27].mxu0 }
 0x3c6   : > { %v6986_v57 = vadd.f32 %v4696_v33, %v2490_v32  ;;  %v4699_v59 = vadd.f32 %v4698_v40, %v4697_v11  ;;  %2906 = vmatmul.mubr.bf16.gmra.mrb[136].mxu1 %v6747_v38  ;;  %v2498_v38 = vadd.f32 %v4590_v23, %v6960_v1 }
 0x3c7   : > { %2913 = vmatprep.mubr.bf16.mxu1 %v6992_v4  ;;  %v2501_v39 = vadd.f32 %v4593_v29, %v6960_v1 }
 0x3c8   : > { %v6996_v16 = vadd.f32 %v4699_v59, %v2493_v60 }
 0x3c9   : > { %v4594_v54 = vpop.f32.mrb[32].mxu1 }
 0x3ca   : > { %v4595_v3 = vpop.f32.mrb[33].mxu1  ;;  %v4700_v37 = vpop.f32.mrb[28].mxu0 }
 0x3cb   : > { %v4596_v47 = vadd.f32 %v4595_v3, %v4594_v54  ;;  %v4597_v5 = vpop.f32.mrb[34].mxu1  ;;  %v4701_v48 = vpop.f32.mrb[29].mxu0 }
 0x3cc   : > { %3059 = vmatmul.mubr.bf16.gmra.mrb[132].mxu0 %v6883_v19  ;;  %v4702_v22 = vadd.f32 %v4701_v48, %v4700_v37  ;;  %v4598_v10 = vpop.f32.mrb[35].mxu1  ;;  %v4703_v0 = vpop.f32.mrb[30].mxu0 }
 0x3cd   : > { %3066 = vmatprep.mubr.bf16.mxu0 %v6745_v20  ;;  %v4599_v18 = vadd.f32 %v4598_v10, %v4597_v5  ;;  %v4704_v28 = vpop.f32.mrb[31].mxu0  ;;  %v2506_v53 = vadd.f32 %v4596_v47, %v6960_v1 }
 0x3ce   : > { %v7001_v19 = vadd.f32 %v4702_v22, %v2498_v38  ;;  %v4705_v31 = vadd.f32 %v4704_v28, %v4703_v0  ;;  %2914 = vmatmul.mubr.bf16.gmra.mrb[140].mxu1 %v6745_v20 }
 0x3cf   : > { %5114 = vmatprep.mubr.bf16.mxu1 %v6647_v34 }
 0x3d0   : > { %v7006_v61 = vadd.f32 %v4705_v31, %v2501_v39 }
 0x3d1   : > { %v4600_v8 = vpop.f32.mrb[36].mxu1 }
 0x3d2   : > { %v4601_v58 = vpop.f32.mrb[37].mxu1  ;;  %v4706_v36 = vpop.f32.mrb[32].mxu0 }
 0x3d3   : > { %v4602_v25 = vadd.f32 %v4601_v58, %v4600_v8  ;;  %v4603_v51 = vpop.f32.mrb[38].mxu1  ;;  %v4707_v62 = vpop.f32.mrb[33].mxu0 }
 0x3d4   : > { %3067 = vmatmul.mubr.bf16.gmra.mrb[136].mxu0 %v6901_v56  ;;  %v4708_v17 = vadd.f32 %v4707_v62, %v4706_v36  ;;  %v4604_v21 = vpop.f32.mrb[39].mxu1  ;;  %v4709_v46 = vpop.f32.mrb[34].mxu0  ;;  %v2509_v56 = vadd.f32 %v4599_v18, %v6960_v1 }
 0x3d5   : > { %3074 = vmatprep.mubr.bf16.mxu0 %v7933_v6  ;;  %v4605_v20 = vadd.f32 %v4604_v21, %v4603_v51  ;;  %v4710_v23 = vpop.f32.mrb[35].mxu0  ;;  %v2514_v60 = vadd.f32 %v4602_v25, %v6960_v1 }
 0x3d6   : > { %v7011_v34 = vadd.f32 %v4708_v17, %v2506_v53  ;;  %v4711_v43 = vadd.f32 %v4710_v23, %v4709_v46  ;;  %5115 = vmatmul.mubr.bf16.vlgmr.msra.gmra.mrb[144].mxu1 %v6677_v41 }
 0x3d7   : > { %5118 = vmatprep.mubr.bf16.mxu1 %v6722_v45  ;;  %v2517_v41 = vadd.f32 %v4605_v20, %v6960_v1 }
 0x3d8   : > { %v7016_v55 = vadd.f32 %v4711_v43, %v2509_v56 }
 0x3d9   : > { %v4606_v32 = vpop.f32.mrb[40].mxu1 }
 0x3da   : > { %v4607_v33 = vpop.f32.mrb[41].mxu1  ;;  %v4712_v50 = vpop.f32.mrb[36].mxu0 }
 0x3db   : > { %v4608_v11 = vadd.f32 %v4607_v33, %v4606_v32  ;;  %v4609_v29 = vpop.f32.mrb[42].mxu1  ;;  %v4713_v40 = vpop.f32.mrb[37].mxu0 }
 0x3dc   : > { %3075 = vmatmul.mubr.bf16.gmra.mrb[140].mxu0 %v6287_v12  ;;  %v4714_v59 = vadd.f32 %v4713_v40, %v4712_v50  ;;  %v4610_v54 = vpop.f32.mrb[43].mxu1  ;;  %v4715_v3 = vpop.f32.mrb[38].mxu0 }
 0x3dd   : > { %v4611_v37 = vadd.f32 %v4610_v54, %v4609_v29  ;;  %v4716_v47 = vpop.f32.mrb[39].mxu0  ;;  %v2522_v28 = vadd.f32 %v4608_v11, %v6960_v1 }
 0x3de   : > { %v7020_v12 = vadd.f32 %v4714_v59, %v2514_v60  ;;  %v4717_v45 = vadd.f32 %v4716_v47, %v4715_v3  ;;  %5119 = vmatmul.mubr.bf16.gmra.mrb[148].mxu1 %v6752_v63 }
 0x3df   : > { %5122 = vmatprep.mubr.bf16.mxu1 %v6776_v24  ;;  %v2525_v36 = vadd.f32 %v4611_v37, %v6960_v1 }
 0x3e0   : > { %v7024_v5 = vadd.f32 %v4717_v45, %v2517_v41 }
 0x3e1   : > { %v4612_v48 = vpop.f32.mrb[44].mxu1 }
 0x3e2   : > { %v4613_v38 = vpop.f32.mrb[45].mxu1  ;;  %v4718_v22 = vpop.f32.mrb[40].mxu0 }
 0x3e3   : > { %v4614_v10 = vadd.f32 %v4613_v38, %v4612_v48  ;;  %v4615_v0 = vpop.f32.mrb[46].mxu1  ;;  %v4719_v18 = vpop.f32.mrb[41].mxu0 }
 0x3e4   : > { %v4720_v39 = vadd.f32 %v4719_v18, %v4718_v22  ;;  %v4616_v31 = vpop.f32.mrb[47].mxu1  ;;  %v4721_v6 = vpop.f32.mrb[42].mxu0 }
 0x3e5   : > { %v4617_v8 = vadd.f32 %v4616_v31, %v4615_v0  ;;  %v4722_v58 = vpop.f32.mrb[43].mxu0  ;;  %v2530_v20 = vadd.f32 %v4614_v10, %v6960_v1 }
 0x3e6   : > { %v7028_v63 = vadd.f32 %v4720_v39, %v2522_v28  ;;  %v4723_v24 = vadd.f32 %v4722_v58, %v4721_v6  ;;  %5123 = vmatmul.mubr.bf16.gmra.mrb[152].mxu1 %v6792_v2 }
 0x3e7   : > { %5126 = vmatprep.mubr.bf16.mxu1 %v6806_v14  ;;  %v2533_v50 = vadd.f32 %v4617_v8, %v6960_v1 }
 0x3e8   : > { %v7032_v25 = vadd.f32 %v4723_v24, %v2525_v36 }
 0x3e9   : > { %v4618_v51 = vpop.f32.mrb[48].mxu1 }
 0x3ea   : > { %v4619_v62 = vpop.f32.mrb[49].mxu1  ;;  %v4724_v53 = vpop.f32.mrb[44].mxu0 }
 0x3eb   : > { %v4620_v17 = vadd.f32 %v4619_v62, %v4618_v51  ;;  %v4621_v21 = vpop.f32.mrb[50].mxu1  ;;  %v4725_v46 = vpop.f32.mrb[45].mxu0 }
 0x3ec   : > { %v4726_v23 = vadd.f32 %v4725_v46, %v4724_v53  ;;  %v4622_v56 = vpop.f32.mrb[51].mxu1  ;;  %v4727_v43 = vpop.f32.mrb[46].mxu0 }
 0x3ed   : > { %v4623_v32 = vadd.f32 %v4622_v56, %v4621_v21  ;;  %v4728_v33 = vpop.f32.mrb[47].mxu0  ;;  %v2538_v37 = vadd.f32 %v4620_v17, %v6960_v1 }
 0x3ee   : > { %v7036_v2 = vadd.f32 %v4726_v23, %v2530_v20  ;;  %v4729_v14 = vadd.f32 %v4728_v33, %v4727_v43  ;;  %5127 = vmatmul.mubr.bf16.gmra.mrb[156].mxu1 %v6820_v15 }
 0x3ef   : > { %5130 = vmatprep.mubr.bf16.mxu1 %v6834_v27  ;;  %v2541_v22 = vadd.f32 %v4623_v32, %v6960_v1 }
 0x3f0   : > { %v7040_v11 = vadd.f32 %v4729_v14, %v2533_v50 }
 0x3f1   : > { %v4624_v29 = vpop.f32.mrb[52].mxu1 }
 0x3f2   : > { %v4625_v40 = vpop.f32.mrb[53].mxu1  ;;  %v4730_v60 = vpop.f32.mrb[48].mxu0 }
 0x3f3   : > { %v4626_v59 = vadd.f32 %v4625_v40, %v4624_v29  ;;  %v4627_v54 = vpop.f32.mrb[54].mxu1  ;;  %v4731_v3 = vpop.f32.mrb[49].mxu0 }
 0x3f4   : > { %v4732_v47 = vadd.f32 %v4731_v3, %v4730_v60  ;;  %v4628_v41 = vpop.f32.mrb[55].mxu1  ;;  %v4733_v45 = vpop.f32.mrb[50].mxu0 }
 0x3f5   : > { %v4629_v48 = vadd.f32 %v4628_v41, %v4627_v54  ;;  %v4734_v38 = vpop.f32.mrb[51].mxu0  ;;  %v2546_v8 = vadd.f32 %v4626_v59, %v6960_v1 }
 0x3f6   : > { %v7044_v15 = vadd.f32 %v4732_v47, %v2538_v37  ;;  %v4735_v27 = vadd.f32 %v4734_v38, %v4733_v45  ;;  %5131 = vmatmul.mubr.bf16.gmra.mrb[160].mxu1 %v6848_v52 }
 0x3f7   : > { %5134 = vmatprep.mubr.bf16.mxu1 %v6862_v7  ;;  %v2549_v53 = vadd.f32 %v4629_v48, %v6960_v1 }
 0x3f8   : > { %v7048_v10 = vadd.f32 %v4735_v27, %v2541_v22 }
 0x3f9   : > { %v4630_v0 = vpop.f32.mrb[56].mxu1 }
 0x3fa   : > { %v4631_v18 = vpop.f32.mrb[57].mxu1  ;;  %v4736_v28 = vpop.f32.mrb[52].mxu0 }
 0x3fb   : > { %v4632_v39 = vadd.f32 %v4631_v18, %v4630_v0  ;;  %v4633_v31 = vpop.f32.mrb[58].mxu1  ;;  %v4737_v6 = vpop.f32.mrb[53].mxu0 }
 0x3fc   : > { %v4738_v58 = vadd.f32 %v4737_v6, %v4736_v28  ;;  %v4634_v36 = vpop.f32.mrb[59].mxu1  ;;  %v4739_v24 = vpop.f32.mrb[54].mxu0 }
 0x3fd   : > { %v4635_v51 = vadd.f32 %v4634_v36, %v4633_v31  ;;  %v4740_v62 = vpop.f32.mrb[55].mxu0  ;;  %v2554_v32 = vadd.f32 %v4632_v39, %v6960_v1 }
 0x3fe   : > { %v7052_v52 = vadd.f32 %v4738_v58, %v2546_v8  ;;  %v4741_v7 = vadd.f32 %v4740_v62, %v4739_v24  ;;  %5135 = vmatmul.mubr.bf16.gmra.mrb[164].mxu1 %v6875_v30 }
 0x3ff   : > { %5138 = vmatprep.mubr.bf16.mxu1 %v6895_v9  ;;  %v2557_v60 = vadd.f32 %v4635_v51, %v6960_v1 }
 0x400   : > { %v7056_v17 = vadd.f32 %v4741_v7, %v2549_v53 }
 0x401   : > { %v4636_v21 = vpop.f32.mrb[60].mxu1 }
 0x402   : > { %v4637_v46 = vpop.f32.mrb[61].mxu1  ;;  %v4742_v20 = vpop.f32.mrb[56].mxu0 }
 0x403   : > { %v4638_v23 = vadd.f32 %v4637_v46, %v4636_v21  ;;  %v4639_v56 = vpop.f32.mrb[62].mxu1  ;;  %v4743_v43 = vpop.f32.mrb[57].mxu0 }
 0x404   : > { %v4744_v33 = vadd.f32 %v4743_v43, %v4742_v20  ;;  %v4640_v50 = vpop.f32.mrb[63].mxu1  ;;  %v4745_v14 = vpop.f32.mrb[58].mxu0 }
 0x405   : > { %v4641_v29 = vadd.f32 %v4640_v50, %v4639_v56  ;;  %v4746_v40 = vpop.f32.mrb[59].mxu0  ;;  %v2562_v48 = vadd.f32 %v4638_v23, %v6960_v1 }
 0x406   : > { %v7060_v30 = vadd.f32 %v4744_v33, %v2554_v32  ;;  %v4747_v9 = vadd.f32 %v4746_v40, %v4745_v14  ;;  %5139 = vmatmul.mubr.bf16.gmra.mrb[168].mxu1 %v6907_v42 }
 0x407   : > { %5142 = vmatprep.mubr.bf16.mxu1 %v6992_v4  ;;  %v2565_v28 = vadd.f32 %v4641_v29, %v6960_v1 }
 0x408   : > { %v7064_v59 = vadd.f32 %v4747_v9, %v2557_v60 }
 0x409   : > { %v4642_v54 = vpop.f32.mrb[64].mxu1 }
 0x40a   : > { %v4643_v3 = vpop.f32.mrb[65].mxu1  ;;  %v4748_v37 = vpop.f32.mrb[60].mxu0 }
 0x40b   : > { %v4644_v47 = vadd.f32 %v4643_v3, %v4642_v54  ;;  %v4645_v41 = vpop.f32.mrb[66].mxu1  ;;  %v4749_v45 = vpop.f32.mrb[61].mxu0 }
 0x40c   : > { %v4750_v38 = vadd.f32 %v4749_v45, %v4748_v37  ;;  %v4646_v22 = vpop.f32.mrb[67].mxu1  ;;  %v4751_v27 = vpop.f32.mrb[62].mxu0 }
 0x40d   : > { %v4647_v0 = vadd.f32 %v4646_v22, %v4645_v41  ;;  %v4752_v18 = vpop.f32.mrb[63].mxu0  ;;  %v2570_v51 = vadd.f32 %v4644_v47, %v6960_v1 }
 0x40e   : > { %v7068_v42 = vadd.f32 %v4750_v38, %v2562_v48  ;;  %v4753_v4 = vadd.f32 %v4752_v18, %v4751_v27  ;;  %5143 = vmatmul.mubr.bf16.gmra.mrb[172].mxu1 %v6510_v13 }
 0x40f   : > { %v2573_v20 = vadd.f32 %v4647_v0, %v6960_v1 }
 0x410   : > { %v7071_v39 = vadd.f32 %v4753_v4, %v2565_v28 }
 0x411   : > { %v4648_v31 = vpop.f32.mrb[68].mxu1 }
 0x412   : > { %v4649_v6 = vpop.f32.mrb[69].mxu1  ;;  %v4754_v8 = vpop.f32.mrb[64].mxu0 }
 0x413   : > { %v4650_v58 = vadd.f32 %v4649_v6, %v4648_v31  ;;  %v4651_v36 = vpop.f32.mrb[70].mxu1  ;;  %v4755_v24 = vpop.f32.mrb[65].mxu0 }
 0x414   : > { %v4756_v62 = vadd.f32 %v4755_v24, %v4754_v8  ;;  %v4652_v53 = vpop.f32.mrb[71].mxu1  ;;  %v4757_v7 = vpop.f32.mrb[66].mxu0 }
 0x415   : > { %v4653_v21 = vadd.f32 %v4652_v53, %v4651_v36  ;;  %v4758_v46 = vpop.f32.mrb[67].mxu0  ;;  %v2578_v40 = vadd.f32 %v4650_v58, %v6960_v1 }
 0x416   : > { %v7075_v23 = vadd.f32 %v4756_v62, %v2570_v51  ;;  %v4759_v13 = vadd.f32 %v4758_v46, %v4757_v7 }
 0x417   : > { %v2581_v47 = vadd.f32 %v4653_v21, %v6960_v1 }
 0x418   : > { %v7077_v56 = vadd.f32 %v4759_v13, %v2573_v20 }
 0x419   : > { %v4654_v43 = vpop.f32.mrb[72].mxu1 }
 0x41a   : > { %v4655_v32 = vpop.f32.mrb[73].mxu1  ;;  %v4760_v33 = vpop.f32.mrb[68].mxu0 }
 0x41b   : > { %v4656_v50 = vadd.f32 %v4655_v32, %v4654_v43  ;;  %v4657_v14 = vpop.f32.mrb[74].mxu1  ;;  %v4761_v29 = vpop.f32.mrb[69].mxu0 }
 0x41c   : > { %v4762_v60 = vadd.f32 %v4761_v29, %v4760_v33  ;;  %v4658_v9 = vpop.f32.mrb[75].mxu1  ;;  %v4763_v54 = vpop.f32.mrb[70].mxu0 }
 0x41d   : > { %v4659_v3 = vadd.f32 %v4658_v9, %v4657_v14  ;;  %v4764_v37 = vpop.f32.mrb[71].mxu0  ;;  %v2586_v4 = vadd.f32 %v4656_v50, %v6960_v1 }
 0x41e   : > { %v7081_v41 = vadd.f32 %v4762_v60, %v2578_v40  ;;  %v4765_v45 = vadd.f32 %v4764_v37, %v4763_v54 }
 0x41f   : > { %v2589_v24 = vadd.f32 %v4659_v3, %v6960_v1 }
 0x420   : > { %v7083_v48 = vadd.f32 %v4765_v45, %v2581_v47 }
 0x421   : > { %v4660_v38 = vpop.f32.mrb[76].mxu1 }
 0x422   : > { %v4661_v22 = vpop.f32.mrb[77].mxu1 }
 0x423   : > { %v4662_v0 = vadd.f32 %v4661_v22, %v4660_v38  ;;  %v4663_v18 = vpop.f32.mrb[78].mxu1 }
 0x424   : > { %v4664_v6 = vpop.f32.mrb[79].mxu1 }
 0x425   : > { %v4665_v58 = vadd.f32 %v4664_v6, %v4663_v18  ;;  %v2594_v32 = vadd.f32 %v4662_v0, %v6960_v1 }
 0x427   : > { %v4766_v27 = vpop.f32.mrb[72].mxu0  ;;  %v2597_v9 = vadd.f32 %v4665_v58, %v6960_v1 }
 0x428   : > { %v4767_v28 = vpop.f32.mrb[73].mxu0 }
 0x429   : > { %v4768_v31 = vadd.f32 %v4767_v28, %v4766_v27  ;;  %v4769_v8 = vpop.f32.mrb[74].mxu0  ;;  %v4794_v7 = vpop.f32.mrb[80].mxu1 }
 0x42a   : > { %v4770_v36 = vpop.f32.mrb[75].mxu0  ;;  %v4795_v46 = vpop.f32.mrb[81].mxu1 }
 0x42b   : > { %v7087_v51 = vadd.f32 %v4768_v31, %v2586_v4  ;;  %v4771_v62 = vadd.f32 %v4770_v36, %v4769_v8  ;;  %v4796_v20 = vadd.f32 %v4795_v46, %v4794_v7  ;;  %v4797_v43 = vpop.f32.mrb[82].mxu1 }
 0x42c   : > { %v4798_v14 = vpop.f32.mrb[83].mxu1 }
 0x42d   : > { %v7089_v53 = vadd.f32 %v4771_v62, %v2589_v24  ;;  %v2796_v29 = vadd.f32 %v4796_v20, %v6966_v44  ;;  %v4799_v40 = vadd.f32 %v4798_v14, %v4797_v43 }
 0x42f   : > { %v4772_v21 = vpop.f32.mrb[76].mxu0  ;;  %v2799_v37 = vadd.f32 %v4799_v40, %v6971_v49 }
 0x430   : > { %v4773_v13 = vpop.f32.mrb[77].mxu0 }
 0x431   : > { %v4774_v33 = vadd.f32 %v4773_v13, %v4772_v21  ;;  %v4775_v50 = vpop.f32.mrb[78].mxu0  ;;  %v4800_v45 = vpop.f32.mrb[84].mxu1 }
 0x432   : > { %v4776_v60 = vpop.f32.mrb[79].mxu0  ;;  %v4801_v38 = vpop.f32.mrb[85].mxu1 }
 0x433   : > { %v7094_v54 = vadd.f32 %v4774_v33, %v2594_v32  ;;  %v4777_v3 = vadd.f32 %v4776_v60, %v4775_v50  ;;  %v4802_v27 = vadd.f32 %v4801_v38, %v4800_v45  ;;  %v4803_v0 = vpop.f32.mrb[86].mxu1 }
 0x434   : > { %v4804_v4 = vpop.f32.mrb[87].mxu1 }
 0x435   : > { %v7097_v47 = vadd.f32 %v4777_v3, %v2597_v9  ;;  %v2804_v31 = vadd.f32 %v4802_v27, %v6976_v26  ;;  %v4805_v6 = vadd.f32 %v4804_v4, %v4803_v0 }
 0x437   : > { %v4906_v22 = vpop.f32.mrb[80].mxu0  ;;  %v2807_v49 = vadd.f32 %v4805_v6, %v6981_v35 }
 0x438   : > { %v4907_v18 = vpop.f32.mrb[81].mxu0 }
 0x439   : > { %v4908_v28 = vadd.f32 %v4907_v18, %v4906_v22  ;;  %v4909_v44 = vpop.f32.mrb[82].mxu0  ;;  %v4806_v24 = vpop.f32.mrb[88].mxu1 }
 0x43a   : > { %v4910_v1 = vpop.f32.mrb[83].mxu0  ;;  %v4807_v62 = vpop.f32.mrb[89].mxu1 }
 0x43b   : > { %v4911_v8 = vadd.f32 %v4910_v1, %v4909_v44  ;;  %v7100_v58 = vadd.f32 %v4908_v28, %v2796_v29  ;;  %v4808_v21 = vadd.f32 %v4807_v62, %v4806_v24  ;;  %v4809_v46 = vpop.f32.mrb[90].mxu1 }
 0x43c   : > { %v4810_v43 = vpop.f32.mrb[91].mxu1 }
 0x43d   : > { %v7103_v36 = vadd.f32 %v4911_v8, %v2799_v37  ;;  %v2812_v26 = vadd.f32 %v4808_v21, %v6986_v57  ;;  %v4811_v33 = vadd.f32 %v4810_v43, %v4809_v46 }
 0x43f   : > { %v4912_v7 = vpop.f32.mrb[84].mxu0  ;;  %v2815_v35 = vadd.f32 %v4811_v33, %v6996_v16 }
 0x440   : > { %v4913_v20 = vpop.f32.mrb[85].mxu0 }
 0x441   : > { %v4914_v13 = vadd.f32 %v4913_v20, %v4912_v7  ;;  %v4915_v32 = vpop.f32.mrb[86].mxu0  ;;  %v4812_v60 = vpop.f32.mrb[92].mxu1 }
 0x442   : > { %v4916_v50 = vpop.f32.mrb[87].mxu0  ;;  %v4813_v9 = vpop.f32.mrb[93].mxu1 }
 0x443   : > { %v4917_v14 = vadd.f32 %v4916_v50, %v4915_v32  ;;  %v7106_v29 = vadd.f32 %v4914_v13, %v2804_v31  ;;  %v4814_v37 = vadd.f32 %v4813_v9, %v4812_v60  ;;  %v4815_v45 = vpop.f32.mrb[94].mxu1 }
 0x444   : > { %v4816_v27 = vpop.f32.mrb[95].mxu1 }
 0x445   : > { %v7109_v40 = vadd.f32 %v4917_v14, %v2807_v49  ;;  %v2820_v57 = vadd.f32 %v4814_v37, %v7001_v19  ;;  %v4817_v18 = vadd.f32 %v4816_v27, %v4815_v45 }
 0x447   : > { %v4918_v3 = vpop.f32.mrb[88].mxu0  ;;  %v2823_v16 = vadd.f32 %v4817_v18, %v7006_v61 }
 0x448   : > { %v4919_v38 = vpop.f32.mrb[89].mxu0 }
 0x449   : > { %v4920_v22 = vadd.f32 %v4919_v38, %v4918_v3  ;;  %v4921_v0 = vpop.f32.mrb[90].mxu0  ;;  %v4818_v6 = vpop.f32.mrb[96].mxu1 }
 0x44a   : > { %v4922_v28 = vpop.f32.mrb[91].mxu0  ;;  %v4819_v1 = vpop.f32.mrb[97].mxu1 }
 0x44b   : > { %v4923_v4 = vadd.f32 %v4922_v28, %v4921_v0  ;;  %v7112_v44 = vadd.f32 %v4920_v22, %v2812_v26  ;;  %v4820_v49 = vadd.f32 %v4819_v1, %v4818_v6  ;;  %v4821_v24 = vpop.f32.mrb[98].mxu1 }
 0x44c   : > { %v4822_v21 = vpop.f32.mrb[99].mxu1 }
 0x44d   : > { %v7115_v31 = vadd.f32 %v4923_v4, %v2815_v35  ;;  %v2828_v19 = vadd.f32 %v4820_v49, %v7011_v34  ;;  %v4823_v20 = vadd.f32 %v4822_v21, %v4821_v24 }
 0x44f   : > { %v4924_v8 = vpop.f32.mrb[92].mxu0  ;;  %v2831_v61 = vadd.f32 %v4823_v20, %v7016_v55 }
 0x450   : > { %v4925_v62 = vpop.f32.mrb[93].mxu0 }
 0x451   : > { %v4926_v7 = vadd.f32 %v4925_v62, %v4924_v8  ;;  %v4927_v46 = vpop.f32.mrb[94].mxu0  ;;  %v4824_v33 = vpop.f32.mrb[100].mxu1 }
 0x452   : > { %v4928_v13 = vpop.f32.mrb[95].mxu0  ;;  %v4825_v50 = vpop.f32.mrb[101].mxu1 }
 0x453   : > { %v4929_v43 = vadd.f32 %v4928_v13, %v4927_v46  ;;  %v7118_v32 = vadd.f32 %v4926_v7, %v2820_v57  ;;  %v4826_v35 = vadd.f32 %v4825_v50, %v4824_v33  ;;  %v4827_v60 = vpop.f32.mrb[102].mxu1 }
 0x454   : > { %v4828_v37 = vpop.f32.mrb[103].mxu1 }
 0x455   : > { %v7121_v26 = vadd.f32 %v4929_v43, %v2823_v16  ;;  %v2836_v34 = vadd.f32 %v4826_v35, %v7020_v12  ;;  %v4829_v38 = vadd.f32 %v4828_v37, %v4827_v60 }
 0x457   : > { %v4930_v14 = vpop.f32.mrb[96].mxu0  ;;  %v2839_v55 = vadd.f32 %v4829_v38, %v7024_v5 }
 0x458   : > { %v4931_v9 = vpop.f32.mrb[97].mxu0 }
 0x459   : > { %v4932_v3 = vadd.f32 %v4931_v9, %v4930_v14  ;;  %v4933_v45 = vpop.f32.mrb[98].mxu0  ;;  %v4830_v18 = vpop.f32.mrb[104].mxu1 }
 0x45a   : > { %v4934_v22 = vpop.f32.mrb[99].mxu0  ;;  %v4831_v28 = vpop.f32.mrb[105].mxu1 }
 0x45b   : > { %v4935_v27 = vadd.f32 %v4934_v22, %v4933_v45  ;;  %v7124_v0 = vadd.f32 %v4932_v3, %v2828_v19  ;;  %v4832_v16 = vadd.f32 %v4831_v28, %v4830_v18  ;;  %v4833_v6 = vpop.f32.mrb[106].mxu1 }
 0x45c   : > { %v4834_v49 = vpop.f32.mrb[107].mxu1 }
 0x45d   : > { %v7127_v57 = vadd.f32 %v4935_v27, %v2831_v61  ;;  %v2844_v12 = vadd.f32 %v4832_v16, %v7028_v63  ;;  %v4835_v62 = vadd.f32 %v4834_v49, %v4833_v6 }
 0x45f   : > { %v4936_v4 = vpop.f32.mrb[100].mxu0  ;;  %v2847_v5 = vadd.f32 %v4835_v62, %v7032_v25 }
 0x460   : > { %v4937_v1 = vpop.f32.mrb[101].mxu0 }
 0x461   : > { %v4938_v8 = vadd.f32 %v4937_v1, %v4936_v4  ;;  %v4939_v24 = vpop.f32.mrb[102].mxu0  ;;  %v4836_v20 = vpop.f32.mrb[108].mxu1 }
 0x462   : > { %v4940_v7 = vpop.f32.mrb[103].mxu0  ;;  %v4837_v13 = vpop.f32.mrb[109].mxu1 }
 0x463   : > { %v4941_v21 = vadd.f32 %v4940_v7, %v4939_v24  ;;  %v7130_v46 = vadd.f32 %v4938_v8, %v2836_v34  ;;  %v4838_v61 = vadd.f32 %v4837_v13, %v4836_v20  ;;  %v4839_v33 = vpop.f32.mrb[110].mxu1 }
 0x464   : > { %v4840_v35 = vpop.f32.mrb[111].mxu1 }
 0x465   : > { %v7133_v19 = vadd.f32 %v4941_v21, %v2839_v55  ;;  %v2852_v63 = vadd.f32 %v4838_v61, %v7036_v2  ;;  %v4841_v9 = vadd.f32 %v4840_v35, %v4839_v33 }
 0x467   : > { %v4942_v43 = vpop.f32.mrb[104].mxu0  ;;  %v2855_v25 = vadd.f32 %v4841_v9, %v7040_v11 }
 0x468   : > { %v4943_v50 = vpop.f32.mrb[105].mxu0 }
 0x469   : > { %v4944_v14 = vadd.f32 %v4943_v50, %v4942_v43  ;;  %v4945_v60 = vpop.f32.mrb[106].mxu0  ;;  %v4842_v38 = vpop.f32.mrb[112].mxu1 }
 0x46a   : > { %v4946_v3 = vpop.f32.mrb[107].mxu0  ;;  %v4843_v22 = vpop.f32.mrb[113].mxu1 }
 0x46b   : > { %v4947_v37 = vadd.f32 %v4946_v3, %v4945_v60  ;;  %v7136_v45 = vadd.f32 %v4944_v14, %v2844_v12  ;;  %v4844_v55 = vadd.f32 %v4843_v22, %v4842_v38  ;;  %v4845_v18 = vpop.f32.mrb[114].mxu1 }
 0x46c   : > { %v4846_v16 = vpop.f32.mrb[115].mxu1 }
 0x46d   : > { %v7139_v34 = vadd.f32 %v4947_v37, %v2847_v5  ;;  %v2860_v2 = vadd.f32 %v4844_v55, %v7044_v15  ;;  %v4847_v1 = vadd.f32 %v4846_v16, %v4845_v18 }
 0x46f   : > { %v4948_v27 = vpop.f32.mrb[108].mxu0  ;;  %v2863_v11 = vadd.f32 %v4847_v1, %v7048_v10 }
 0x470   : > { %v4949_v28 = vpop.f32.mrb[109].mxu0 }
 0x471   : > { %v4950_v4 = vadd.f32 %v4949_v28, %v4948_v27  ;;  %v4951_v6 = vpop.f32.mrb[110].mxu0  ;;  %v4848_v62 = vpop.f32.mrb[116].mxu1 }
 0x472   : > { %v4952_v8 = vpop.f32.mrb[111].mxu0  ;;  %v4849_v7 = vpop.f32.mrb[117].mxu1 }
 0x473   : > { %v4953_v49 = vadd.f32 %v4952_v8, %v4951_v6  ;;  %v7142_v24 = vadd.f32 %v4950_v4, %v2852_v63  ;;  %v4850_v5 = vadd.f32 %v4849_v7, %v4848_v62  ;;  %v4851_v20 = vpop.f32.mrb[118].mxu1 }
 0x474   : > { %v4852_v61 = vpop.f32.mrb[119].mxu1 }
 0x475   : > { %v7145_v12 = vadd.f32 %v4953_v49, %v2855_v25  ;;  %v2868_v15 = vadd.f32 %v4850_v5, %v7052_v52  ;;  %v4853_v50 = vadd.f32 %v4852_v61, %v4851_v20 }
 0x477   : > { %v4954_v21 = vpop.f32.mrb[112].mxu0  ;;  %v2871_v10 = vadd.f32 %v4853_v50, %v7056_v17 }
 0x478   : > { %v4955_v13 = vpop.f32.mrb[113].mxu0 }
 0x479   : > { %v4956_v43 = vadd.f32 %v4955_v13, %v4954_v21  ;;  %v4957_v33 = vpop.f32.mrb[114].mxu0  ;;  %v4854_v9 = vpop.f32.mrb[120].mxu1 }
 0x47a   : > { %v4958_v14 = vpop.f32.mrb[115].mxu0  ;;  %v4855_v3 = vpop.f32.mrb[121].mxu1 }
 0x47b   : > { %v4959_v35 = vadd.f32 %v4958_v14, %v4957_v33  ;;  %v7148_v60 = vadd.f32 %v4956_v43, %v2860_v2  ;;  %v4856_v25 = vadd.f32 %v4855_v3, %v4854_v9  ;;  %v4857_v38 = vpop.f32.mrb[122].mxu1 }
 0x47c   : > { %v4858_v55 = vpop.f32.mrb[123].mxu1 }
 0x47d   : > { %v7151_v63 = vadd.f32 %v4959_v35, %v2863_v11  ;;  %v2876_v52 = vadd.f32 %v4856_v25, %v7060_v30  ;;  %v4859_v28 = vadd.f32 %v4858_v55, %v4857_v38 }
 0x47f   : > { %v4960_v37 = vpop.f32.mrb[116].mxu0  ;;  %v2879_v17 = vadd.f32 %v4859_v28, %v7064_v59 }
 0x480   : > { %v4961_v22 = vpop.f32.mrb[117].mxu0 }
 0x481   : > { %v4962_v27 = vadd.f32 %v4961_v22, %v4960_v37  ;;  %v4963_v18 = vpop.f32.mrb[118].mxu0  ;;  %v4860_v1 = vpop.f32.mrb[124].mxu1 }
 0x482   : > { %v4964_v4 = vpop.f32.mrb[119].mxu0  ;;  %v4861_v8 = vpop.f32.mrb[125].mxu1 }
 0x483   : > { %v4965_v16 = vadd.f32 %v4964_v4, %v4963_v18  ;;  %v7154_v6 = vadd.f32 %v4962_v27, %v2868_v15  ;;  %v4862_v11 = vadd.f32 %v4861_v8, %v4860_v1  ;;  %v4863_v62 = vpop.f32.mrb[126].mxu1 }
 0x484   : > { %v4864_v5 = vpop.f32.mrb[127].mxu1 }
 0x485   : > { %v7157_v2 = vadd.f32 %v4965_v16, %v2871_v10  ;;  %v2884_v30 = vadd.f32 %v4862_v11, %v7068_v42  ;;  %v4865_v13 = vadd.f32 %v4864_v5, %v4863_v62 }
 0x487   : > { %v4966_v49 = vpop.f32.mrb[120].mxu0  ;;  %v2887_v59 = vadd.f32 %v4865_v13, %v7071_v39 }
 0x488   : > { %v4967_v7 = vpop.f32.mrb[121].mxu0 }
 0x489   : > { %v4968_v21 = vadd.f32 %v4967_v7, %v4966_v49  ;;  %v4969_v20 = vpop.f32.mrb[122].mxu0  ;;  %v4866_v50 = vpop.f32.mrb[128].mxu1 }
 0x48a   : > { %v4970_v43 = vpop.f32.mrb[123].mxu0  ;;  %v4867_v14 = vpop.f32.mrb[129].mxu1 }
 0x48b   : > { %v4971_v61 = vadd.f32 %v4970_v43, %v4969_v20  ;;  %v7160_v33 = vadd.f32 %v4968_v21, %v2876_v52  ;;  %v4868_v10 = vadd.f32 %v4867_v14, %v4866_v50  ;;  %v4869_v9 = vpop.f32.mrb[130].mxu1 }
 0x48c   : > { %v4870_v25 = vpop.f32.mrb[131].mxu1 }
 0x48d   : > { %v7163_v15 = vadd.f32 %v4971_v61, %v2879_v17  ;;  %v2892_v42 = vadd.f32 %v4868_v10, %v7075_v23  ;;  %v4871_v22 = vadd.f32 %v4870_v25, %v4869_v9 }
 0x48f   : > { %v4972_v35 = vpop.f32.mrb[124].mxu0  ;;  %v2895_v39 = vadd.f32 %v4871_v22, %v7077_v56 }
 0x490   : > { %v4973_v3 = vpop.f32.mrb[125].mxu0 }
 0x491   : > { %v4974_v37 = vadd.f32 %v4973_v3, %v4972_v35  ;;  %v4975_v38 = vpop.f32.mrb[126].mxu0  ;;  %v4872_v28 = vpop.f32.mrb[132].mxu1 }
 0x492   : > { %v4976_v27 = vpop.f32.mrb[127].mxu0  ;;  %v4873_v4 = vpop.f32.mrb[133].mxu1 }
 0x493   : > { %v4977_v55 = vadd.f32 %v4976_v27, %v4975_v38  ;;  %v7166_v18 = vadd.f32 %v4974_v37, %v2884_v30  ;;  %v4874_v17 = vadd.f32 %v4873_v4, %v4872_v28  ;;  %v4875_v1 = vpop.f32.mrb[134].mxu1 }
 0x494   : > { %v4876_v11 = vpop.f32.mrb[135].mxu1 }
 0x495   : > { %v7169_v52 = vadd.f32 %v4977_v55, %v2887_v59  ;;  %v2900_v23 = vadd.f32 %v4874_v17, %v7081_v41  ;;  %v4877_v7 = vadd.f32 %v4876_v11, %v4875_v1 }
 0x497   : > { %v4978_v16 = vpop.f32.mrb[128].mxu0  ;;  %v2903_v56 = vadd.f32 %v4877_v7, %v7083_v48 }
 0x498   : > { %v4979_v8 = vpop.f32.mrb[129].mxu0 }
 0x499   : > { %v4980_v49 = vadd.f32 %v4979_v8, %v4978_v16  ;;  %v4981_v62 = vpop.f32.mrb[130].mxu0  ;;  %v4878_v13 = vpop.f32.mrb[136].mxu1 }
 0x49a   : > { %v4982_v21 = vpop.f32.mrb[131].mxu0  ;;  %v4879_v43 = vpop.f32.mrb[137].mxu1 }
 0x49b   : > { %v4983_v5 = vadd.f32 %v4982_v21, %v4981_v62  ;;  %v7172_v20 = vadd.f32 %v4980_v49, %v2892_v42  ;;  %v4880_v59 = vadd.f32 %v4879_v43, %v4878_v13  ;;  %v4881_v50 = vpop.f32.mrb[138].mxu1 }
 0x49c   : > { %v4882_v10 = vpop.f32.mrb[139].mxu1 }
 0x49d   : > { %v7175_v30 = vadd.f32 %v4983_v5, %v2895_v39  ;;  %v2908_v41 = vadd.f32 %v4880_v59, %v7087_v51  ;;  %v4883_v3 = vadd.f32 %v4882_v10, %v4881_v50 }
 0x49f   : > { %v4984_v61 = vpop.f32.mrb[132].mxu0  ;;  %v2911_v48 = vadd.f32 %v4883_v3, %v7089_v53 }
 0x4a0   : > { %v4985_v14 = vpop.f32.mrb[133].mxu0 }
 0x4a1   : > { %v4986_v35 = vadd.f32 %v4985_v14, %v4984_v61  ;;  %v4987_v9 = vpop.f32.mrb[134].mxu0  ;;  %v4884_v22 = vpop.f32.mrb[140].mxu1 }
 0x4a2   : > { %v4988_v37 = vpop.f32.mrb[135].mxu0  ;;  %v4885_v27 = vpop.f32.mrb[141].mxu1 }
 0x4a3   : > { %v4989_v25 = vadd.f32 %v4988_v37, %v4987_v9  ;;  %v7178_v38 = vadd.f32 %v4986_v35, %v2900_v23  ;;  %v4886_v39 = vadd.f32 %v4885_v27, %v4884_v22  ;;  %v4887_v28 = vpop.f32.mrb[142].mxu1 }
 0x4a4   : > { %v4888_v17 = vpop.f32.mrb[143].mxu1 }
 0x4a5   : > { %v7181_v42 = vadd.f32 %v4989_v25, %v2903_v56  ;;  %v2916_v51 = vadd.f32 %v4886_v39, %v7094_v54  ;;  %v4889_v8 = vadd.f32 %v4888_v17, %v4887_v28 }
 0x4a7   : > { %v4990_v55 = vpop.f32.mrb[136].mxu0  ;;  %v2919_v53 = vadd.f32 %v4889_v8, %v7097_v47 }
 0x4a8   : > { %v4991_v4 = vpop.f32.mrb[137].mxu0 }
 0x4a9   : > { %v4992_v16 = vadd.f32 %v4991_v4, %v4990_v55  ;;  %v4993_v1 = vpop.f32.mrb[138].mxu0  ;;  %v5116_v7 = vpop.f32.mrb[144].mxu1 }
 0x4aa   : > { %v4994_v49 = vpop.f32.mrb[139].mxu0  ;;  %v7190_v21 = vadd.f32 %v5116_v7, %v7106_v29  ;;  %v3117_v56 = vpop.f32.mrb[145].mxu1 }
 0x4ab   : > { %v4995_v11 = vadd.f32 %v4994_v49, %v4993_v1  ;;  %v7184_v62 = vadd.f32 %v4992_v16, %v2908_v41  ;;  %v7193_v13 = vadd.f32 %v3117_v56, %v7100_v58  ;;  %v5117_v54 = vpop.f32.mrb[146].mxu1 }
 0x4ac   : > { %v7196_v59 = vadd.f32 %v5117_v54, %v7109_v40  ;;  %v3120_v14 = vpop.f32.mrb[147].mxu1  ;;  %3248 = vadd.xlane.f32.xlu0 %v7190_v21 }
 0x4ad   : > { %v7187_v23 = vadd.f32 %v4995_v11, %v2911_v48  ;;  %v7200_v47 = vadd.f32 %v3120_v14, %v7103_v36  ;;  %v3347_v36 = vmul.f32 %v7190_v21, %v7190_v21  ;;  %v3345_v22 = vmul.f32 %v7193_v13, %v7193_v13 }
 0x4ae   : > { %3250 = vadd.xlane.f32.xlu1 %v7196_v59  ;;  %v3348_v27 = vmul.f32 %v7196_v59, %v7196_v59 }
 0x4af   : > { %v4996_v5 = vpop.f32.mrb[140].mxu0 }
 0x4b0   : > { %v4997_v43 = vpop.f32.mrb[141].mxu0  ;;  %3244 = vadd.xlane.f32.xlu0 %v7193_v13 }
 0x4b1   : > { %v4998_v61 = vadd.f32 %v4997_v43, %v4996_v5  ;;  %v4999_v50 = vpop.f32.mrb[142].mxu0  ;;  %v5120_v9 = vpop.f32.mrb[148].mxu1 }
 0x4b2   : > { %v5000_v29 = vpop.f32.mrb[143].mxu0  ;;  %v7209_v40 = vadd.f32 %v5120_v9, %v7118_v32  ;;  %v3133_v41 = vpop.f32.mrb[149].mxu1  ;;  %3246 = vadd.xlane.f32.xlu1 %v7200_v47 }
 0x4b3   : > { %v5001_v35 = vadd.f32 %v5000_v29, %v4999_v50  ;;  %v7203_v10 = vadd.f32 %v4998_v61, %v2916_v51  ;;  %v7215_v3 = vadd.f32 %v3133_v41, %v7112_v44  ;;  %v5121_v37 = vpop.f32.mrb[150].mxu1 }
 0x4b4   : > { %v7218_v25 = vadd.f32 %v5121_v37, %v7121_v26  ;;  %v3136_v48 = vpop.f32.mrb[151].mxu1  ;;  %3381 = vadd.xlane.f32.xlu0 %v3347_v36  ;;  %v3346_v26 = vmul.f32 %v7200_v47, %v7200_v47 }
 0x4b5   : > { %v7206_v58 = vadd.f32 %v5001_v35, %v2919_v53  ;;  %v7223_v32 = vadd.f32 %v3136_v48, %v7115_v31 }
 0x4b6   : > { %3377 = vadd.xlane.f32.xlu1 %v3345_v22 }
 0x4b8   : > { %3383 = vadd.xlane.f32.xlu0 %v3348_v27 }
 0x4b9   : > { %v5124_v55 = vpop.f32.mrb[152].mxu1 }
 0x4ba   : > { %v7228_v44 = vadd.f32 %v5124_v55, %v7130_v46  ;;  %v3149_v39 = vpop.f32.mrb[153].mxu1  ;;  %3256 = vadd.xlane.f32.xlu1 %v7209_v40  ;;  %v3351_v46 = vmul.f32 %v7209_v40, %v7209_v40 }
 0x4bb   : > { %v7234_v28 = vadd.f32 %v3149_v39, %v7124_v0  ;;  %v5125_v31 = vpop.f32.mrb[154].mxu1 }
 0x4bc   : > { %v7237_v4 = vadd.f32 %v5125_v31, %v7133_v19  ;;  %v3152_v16 = vpop.f32.mrb[155].mxu1  ;;  %3379 = vadd.xlane.f32.xlu0 %v3346_v26  ;;  %v3349_v19 = vmul.f32 %v7215_v3, %v7215_v3 }
 0x4bd   : > { %v7240_v17 = vadd.f32 %v3152_v16, %v7127_v57 }
 0x4be   : > { %3252 = vadd.xlane.f32.xlu1 %v7215_v3 }
 0x4c0   : > { %3389 = vadd.xlane.f32.xlu0 %v3351_v46 }
 0x4c1   : > { %v5128_v1 = vpop.f32.mrb[156].mxu1 }
 0x4c2   : > { %v7246_v51 = vadd.f32 %v5128_v1, %v7142_v24  ;;  %v3165_v0 = vpop.f32.mrb[157].mxu1  ;;  %3258 = vadd.xlane.f32.xlu1 %v7218_v25  ;;  %v3352_v24 = vmul.f32 %v7218_v25, %v7218_v25 }
 0x4c3   : > { %v7252_v8 = vadd.f32 %v3165_v0, %v7136_v45  ;;  %v5129_v57 = vpop.f32.mrb[158].mxu1  ;;  %v5388_v0 = vld [vmem:[#allocation9] sm:$0xff]  }
 0x4c4   : > { %v7255_v49 = vadd.f32 %v5129_v57, %v7145_v12  ;;  %v3168_v11 = vpop.f32.mrb[159].mxu1  ;;  %3385 = vadd.xlane.f32.xlu0 %v3349_v19  ;;  %v3350_v12 = vmul.f32 %v7223_v32, %v7223_v32  ;;  %5146 = vmatprep.subr.bf16.mxu0 %v5388_v0 }
 0x4c5   : > { %v7258_v53 = vadd.f32 %v3168_v11, %v7139_v34  ;;  %5147 = vmatpush3.bf16.msra.mxu0 %v5388_v0 }
 0x4c6   : > { %3254 = vadd.xlane.f32.xlu1 %v7223_v32 }
 0x4c8   : > { %3391 = vadd.xlane.f32.xlu0 %v3352_v24  ;;  %v5389_v24 = vld [vmem:[#allocation9 + $0x8] sm:$0xff]  }
 0x4c9   : > { %v5132_v7 = vpop.f32.mrb[160].mxu1  ;;  %5148 = vmatprep.subr.bf16.mxu0 %v5389_v24 }
 0x4ca   : > { %v7264_v5 = vadd.f32 %v5132_v7, %v7154_v6  ;;  %v3181_v45 = vpop.f32.mrb[161].mxu1  ;;  %3264 = vadd.xlane.f32.xlu1 %v7228_v44  ;;  %v3355_v6 = vmul.f32 %v7228_v44, %v7228_v44  ;;  %5149 = vmatpush3.bf16.msra.mxu0 %v5389_v24 }
 0x4cb   : > { %v7270_v56 = vadd.f32 %v3181_v45, %v7148_v60  ;;  %v5133_v34 = vpop.f32.mrb[162].mxu1 }
 0x4cc   : > { %v7273_v43 = vadd.f32 %v5133_v34, %v7157_v2  ;;  %v3184_v54 = vpop.f32.mrb[163].mxu1  ;;  %3387 = vadd.xlane.f32.xlu0 %v3350_v12  ;;  %v3353_v2 = vmul.f32 %v7234_v28, %v7234_v28 }
 0x4cd   : > { %v7276_v61 = vadd.f32 %v3184_v54, %v7151_v63  ;;  %v5390_v54 = vld [vmem:[#allocation9 + $0x10] sm:$0xff]  }
 0x4ce   : > { %3260 = vadd.xlane.f32.xlu1 %v7234_v28  ;;  %v3364_v19 = vmul.f32 %v7273_v43, %v7273_v43  ;;  %5150 = vmatprep.subr.bf16.mxu0 %v5390_v54 }
 0x4cf   : > { %v3362_v57 = vmul.f32 %v7276_v61, %v7276_v61  ;;  %5151 = vmatpush3.bf16.msra.mxu0 %v5390_v54 }
 0x4d0   : > { %3397 = vadd.xlane.f32.xlu0 %v3355_v6 }
 0x4d1   : > { %v5136_v50 = vpop.f32.mrb[164].mxu1 }
 0x4d2   : > { %v7282_v14 = vadd.f32 %v5136_v50, %v7166_v18  ;;  %v3197_v60 = vpop.f32.mrb[165].mxu1  ;;  %3266 = vadd.xlane.f32.xlu1 %v7237_v4  ;;  %v3356_v18 = vmul.f32 %v7237_v4, %v7237_v4 }
 0x4d3   : > { %v7288_v29 = vadd.f32 %v3197_v60, %v7160_v33  ;;  %v5137_v63 = vpop.f32.mrb[166].mxu1 }
 0x4d4   : > { %v7291_v35 = vadd.f32 %v5137_v63, %v7169_v52  ;;  %v3200_v9 = vpop.f32.mrb[167].mxu1  ;;  %3393 = vadd.xlane.f32.xlu0 %v3353_v2  ;;  %v3354_v52 = vmul.f32 %v7240_v17, %v7240_v17  ;;  %v3367_v11 = vmul.f32 %v7282_v14, %v7282_v14  ;;  %v5391_v63 = vld [vmem:[#allocation9 + $0x18] sm:$0xff]  }
 0x4d5   : > { %v7294_v41 = vadd.f32 %v3200_v9, %v7163_v15  ;;  %v3365_v7 = vmul.f32 %v7288_v29, %v7288_v29  ;;  %5152 = vmatprep.subr.bf16.mxu0 %v5391_v63 }
 0x4d6   : > { %3262 = vadd.xlane.f32.xlu1 %v7240_v17  ;;  %v3368_v45 = vmul.f32 %v7291_v35, %v7291_v35  ;;  %5153 = vmatpush3.bf16.msra.mxu0 %v5391_v63 }
 0x4d7   : > { %v3366_v12 = vmul.f32 %v7294_v41, %v7294_v41 }
 0x4d8   : > { %3399 = vadd.xlane.f32.xlu0 %v3356_v18 }
 0x4d9   : > { %v5140_v36 = vpop.f32.mrb[168].mxu1 }
 0x4da   : > { %v7300_v37 = vadd.f32 %v5140_v36, %v7178_v38  ;;  %v3213_v33 = vpop.f32.mrb[169].mxu1  ;;  %3272 = vadd.xlane.f32.xlu1 %v7246_v51  ;;  %v3359_v38 = vmul.f32 %v7246_v51, %v7246_v51 }
 0x4db   : > { %v7306_v48 = vadd.f32 %v3213_v33, %v7172_v20  ;;  %v5141_v15 = vpop.f32.mrb[170].mxu1  ;;  %v5392_v33 = vld [vmem:[#allocation9 + $0x20] sm:$0xff]  }
 0x4dc   : > { %7934 = vst [vmem:[#allocation18_spill] sm:$0xff] %v7300_v37  ;;  %v7309_v22 = vadd.f32 %v5141_v15, %v7181_v42  ;;  %v3216_v27 = vpop.f32.mrb[171].mxu1  ;;  %3395 = vadd.xlane.f32.xlu0 %v3354_v52  ;;  %v3357_v42 = vmul.f32 %v7252_v8, %v7252_v8  ;;  %v3371_v34 = vmul.f32 %v7300_v37, %v7300_v37 }
 0x4dd   : > { %v7312_v55 = vadd.f32 %v3216_v27, %v7175_v30  ;;  %v3369_v6 = vmul.f32 %v7306_v48, %v7306_v48  ;;  %5154 = vmatprep.subr.bf16.mxu0 %v5392_v33 }
 0x4de   : > { %7935 = vst [vmem:[#allocation19_spill] sm:$0xff] %v7309_v22  ;;  %3268 = vadd.xlane.f32.xlu1 %v7252_v8  ;;  %v3372_v50 = vmul.f32 %v7309_v22, %v7309_v22  ;;  %5155 = vmatpush3.bf16.msra.mxu0 %v5392_v33 }
 0x4df   : > { %7936 = vst [vmem:[#allocation27_spill] sm:$0xff] %v7312_v55  ;;  %v3370_v60 = vmul.f32 %v7312_v55, %v7312_v55 }
 0x4e0   : > { %3405 = vadd.xlane.f32.xlu0 %v3359_v38 }
 0x4e1   : > { %v5144_v39 = vpop.f32.mrb[172].mxu1 }
 0x4e2   : > { %v7318_v26 = vadd.f32 %v5144_v39, %v7203_v10  ;;  %v3229_v20 = vpop.f32.mrb[173].mxu1  ;;  %3274 = vadd.xlane.f32.xlu1 %v7255_v49  ;;  %v3360_v10 = vmul.f32 %v7255_v49, %v7255_v49 }
 0x4e3   : > { %v7324_v31 = vadd.f32 %v3229_v20, %v7184_v62  ;;  %v5145_v30 = vpop.f32.mrb[174].mxu1  ;;  %v3358_v62 = vmul.f32 %v7258_v53, %v7258_v53 }
 0x4e4   : > { %7937 = vst [vmem:[#allocation29_spill] sm:$0xff] %v7318_v26  ;;  %v7327_v16 = vadd.f32 %v5145_v30, %v7206_v58  ;;  %v3232_v46 = vpop.f32.mrb[175].mxu1  ;;  %3401 = vadd.xlane.f32.xlu0 %v3357_v42  ;;  %v3363_v58 = vmul.f32 %v7264_v5, %v7264_v5  ;;  %v3375_v18 = vmul.f32 %v7318_v26, %v7318_v26 }
 0x4e5   : > { %7938 = vst [vmem:[#allocation24_spill] sm:$0xff] %v7324_v31  ;;  %v7330_v1 = vadd.f32 %v3232_v46, %v7187_v23  ;;  %v3361_v23 = vmul.f32 %v7270_v56, %v7270_v56  ;;  %v3373_v2 = vmul.f32 %v7324_v31, %v7324_v31 }
 0x4e6   : > { %7939 = vst [vmem:[#allocation28_spill] sm:$0xff] %v7327_v16  ;;  %3270 = vadd.xlane.f32.xlu1 %v7258_v53  ;;  %v3376_v36 = vmul.f32 %v7327_v16, %v7327_v16 }
 0x4e7   : > { %7940 = vst [vmem:[#allocation31_spill] sm:$0xff] %v7330_v1  ;;  %v3374_v9 = vmul.f32 %v7330_v1, %v7330_v1 }
 0x4e8   : > { %3407 = vadd.xlane.f32.xlu0 %v3360_v10 }
 0x4ea   : > { %3280 = vadd.xlane.f32.xlu1 %v7264_v5 }
 0x4ec   : > { %3403 = vadd.xlane.f32.xlu0 %v3358_v62 }
 0x4ee   : > { %3276 = vadd.xlane.f32.xlu1 %v7270_v56 }
 0x4f0   : > { %3413 = vadd.xlane.f32.xlu0 %v3363_v58 }
 0x4f2   : > { %3282 = vadd.xlane.f32.xlu1 %v7273_v43 }
 0x4f4   : > { %3409 = vadd.xlane.f32.xlu0 %v3361_v23 }
 0x4f6   : > { %3278 = vadd.xlane.f32.xlu1 %v7276_v61 }
 0x4f8   : > { %3415 = vadd.xlane.f32.xlu0 %v3364_v19 }
 0x4fa   : > { %3288 = vadd.xlane.f32.xlu1 %v7282_v14 }
 0x4fc   : > { %3411 = vadd.xlane.f32.xlu0 %v3362_v57 }
 0x4fe   : > { %3284 = vadd.xlane.f32.xlu1 %v7288_v29 }
 0x500   : > { %3421 = vadd.xlane.f32.xlu0 %v3367_v11 }
 0x502   : > { %3290 = vadd.xlane.f32.xlu1 %v7291_v35 }
 0x504   : > { %3417 = vadd.xlane.f32.xlu0 %v3365_v7 }
 0x506   : > { %3286 = vadd.xlane.f32.xlu1 %v7294_v41 }
 0x508   : > { %3423 = vadd.xlane.f32.xlu0 %v3368_v45 }
 0x50a   : > { %3296 = vadd.xlane.f32.xlu1 %v7300_v37  ;;  %v5394_v37 = vld [vmem:[#allocation9 + $0x30] sm:$0xff]  }
 0x50c   : > { %3419 = vadd.xlane.f32.xlu0 %v3366_v12 }
 0x50e   : > { %3292 = vadd.xlane.f32.xlu1 %v7306_v48 }
 0x510   : > { %3429 = vadd.xlane.f32.xlu0 %v3371_v34 }
 0x512   : > { %3298 = vadd.xlane.f32.xlu1 %v7309_v22 }
 0x514   : > { %3425 = vadd.xlane.f32.xlu0 %v3369_v6 }
 0x516   : > { %3294 = vadd.xlane.f32.xlu1 %v7312_v55 }
 0x518   : > { %3431 = vadd.xlane.f32.xlu0 %v3372_v50 }
 0x51a   : > { %3304 = vadd.xlane.f32.xlu1 %v7318_v26 }
 0x51c   : > { %3427 = vadd.xlane.f32.xlu0 %v3370_v60 }
 0x51e   : > { %3300 = vadd.xlane.f32.xlu1 %v7324_v31 }
 0x520   : > { %3433 = vadd.xlane.f32.xlu0 %v3373_v2 }
 0x522   : > { %3302 = vadd.xlane.f32.xlu1 %v7330_v1 }
 0x524   : > { %3435 = vadd.xlane.f32.xlu0 %v3374_v9 }
 0x526   : > { %3306 = vadd.xlane.f32.xlu1 %v7327_v16 }
 0x528   : > { %3437 = vadd.xlane.f32.xlu0 %v3375_v18 }
 0x52a   : > { %3439 = vadd.xlane.f32.xlu1 %v3376_v36 }
 0x539   : > { %v3249_v52 = vpop.xlane.xlu0 %3248 }
 0x53b   : > { %v3251_v15 = vpop.xlane.xlu1 %3250 }
 0x53d   : > { %v3245_v27 = vpop.xlane.xlu0 %3244 }
 0x53f   : > { %v3247_v38 = vpop.xlane.xlu1 %3246 }
 0x540   : > { %v3308_v39 = vadd.f32 %v3247_v38, %v3245_v27 }
 0x541   : > { %v3382_v20 = vpop.xlane.xlu0 %3381 }
 0x542   : > { %v3309_v42 = vadd.f32 %v3308_v39, %v3249_v52 }
 0x543   : > { %v3378_v30 = vpop.xlane.xlu1 %3377 }
 0x544   : > { %v3310_v46 = vadd.f32 %v3309_v42, %v3251_v15 }
 0x545   : > { %v3384_v10 = vpop.xlane.xlu0 %3383 }
 0x547   : > { %v3257_v62 = vpop.xlane.xlu1 %3256 }
 0x549   : > { %v3380_v58 = vpop.xlane.xlu0 %3379 }
 0x54a   : > { %v3441_v50 = vadd.f32 %v3380_v58, %v3378_v30  ;;  %v5393_v58 = vld [vmem:[#allocation9 + $0x28] sm:$0xff]  }
 0x54b   : > { %v3253_v0 = vpop.xlane.xlu1 %3252  ;;  %5156 = vmatprep.subr.bf16.mxu0 %v5393_v58 }
 0x54c   : > { %v3442_v63 = vadd.f32 %v3441_v50, %v3382_v20  ;;  %v3311_v9 = vadd.f32 %v3310_v46, %v3253_v0  ;;  %5157 = vmatpush3.bf16.msra.mxu0 %v5393_v58 }
 0x54d   : > { %v3390_v23 = vpop.xlane.xlu0 %3389  ;;  %5158 = vmatprep.subr.bf16.mxu0 %v5394_v37 }
 0x54e   : > { %v3443_v52 = vadd.f32 %v3442_v63, %v3384_v10 }
 0x54f   : > { %v3259_v19 = vpop.xlane.xlu1 %3258 }
 0x550   : > { %5159 = vmatpush3.bf16.msra.mxu0 %v5394_v37 }
 0x551   : > { %v3386_v57 = vpop.xlane.xlu0 %3385 }
 0x552   : > { %v3444_v27 = vadd.f32 %v3443_v52, %v3386_v57 }
 0x553   : > { %v3255_v11 = vpop.xlane.xlu1 %3254 }
 0x554   : > { %v3312_v36 = vadd.f32 %v3311_v9, %v3255_v11 }
 0x555   : > { %v3392_v24 = vpop.xlane.xlu0 %3391 }
 0x556   : > { %v3313_v38 = vadd.f32 %v3312_v36, %v3257_v62  ;;  %v5395_v62 = vld [vmem:[#allocation9 + $0x38] sm:$0xff]  }
 0x557   : > { %v3265_v7 = vpop.xlane.xlu1 %3264  ;;  %5160 = vmatprep.subr.bf16.mxu0 %v5395_v62 }
 0x558   : > { %v3314_v16 = vadd.f32 %v3313_v38, %v3259_v19  ;;  %5161 = vmatpush3.bf16.msra.mxu0 %v5395_v62 }
 0x559   : > { %v3388_v45 = vpop.xlane.xlu0 %3387 }
 0x55a   : > { %v3445_v42 = vadd.f32 %v3444_v27, %v3388_v45 }
 0x55b   : > { %v3261_v12 = vpop.xlane.xlu1 %3260 }
 0x55c   : > { %v3446_v1 = vadd.f32 %v3445_v42, %v3390_v23  ;;  %v3315_v31 = vadd.f32 %v3314_v16, %v3261_v12 }
 0x55d   : > { %v3398_v34 = vpop.xlane.xlu0 %3397 }
 0x55e   : > { %v3447_v46 = vadd.f32 %v3446_v1, %v3392_v24 }
 0x55f   : > { %v3267_v54 = vpop.xlane.xlu1 %3266 }
 0x561   : > { %v3394_v6 = vpop.xlane.xlu0 %3393 }
 0x562   : > { %v3448_v10 = vadd.f32 %v3447_v46, %v3394_v6 }
 0x563   : > { %v3263_v60 = vpop.xlane.xlu1 %3262 }
 0x564   : > { %v3316_v30 = vadd.f32 %v3315_v31, %v3263_v60 }
 0x565   : > { %v3400_v2 = vpop.xlane.xlu0 %3399 }
 0x566   : > { %v3317_v11 = vadd.f32 %v3316_v30, %v3265_v7 }
 0x567   : > { %v3273_v18 = vpop.xlane.xlu1 %3272 }
 0x568   : > { %v3318_v19 = vadd.f32 %v3317_v11, %v3267_v54 }
 0x569   : > { %v3396_v33 = vpop.xlane.xlu0 %3395 }
 0x56a   : > { %v3449_v45 = vadd.f32 %v3448_v10, %v3396_v33 }
 0x56b   : > { %v3269_v15 = vpop.xlane.xlu1 %3268 }
 0x56c   : > { %v3450_v23 = vadd.f32 %v3449_v45, %v3398_v34  ;;  %v3319_v31 = vadd.f32 %v3318_v19, %v3269_v15 }
 0x56d   : > { %v3406_v39 = vpop.xlane.xlu0 %3405 }
 0x56e   : > { %v3451_v24 = vadd.f32 %v3450_v23, %v3400_v2 }
 0x56f   : > { %v3275_v55 = vpop.xlane.xlu1 %3274 }
 0x571   : > { %v3402_v26 = vpop.xlane.xlu0 %3401 }
 0x572   : > { %v3452_v9 = vadd.f32 %v3451_v24, %v3402_v26 }
 0x573   : > { %v3271_v22 = vpop.xlane.xlu1 %3270 }
 0x574   : > { %v3320_v60 = vadd.f32 %v3319_v31, %v3271_v22 }
 0x575   : > { %v3408_v20 = vpop.xlane.xlu0 %3407 }
 0x576   : > { %v3321_v6 = vadd.f32 %v3320_v60, %v3273_v18 }
 0x577   : > { %v3281_v0 = vpop.xlane.xlu1 %3280 }
 0x578   : > { %v3322_v27 = vadd.f32 %v3321_v6, %v3275_v55 }
 0x579   : > { %v3404_v57 = vpop.xlane.xlu0 %3403 }
 0x57a   : > { %v3453_v36 = vadd.f32 %v3452_v9, %v3404_v57 }
 0x57b   : > { %v3277_v50 = vpop.xlane.xlu1 %3276 }
 0x57c   : > { %v3454_v38 = vadd.f32 %v3453_v36, %v3406_v39  ;;  %v3323_v37 = vadd.f32 %v3322_v27, %v3277_v50 }
 0x57d   : > { %v3414_v16 = vpop.xlane.xlu0 %3413 }
 0x57e   : > { %v3455_v34 = vadd.f32 %v3454_v38, %v3408_v20 }
 0x57f   : > { %v3283_v12 = vpop.xlane.xlu1 %3282 }
 0x581   : > { %v3410_v1 = vpop.xlane.xlu0 %3409 }
 0x582   : > { %v3456_v58 = vadd.f32 %v3455_v34, %v3410_v1 }
 0x583   : > { %v3279_v63 = vpop.xlane.xlu1 %3278 }
 0x584   : > { %v3324_v42 = vadd.f32 %v3323_v37, %v3279_v63 }
 0x585   : > { %v3416_v7 = vpop.xlane.xlu0 %3415 }
 0x586   : > { %v3325_v46 = vadd.f32 %v3324_v42, %v3281_v0 }
 0x587   : > { %v3289_v52 = vpop.xlane.xlu1 %3288 }
 0x588   : > { %v3326_v11 = vadd.f32 %v3325_v46, %v3283_v12 }
 0x589   : > { %v3412_v33 = vpop.xlane.xlu0 %3411 }
 0x58a   : > { %v3457_v10 = vadd.f32 %v3456_v58, %v3412_v33 }
 0x58b   : > { %v3285_v54 = vpop.xlane.xlu1 %3284 }
 0x58c   : > { %v3458_v18 = vadd.f32 %v3457_v10, %v3414_v16  ;;  %v3327_v62 = vadd.f32 %v3326_v11, %v3285_v54 }
 0x58d   : > { %v3422_v30 = vpop.xlane.xlu0 %3421 }
 0x58e   : > { %v3459_v19 = vadd.f32 %v3458_v18, %v3416_v7 }
 0x58f   : > { %v3291_v15 = vpop.xlane.xlu1 %3290 }
 0x591   : > { %v3418_v22 = vpop.xlane.xlu0 %3417 }
 0x592   : > { %v3460_v50 = vadd.f32 %v3459_v19, %v3418_v22 }
 0x593   : > { %v3287_v2 = vpop.xlane.xlu1 %3286 }
 0x594   : > { %v3328_v45 = vadd.f32 %v3327_v62, %v3287_v2 }
 0x595   : > { %v3424_v26 = vpop.xlane.xlu0 %3423 }
 0x596   : > { %v3329_v23 = vadd.f32 %v3328_v45, %v3289_v52 }
 0x597   : > { %v3297_v57 = vpop.xlane.xlu1 %3296 }
 0x598   : > { %v3330_v24 = vadd.f32 %v3329_v23, %v3291_v15 }
 0x599   : > { %v3420_v55 = vpop.xlane.xlu0 %3419 }
 0x59a   : > { %v3461_v60 = vadd.f32 %v3460_v50, %v3420_v55 }
 0x59b   : > { %v3293_v39 = vpop.xlane.xlu1 %3292 }
 0x59c   : > { %v3462_v0 = vadd.f32 %v3461_v60, %v3422_v30  ;;  %v3331_v63 = vadd.f32 %v3330_v24, %v3293_v39 }
 0x59d   : > { %v3430_v31 = vpop.xlane.xlu0 %3429 }
 0x59e   : > { %v3463_v36 = vadd.f32 %v3462_v0, %v3424_v26 }
 0x59f   : > { %v3299_v20 = vpop.xlane.xlu1 %3298 }
 0x5a1   : > { %v3426_v1 = vpop.xlane.xlu0 %3425 }
 0x5a2   : > { %v3464_v27 = vadd.f32 %v3463_v36, %v3426_v1 }
 0x5a3   : > { %v3295_v9 = vpop.xlane.xlu1 %3294 }
 0x5a4   : > { %v3332_v6 = vadd.f32 %v3331_v63, %v3295_v9 }
 0x5a5   : > { %v3432_v12 = vpop.xlane.xlu0 %3431 }
 0x5a6   : > { %v3333_v33 = vadd.f32 %v3332_v6, %v3297_v57 }
 0x5a7   : > { %v3305_v16 = vpop.xlane.xlu1 %3304 }
 0x5a8   : > { %v3334_v42 = vadd.f32 %v3333_v33, %v3299_v20 }
 0x5a9   : > { %v3428_v38 = vpop.xlane.xlu0 %3427 }
 0x5aa   : > { %v3465_v37 = vadd.f32 %v3464_v27, %v3428_v38 }
 0x5ab   : > { %v3301_v7 = vpop.xlane.xlu1 %3300 }
 0x5ac   : > { %v3466_v54 = vadd.f32 %v3465_v37, %v3430_v31  ;;  %v3335_v34 = vadd.f32 %v3334_v42, %v3301_v7 }
 0x5ad   : > { %v3434_v52 = vpop.xlane.xlu0 %3433 }
 0x5ae   : > { %v3467_v58 = vadd.f32 %v3466_v54, %v3432_v12 }
 0x5af   : > { %v3303_v46 = vpop.xlane.xlu1 %3302 }
 0x5b0   : > { %v3468_v15 = vadd.f32 %v3467_v58, %v3434_v52  ;;  %v3336_v22 = vadd.f32 %v3335_v34, %v3303_v46 }
 0x5b1   : > { %v3436_v30 = vpop.xlane.xlu0 %3435 }
 0x5b2   : > { %v3337_v10 = vadd.f32 %v3336_v22, %v3305_v16  ;;  %v3469_v11 = vadd.f32 %v3468_v15, %v3436_v30 }
 0x5b3   : > { %v3307_v2 = vpop.xlane.xlu1 %3306 }
 0x5b4   : > { %v3338_v18 = vadd.f32 %v3337_v10, %v3307_v2 }
 0x5b5   : > { %v3438_v26 = vpop.xlane.xlu0 %3437 }
 0x5b6   : > { %v3339_v62 = vrot.slane %v3338_v18, 4  ;;  %v3470_v45 = vadd.f32 %v3469_v11, %v3438_v26 }
 0x5b7   : > { %v3440_v57 = vpop.xlane.xlu1 %3439 }
 0x5b8   : > { %v3340_v55 = vadd.f32 %v3339_v62, %v3338_v18  ;;  %v3471_v19 = vadd.f32 %v3470_v45, %v3440_v57 }
 0x5ba   : > { %v3341_v39 = vrot.slane %v3340_v55, 2  ;;  %v3472_v50 = vrot.slane %v3471_v19, 4 }
 0x5bc   : > { %v3473_v23 = vadd.f32 %v3472_v50, %v3471_v19  ;;  %v3342_v31 = vadd.f32 %v3341_v39, %v3340_v55 }
 0x5be   : > { %v3474_v60 = vrot.slane %v3473_v23, 2  ;;  %v3343_v20 = vrot.slane %v3342_v31, 1 }
 0x5c0   : > { %v3475_v24 = vadd.f32 %v3474_v60, %v3473_v23  ;;  %v3344_v1 = vadd.f32 %v3343_v20, %v3342_v31  ;;  %v7468_v23 = vld [vmem:[%s7845_s7] ss:$0 sm:$0xff] }
 0x5c2   : > { %v3476_v0 = vrot.slane %v3475_v24, 1  ;;  %v7385_v63 = vmul.f32 0.00048828125, %v3344_v1 }
 0x5c4   : > { %v3477_v9 = vadd.f32 %v3476_v0, %v3475_v24  ;;  %v3480_v12 = vmul.f32 %v7385_v63, %v7385_v63  ;;  %v3482_v27 = vsub.f32 %v7193_v13, %v7385_v63  ;;  %v3483_v33 = vsub.f32 %v7200_v47, %v7385_v63 }
 0x5c5   : > { %v3484_v38 = vsub.f32 %v7190_v21, %v7385_v63  ;;  %v3485_v37 = vsub.f32 %v7196_v59, %v7385_v63  ;;  %v3486_v7 = vsub.f32 %v7215_v3, %v7385_v63  ;;  %v3487_v54 = vsub.f32 %v7223_v32, %v7385_v63 }
 0x5c6   : > { %v3479_v6 = vmul.f32 0.00048828125, %v3477_v9  ;;  %v3488_v42 = vsub.f32 %v7209_v40, %v7385_v63  ;;  %v3489_v13 = vsub.f32 %v7218_v25, %v7385_v63  ;;  %v3490_v47 = vsub.f32 %v7234_v28, %v7385_v63 }
 0x5c7   : > { %v3491_v21 = vsub.f32 %v7240_v17, %v7385_v63  ;;  %v3492_v59 = vsub.f32 %v7228_v44, %v7385_v63  ;;  %v3493_v3 = vsub.f32 %v7237_v4, %v7385_v63  ;;  %v3494_v32 = vsub.f32 %v7252_v8, %v7385_v63 }
 0x5c8   : > { %v3481_v36 = vsub.f32 %v3479_v6, %v3480_v12  ;;  %v3495_v40 = vsub.f32 %v7258_v53, %v7385_v63  ;;  %v3496_v25 = vsub.f32 %v7246_v51, %v7385_v63  ;;  %v3497_v28 = vsub.f32 %v7255_v49, %v7385_v63 }
 0x5c9   : > { %v3498_v17 = vsub.f32 %v7270_v56, %v7385_v63  ;;  %v3499_v44 = vsub.f32 %v7276_v61, %v7385_v63  ;;  %v3500_v4 = vsub.f32 %v7264_v5, %v7385_v63  ;;  %v3501_v8 = vsub.f32 %v7273_v43, %v7385_v63  ;;  %v7941_v5 = vld [vmem:[#allocation18_spill] sm:$0xff]  ;;  %v7942_v43 = vld [vmem:[#allocation19_spill] sm:$0xff] }
 0x5ca   : > { %v3514_v16 = vadd.f32 1e-05, %v3481_v36  ;;  %v3502_v53 = vsub.f32 %v7288_v29, %v7385_v63  ;;  %v3503_v51 = vsub.f32 %v7294_v41, %v7385_v63  ;;  %v3504_v49 = vsub.f32 %v7282_v14, %v7385_v63  ;;  %v7943_v29 = vld [vmem:[#allocation24_spill] sm:$0xff]  ;;  %v7944_v41 = vld [vmem:[#allocation31_spill] sm:$0xff]  ;;  %v7945_v14 = vld [vmem:[#allocation29_spill] sm:$0xff] }
 0x5cb   : > { %v3505_v56 = vsub.f32 %v7291_v35, %v7385_v63  ;;  %v3506_v61 = vsub.f32 %v7306_v48, %v7385_v63  ;;  %v3508_v34 = vsub.f32 %v7941_v5, %v7385_v63  ;;  %v3509_v58 = vsub.f32 %v7942_v43, %v7385_v63  ;;  %v7946_v35 = vld [vmem:[#allocation28_spill] sm:$0xff]  ;;  %v7947_v48 = vld [vmem:[#allocation27_spill] sm:$0xff] }
 0x5cc   : > { %5462 = vrsqrt.f32 %v3514_v16  ;;  %v3510_v46 = vsub.f32 %v7943_v29, %v7385_v63  ;;  %v3511_v15 = vsub.f32 %v7944_v41, %v7385_v63  ;;  %v3512_v22 = vsub.f32 %v7945_v14, %v7385_v63 }
 0x5cd   : > { %v3513_v30 = vsub.f32 %v7946_v35, %v7385_v63  ;;  %v3507_v10 = vsub.f32 %v7947_v48, %v7385_v63 }
 0x5d6   : > { %v5463_v52 = vpop.eup %5462 }
 0x5d7   : > { %v3516_v2 = vmul.f32 %v5463_v52, %v3482_v27  ;;  %v7453_v11 = vmul.f32 %v5463_v52, %v3508_v34  ;;  %v7455_v18 = vmul.f32 %v5463_v52, %v3509_v58  ;;  %v7457_v26 = vmul.f32 %v5463_v52, %v3510_v46 }
 0x5d8   : > { %v7459_v62 = vmul.f32 %v5463_v52, %v3511_v15  ;;  %v7461_v45 = vmul.f32 %v5463_v52, %v3512_v22  ;;  %v7463_v57 = vmul.f32 %v5463_v52, %v3513_v30  ;;  %v3517_v55 = vmul.f32 %v5463_v52, %v3483_v33 }
 0x5d9   : > { %v3518_v19 = vmul.f32 %v5463_v52, %v3484_v38  ;;  %v3519_v39 = vmul.f32 %v5463_v52, %v3485_v37  ;;  %v3520_v50 = vmul.f32 %v5463_v52, %v3486_v7  ;;  %v3521_v31 = vmul.f32 %v5463_v52, %v3487_v54  ;;  %v7477_v7 = vld [vmem:[%s7846_s8] ss:$0 sm:$0xff] }
 0x5da   : > { %v3522_v60 = vmul.f32 %v5463_v52, %v3488_v42  ;;  %v3523_v20 = vmul.f32 %v5463_v52, %v3489_v13  ;;  %v3524_v24 = vmul.f32 %v5463_v52, %v3490_v47  ;;  %v3525_v1 = vmul.f32 %v5463_v52, %v3491_v21 }
 0x5db   : > { %v3526_v0 = vmul.f32 %v5463_v52, %v3492_v59  ;;  %v3527_v63 = vmul.f32 %v5463_v52, %v3493_v3  ;;  %v3528_v9 = vmul.f32 %v5463_v52, %v3494_v32  ;;  %v3529_v6 = vmul.f32 %v5463_v52, %v3495_v40 }
 0x5dc   : > { %v3530_v12 = vmul.f32 %v5463_v52, %v3496_v25  ;;  %v3531_v36 = vmul.f32 %v5463_v52, %v3497_v28  ;;  %v3532_v16 = vmul.f32 %v5463_v52, %v3498_v17  ;;  %v3555_v27 = vmul.f32 %v7468_v23, %v3516_v2 }
 0x5dd   : > { %v3556_v33 = vmul.f32 %v7468_v23, %v3517_v55  ;;  %v3557_v38 = vmul.f32 %v7468_v23, %v3518_v19  ;;  %v3558_v37 = vmul.f32 %v7468_v23, %v3519_v39  ;;  %v3533_v54 = vmul.f32 %v5463_v52, %v3499_v44 }
 0x5de   : > { %v3534_v42 = vmul.f32 %v5463_v52, %v3500_v4  ;;  %v3559_v13 = vmul.f32 %v7468_v23, %v3520_v50  ;;  %v3560_v47 = vmul.f32 %v7468_v23, %v3521_v31  ;;  %v3535_v21 = vmul.f32 %v5463_v52, %v3501_v8 }
 0x5df   : > { %v3536_v59 = vmul.f32 %v5463_v52, %v3502_v53  ;;  %v3537_v3 = vmul.f32 %v5463_v52, %v3503_v51  ;;  %v3561_v32 = vmul.f32 %v7468_v23, %v3522_v60  ;;  %v3538_v40 = vmul.f32 %v5463_v52, %v3504_v49 }
 0x5e0   : > { %v3539_v25 = vmul.f32 %v5463_v52, %v3505_v56  ;;  %v3540_v28 = vmul.f32 %v5463_v52, %v3506_v61  ;;  %v3562_v17 = vmul.f32 %v7468_v23, %v3523_v20  ;;  %v3596_v5 = vadd.f32 %v7477_v7, %v3557_v38 }
 0x5e1   : > { %v3597_v34 = vadd.f32 %v7477_v7, %v3558_v37  ;;  %v3594_v44 = vadd.f32 %v7477_v7, %v3555_v27  ;;  %v3595_v4 = vadd.f32 %v7477_v7, %v3556_v33  ;;  %v7487_v43 = vmul.f32 %v5463_v52, %v3507_v10 }
 0x5e2   : > { %v3563_v8 = vmul.f32 %v7468_v23, %v3524_v24  ;;  %v3598_v53 = vadd.f32 %v7477_v7, %v3559_v13  ;;  %v7492_v51 = vadd.f32 %v7477_v7, %v3560_v47  ;;  %v3564_v49 = vmul.f32 %v7468_v23, %v3525_v1 }
 0x5e3   : > { %v3660_v56 = vmul.f32 0.70710677, %v3596_v5  ;;  %v3661_v61 = vmul.f32 0.70710677, %v3597_v34  ;;  %v7496_v58 = vadd.f32 %v7477_v7, %v3561_v32  ;;  %v3565_v29 = vmul.f32 %v7468_v23, %v3526_v0 }
 0x5e4   : > { %v3658_v46 = vmul.f32 0.70710677, %v3594_v44  ;;  %v3659_v41 = vmul.f32 0.70710677, %v3595_v4  ;;  %v7500_v52 = vadd.f32 %v7477_v7, %v3562_v17  ;;  %v3566_v15 = vmul.f32 %v7468_v23, %v3527_v63 }
 0x5e5   : > { %v3567_v14 = vmul.f32 %v7468_v23, %v3528_v9  ;;  %5464 = verf.f32 %v3660_v56  ;;  %v3662_v22 = vmul.f32 0.70710677, %v3598_v53  ;;  %v3568_v35 = vmul.f32 %v7468_v23, %v3529_v6 }
 0x5e6   : > { %v3569_v30 = vmul.f32 %v7468_v23, %v3530_v12  ;;  %5466 = verf.f32 %v3661_v61  ;;  %v3663_v48 = vmul.f32 0.70710677, %v7492_v51  ;;  %v3570_v10 = vmul.f32 %v7468_v23, %v3531_v36 }
 0x5e7   : > { %5468 = verf.f32 %v3658_v46  ;;  %v3664_v2 = vmul.f32 0.70710677, %v7496_v58  ;;  %v7510_v55 = vadd.f32 %v7477_v7, %v3563_v8  ;;  %v3665_v19 = vmul.f32 0.70710677, %v7500_v52 }
 0x5e8   : > { %5470 = verf.f32 %v3659_v41  ;;  %v7514_v39 = vadd.f32 %v7477_v7, %v3564_v49  ;;  %v7517_v50 = vadd.f32 %v7477_v7, %v3565_v29  ;;  %v3571_v31 = vmul.f32 %v7468_v23, %v3532_v16 }
 0x5e9   : > { %5472 = verf.f32 %v3662_v22  ;;  %v3666_v60 = vmul.f32 0.70710677, %v7510_v55  ;;  %v7522_v20 = vadd.f32 %v7477_v7, %v3566_v15  ;;  %v3572_v24 = vmul.f32 %v7468_v23, %v3533_v54 }
 0x5ea   : > { %5474 = verf.f32 %v3663_v48  ;;  %v3667_v1 = vmul.f32 0.70710677, %v7514_v39  ;;  %v7527_v0 = vadd.f32 %v7477_v7, %v3567_v14  ;;  %v3573_v63 = vmul.f32 %v7468_v23, %v3534_v42 }
 0x5eb   : > { %v7531_v9 = vmul.f32 %v7468_v23, %v3535_v21  ;;  %v7534_v6 = vmul.f32 %v7468_v23, %v3536_v59  ;;  %5476 = verf.f32 %v3664_v2  ;;  %v7537_v12 = vmul.f32 %v7468_v23, %v3537_v3 }
 0x5ec   : > { %5478 = verf.f32 %v3665_v19  ;;  %v3668_v36 = vmul.f32 0.70710677, %v7517_v50  ;;  %v7541_v16 = vadd.f32 %v7477_v7, %v3568_v35  ;;  %v7544_v27 = vmul.f32 %v7468_v23, %v3538_v40 }
 0x5ed   : > { %v7547_v33 = vmul.f32 %v7468_v23, %v3539_v25  ;;  %5480 = verf.f32 %v3666_v60  ;;  %v3669_v38 = vmul.f32 0.70710677, %v7522_v20  ;;  %v7551_v37 = vmul.f32 %v7468_v23, %v3540_v28 }
 0x5ee   : > { %5482 = verf.f32 %v3667_v1  ;;  %v3670_v54 = vmul.f32 0.70710677, %v7527_v0  ;;  %v7555_v42 = vadd.f32 %v7477_v7, %v3569_v30  ;;  %v3628_v47 = vmul.f32 0.5, %v3596_v5 }
 0x5ef   : > { %v5465_v13 = vpop.eup %5464  ;;  %v3629_v21 = vmul.f32 0.5, %v3597_v34  ;;  %v3626_v59 = vmul.f32 0.5, %v3594_v44  ;;  %v3671_v3 = vmul.f32 0.70710677, %v7541_v16  ;;  %v3627_v40 = vmul.f32 0.5, %v3595_v4 }
 0x5f0   : > { %v5467_v32 = vpop.eup %5466  ;;  %v3724_v25 = vadd.f32 1.0, %v5465_v13  ;;  %5484 = verf.f32 %v3668_v36  ;;  %v7559_v17 = vadd.f32 %v7477_v7, %v3570_v10  ;;  %v3630_v49 = vmul.f32 0.5, %v3598_v53 }
 0x5f1   : > { %v5469_v28 = vpop.eup %5468  ;;  %v3725_v8 = vadd.f32 1.0, %v5467_v32  ;;  %5486 = verf.f32 %v3669_v38  ;;  %v7562_v56 = vadd.f32 %v7477_v7, %v3571_v31  ;;  %v3672_v44 = vmul.f32 0.70710677, %v7555_v42 }
 0x5f2   : > { %v5471_v61 = vpop.eup %5470  ;;  %v3722_v5 = vadd.f32 1.0, %v5469_v28  ;;  %v3756_v34 = vmul.f32 %v3724_v25, %v3628_v47  ;;  %5488 = verf.f32 %v3670_v54  ;;  %v3631_v41 = vmul.f32 0.5, %v7492_v51 }
 0x5f3   : > { %v5473_v29 = vpop.eup %5472  ;;  %v3723_v4 = vadd.f32 1.0, %v5471_v61  ;;  %v3757_v46 = vmul.f32 %v3725_v8, %v3629_v21  ;;  %5490 = verf.f32 %v3671_v3  ;;  %v3673_v53 = vmul.f32 0.70710677, %v7559_v17 }
 0x5f4   : > { %v5475_v15 = vpop.eup %5474  ;;  %v3754_v14 = vmul.f32 %v3722_v5, %v3626_v59  ;;  %v3726_v22 = vadd.f32 1.0, %v5473_v29  ;;  %v7568_v35 = vadd.f32 %v7477_v7, %v3572_v24  ;;  %v3632_v2 = vmul.f32 0.5, %v7496_v58 }
 0x5f5   : > { %v5477_v30 = vpop.eup %5476  ;;  %v3755_v48 = vmul.f32 %v3723_v4, %v3627_v40  ;;  %v3727_v10 = vadd.f32 1.0, %v5475_v15  ;;  %v3674_v19 = vmul.f32 0.70710677, %v7562_v56  ;;  %v3787_v60 = vpack.c.bf16 %v3757_v46, %v3756_v34 }
 0x5f6   : > { %v5479_v31 = vpop.eup %5478  ;;  %v3758_v1 = vmul.f32 %v3726_v22, %v3630_v49  ;;  %5492 = verf.f32 %v3672_v44  ;;  %v7573_v51 = vadd.f32 %v7477_v7, %v3573_v63  ;;  %v3728_v13 = vadd.f32 1.0, %v5477_v30 }
 0x5f7   : > { %v5481_v36 = vpop.eup %5480  ;;  %v3786_v38 = vpack.c.bf16 %v3755_v48, %v3754_v14  ;;  %v3759_v54 = vmul.f32 %v3727_v10, %v3631_v41  ;;  %v3729_v24 = vadd.f32 1.0, %v5479_v31  ;;  %v3633_v21 = vmul.f32 0.5, %v7500_v52 }
 0x5f8   : > { %v5483_v47 = vpop.eup %5482  ;;  %5494 = verf.f32 %v3673_v53  ;;  %v3675_v58 = vmul.f32 0.70710677, %v7568_v35  ;;  %v7579_v59 = vadd.f32 %v7477_v7, %v7531_v9  ;;  %v3730_v32 = vadd.f32 1.0, %v5481_v36 }
 0x5f9   : > { %5162 = vmatprep.mubr.bf16.mxu0 %v3786_v38  ;;  %v3788_v3 = vpack.c.bf16 %v3759_v54, %v3758_v1  ;;  %v3731_v63 = vadd.f32 1.0, %v5483_v47  ;;  %v7583_v40 = vadd.f32 %v7477_v7, %v7534_v6  ;;  %v3580_v28 = vmul.f32 %v7468_v23, %v7487_v43 }
 0x5fa   : > { %v5485_v25 = vpop.eup %5484  ;;  %5163 = vmatmul.mubr.bf16.vlgmr.msra.gmra.mrb[144].mxu0 %v3787_v60  ;;  %v3634_v52 = vmul.f32 0.5, %v7510_v55  ;;  %5496 = verf.f32 %v3674_v19  ;;  %v7590_v9 = vadd.f32 %v7477_v7, %v7537_v12  ;;  %v3760_v49 = vmul.f32 %v3728_v13, %v3632_v2 }
 0x5fb   : > { %v5487_v8 = vpop.eup %5486  ;;  %5166 = vmatprep.mubr.bf16.mxu0 %v3788_v3  ;;  %v3761_v61 = vmul.f32 %v3729_v24, %v3633_v21  ;;  %v3635_v5 = vmul.f32 0.5, %v7514_v39  ;;  %v3676_v6 = vmul.f32 0.70710677, %v7573_v51  ;;  %v3581_v43 = vmul.f32 %v7468_v23, %v7453_v11 }
 0x5fc   : > { %v5489_v34 = vpop.eup %5488  ;;  %v3582_v55 = vmul.f32 %v7468_v23, %v7455_v18  ;;  %5498 = verf.f32 %v3675_v58  ;;  %v3677_v44 = vmul.f32 0.70710677, %v7579_v59  ;;  %v3583_v29 = vmul.f32 %v7468_v23, %v7457_v26 }
 0x5fd   : > { %v5491_v12 = vpop.eup %5490  ;;  %v3762_v4 = vmul.f32 %v3730_v32, %v3634_v52  ;;  %v3763_v46 = vmul.f32 %v3731_v63, %v3635_v5  ;;  %v3678_v39 = vmul.f32 0.70710677, %v7583_v40  ;;  %v3732_v41 = vadd.f32 1.0, %v5485_v25 }
 0x5fe   : > { %v3733_v15 = vadd.f32 1.0, %v5487_v8  ;;  %v3679_v14 = vmul.f32 0.70710677, %v7590_v9  ;;  %v7605_v11 = vadd.f32 %v7477_v7, %v7544_v27  ;;  %v3789_v18 = vpack.c.bf16 %v3761_v61, %v3760_v49 }
 0x5ff   : > { %v3636_v22 = vmul.f32 0.5, %v7517_v50  ;;  %v3637_v53 = vmul.f32 0.5, %v7522_v20  ;;  %5500 = verf.f32 %v3676_v6  ;;  %v3734_v26 = vadd.f32 1.0, %v5489_v34 }
 0x600   : > { %v5493_v30 = vpop.eup %5492  ;;  %v3735_v48 = vadd.f32 1.0, %v5491_v12  ;;  %5502 = verf.f32 %v3677_v44  ;;  %v7611_v10 = vadd.f32 %v7477_v7, %v7547_v33  ;;  %v3790_v2 = vpack.c.bf16 %v3763_v46, %v3762_v4 }
 0x601   : > { %v3638_v19 = vmul.f32 0.5, %v7527_v0  ;;  %v3639_v27 = vmul.f32 0.5, %v7541_v16  ;;  %5504 = verf.f32 %v3678_v39  ;;  %v3764_v50 = vmul.f32 %v3732_v41, %v3636_v22 }
 0x602   : > { %v5495_v31 = vpop.eup %5494  ;;  %5167 = vmatmul.mubr.bf16.gmra.mrb[148].mxu0 %v3789_v18  ;;  %v3765_v60 = vmul.f32 %v3733_v15, %v3637_v53  ;;  %5506 = verf.f32 %v3679_v14  ;;  %v3680_v20 = vmul.f32 0.70710677, %v7605_v11  ;;  %v3584_v1 = vmul.f32 %v7468_v23, %v7459_v62 }
 0x603   : > { %5170 = vmatprep.mubr.bf16.mxu0 %v3790_v2  ;;  %v3681_v33 = vmul.f32 0.70710677, %v7611_v10  ;;  %v7621_v36 = vadd.f32 %v7477_v7, %v7551_v37  ;;  %v7624_v0 = vadd.f32 %v7477_v7, %v3580_v28  ;;  %v3766_v38 = vmul.f32 %v3734_v26, %v3638_v19 }
 0x604   : > { %v5497_v16 = vpop.eup %5496  ;;  %v3767_v54 = vmul.f32 %v3735_v48, %v3639_v27  ;;  %v7627_v13 = vadd.f32 %v7477_v7, %v3581_v43  ;;  %v7630_v24 = vadd.f32 %v7477_v7, %v3582_v55  ;;  %v3585_v62 = vmul.f32 %v7468_v23, %v7461_v45 }
 0x605   : > { %v3586_v47 = vmul.f32 %v7468_v23, %v7463_v57  ;;  %v3736_v37 = vadd.f32 1.0, %v5493_v30  ;;  %v7637_v21 = vadd.f32 %v7477_v7, %v3583_v29  ;;  %v3791_v3 = vpack.c.bf16 %v3765_v60, %v3764_v50 }
 0x606   : > { %v5499_v58 = vpop.eup %5498  ;;  %5508 = verf.f32 %v3680_v20  ;;  %v3682_v32 = vmul.f32 0.70710677, %v7621_v36  ;;  %v3683_v63 = vmul.f32 0.70710677, %v7624_v0  ;;  %v3737_v25 = vadd.f32 1.0, %v5495_v31 }
 0x607   : > { %v3738_v28 = vadd.f32 1.0, %v5497_v16  ;;  %5510 = verf.f32 %v3681_v33  ;;  %v3684_v52 = vmul.f32 0.70710677, %v7627_v13  ;;  %v3792_v45 = vpack.c.bf16 %v3767_v54, %v3766_v38 }
 0x608   : > { %5512 = verf.f32 %v3682_v32  ;;  %v3685_v57 = vmul.f32 0.70710677, %v7630_v24  ;;  %v3623_v23 = vadd.f32 %v7477_v7, %v3584_v1  ;;  %v3739_v49 = vadd.f32 1.0, %v5499_v58 }
 0x609   : > { %v5501_v8 = vpop.eup %5500  ;;  %5514 = verf.f32 %v3683_v63  ;;  %v3686_v61 = vmul.f32 0.70710677, %v7637_v21  ;;  %v3624_v5 = vadd.f32 %v7477_v7, %v3585_v62  ;;  %v3640_v34 = vmul.f32 0.5, %v7555_v42 }
 0x60a   : > { %v5503_v6 = vpop.eup %5502  ;;  %5171 = vmatmul.mubr.bf16.gmra.mrb[152].mxu0 %v3791_v3  ;;  %v3641_v43 = vmul.f32 0.5, %v7559_v17  ;;  %v3642_v55 = vmul.f32 0.5, %v7562_v56  ;;  %5516 = verf.f32 %v3684_v52  ;;  %v3643_v12 = vmul.f32 0.5, %v7568_v35 }
 0x60b   : > { %v5505_v44 = vpop.eup %5504  ;;  %5174 = vmatprep.mubr.bf16.mxu0 %v3792_v45  ;;  %5518 = verf.f32 %v3685_v57  ;;  %v3687_v29 = vmul.f32 0.70710677, %v3623_v23  ;;  %v3625_v4 = vadd.f32 %v7477_v7, %v3586_v47  ;;  %v3768_v39 = vmul.f32 %v3736_v37, %v3640_v34 }
 0x60c   : > { %v5507_v46 = vpop.eup %5506  ;;  %v3769_v41 = vmul.f32 %v3737_v25, %v3641_v43  ;;  %5520 = verf.f32 %v3686_v61  ;;  %v3688_v15 = vmul.f32 0.70710677, %v3624_v5  ;;  %v3770_v14 = vmul.f32 %v3738_v28, %v3642_v55 }
 0x60d   : > { %v3771_v42 = vmul.f32 %v3739_v49, %v3643_v12  ;;  %5522 = verf.f32 %v3687_v29  ;;  %v3689_v17 = vmul.f32 0.70710677, %v3625_v4  ;;  %v3740_v18 = vadd.f32 1.0, %v5501_v8 }
 0x60e   : > { %v3741_v56 = vadd.f32 1.0, %v5503_v6  ;;  %5524 = verf.f32 %v3688_v15  ;;  %v3742_v22 = vadd.f32 1.0, %v5505_v44  ;;  %v3743_v53 = vadd.f32 1.0, %v5507_v46 }
 0x60f   : > { %5526 = verf.f32 %v3689_v17  ;;  %v3793_v30 = vpack.c.bf16 %v3769_v41, %v3768_v39  ;;  %v3644_v26 = vmul.f32 0.5, %v7573_v51  ;;  %v3645_v7 = vmul.f32 0.5, %v7579_v59 }
 0x610   : > { %v5509_v35 = vpop.eup %5508  ;;  %v3794_v2 = vpack.c.bf16 %v3771_v42, %v3770_v14  ;;  %v3646_v19 = vmul.f32 0.5, %v7583_v40  ;;  %v3647_v27 = vmul.f32 0.5, %v7590_v9  ;;  %v3648_v38 = vmul.f32 0.5, %v7605_v11 }
 0x611   : > { %v5511_v48 = vpop.eup %5510  ;;  %v3772_v50 = vmul.f32 %v3740_v18, %v3644_v26  ;;  %v3773_v60 = vmul.f32 %v3741_v56, %v3645_v7  ;;  %v3649_v59 = vmul.f32 0.5, %v7611_v10  ;;  %v3652_v54 = vmul.f32 0.5, %v7627_v13  ;;  %v7672_v56 = vld [vmem:[%s7948_s11] ss:$0 sm:$0xff] }
 0x612   : > { %v5513_v31 = vpop.eup %5512  ;;  %5175 = vmatmul.mubr.bf16.gmra.mrb[156].mxu0 %v3793_v30  ;;  %v3774_v1 = vmul.f32 %v3742_v22, %v3646_v19  ;;  %v3775_v33 = vmul.f32 %v3743_v53, %v3647_v27  ;;  %v3653_v40 = vmul.f32 0.5, %v7630_v24  ;;  %v3654_v58 = vmul.f32 0.5, %v7637_v21 }
 0x613   : > { %v5515_v20 = vpop.eup %5514  ;;  %5178 = vmatprep.mubr.bf16.mxu0 %v3794_v2  ;;  %v3795_v47 = vpack.c.bf16 %v3773_v60, %v3772_v50  ;;  %v3655_v3 = vmul.f32 0.5, %v3623_v23  ;;  %v3656_v52 = vmul.f32 0.5, %v3624_v5  ;;  %v3744_v45 = vadd.f32 1.0, %v5509_v35 }
 0x614   : > { %v5517_v16 = vpop.eup %5516  ;;  %v3796_v63 = vpack.c.bf16 %v3775_v33, %v3774_v1  ;;  %v3745_v57 = vadd.f32 1.0, %v5511_v48  ;;  %v3746_v49 = vadd.f32 1.0, %v5513_v31  ;;  %v3747_v24 = vadd.f32 1.0, %v5515_v20 }
 0x615   : > { %v5519_v51 = vpop.eup %5518  ;;  %v3748_v62 = vadd.f32 1.0, %v5517_v16  ;;  %v3657_v21 = vmul.f32 0.5, %v3625_v4  ;;  %v3650_v55 = vmul.f32 0.5, %v7621_v36  ;;  %v3651_v5 = vmul.f32 0.5, %v7624_v0  ;;  %v7665_v36 = vld [vmem:[%s7844_s6] ss:$0 sm:$0xff] }
 0x616   : > { %v5521_v9 = vpop.eup %5520  ;;  %v3749_v37 = vadd.f32 1.0, %v5519_v51  ;;  %v3776_v12 = vmul.f32 %v3744_v45, %v3648_v38  ;;  %v3777_v29 = vmul.f32 %v3745_v57, %v3649_v59  ;;  %v4515_v0 = vld [vmem:[%s5992_s12 + $0x8] sm:$0xff]   ;;  %v4452_v4 = vld [vmem:[%s5992_s12] sm:$0xff]   ;;  %v4517_v38 = vld [vmem:[%s5992_s12 + $0x18] sm:$0xff]  }
 0x617   : > { %v5523_v32 = vpop.eup %5522  ;;  %v3780_v25 = vmul.f32 %v3748_v62, %v3652_v54  ;;  %v3750_v28 = vadd.f32 1.0, %v5521_v9  ;;  %v3778_v41 = vmul.f32 %v3746_v49, %v3650_v55  ;;  %v3779_v15 = vmul.f32 %v3747_v24, %v3651_v5  ;;  %v4516_v59 = vld [vmem:[%s5992_s12 + $0x10] sm:$0xff]   ;;  %v4519_v49 = vld [vmem:[%s5992_s12 + $0x28] sm:$0xff]  }
 0x618   : > { %v5525_v11 = vpop.eup %5524  ;;  %v3781_v10 = vmul.f32 %v3749_v37, %v3653_v40  ;;  %v3751_v8 = vadd.f32 1.0, %v5523_v32  ;;  %v3797_v42 = vpack.c.bf16 %v3777_v29, %v3776_v12  ;;  %v4457_v53 = vunpack.c.l.bf16 %v4515_v0 }
 0x619   : > { %v5527_v13 = vpop.eup %5526  ;;  %v3782_v61 = vmul.f32 %v3750_v28, %v3654_v58  ;;  %v3752_v6 = vadd.f32 1.0, %v5525_v11  ;;  %v3798_v17 = vpack.c.bf16 %v3779_v15, %v3778_v41  ;;  %v4453_v26 = vunpack.c.l.bf16 %v4452_v4 }
 0x61a   : > { %5179 = vmatmul.mubr.bf16.gmra.mrb[160].mxu0 %v3795_v47  ;;  %v3799_v34 = vpack.c.bf16 %v3781_v10, %v3780_v25  ;;  %v3783_v43 = vmul.f32 %v3751_v8, %v3655_v3  ;;  %v3753_v23 = vadd.f32 1.0, %v5527_v13  ;;  %v4458_v19 = vunpack.c.h.bf16 %v4515_v0 }
 0x61b   : > { %5182 = vmatprep.mubr.bf16.mxu0 %v3796_v63  ;;  %v3784_v44 = vmul.f32 %v3752_v6, %v3656_v52  ;;  %v4454_v60 = vunpack.c.h.bf16 %v4452_v4  ;;  %v4465_v9 = vunpack.c.l.bf16 %v4517_v38  ;;  %v4461_v58 = vunpack.c.l.bf16 %v4516_v59 }
 0x61c   : > { %v3800_v46 = vpack.c.bf16 %v3783_v43, %v3782_v61  ;;  %v3785_v39 = vmul.f32 %v3753_v23, %v3657_v21  ;;  %v4466_v25 = vunpack.c.h.bf16 %v4517_v38  ;;  %v4462_v45 = vunpack.c.h.bf16 %v4516_v59  ;;  %v4518_v61 = vld [vmem:[%s5992_s12 + $0x20] sm:$0xff]  }
 0x61d   : > { %v4473_v21 = vunpack.c.l.bf16 %v4519_v49  ;;  %v4469_v5 = vunpack.c.l.bf16 %v4518_v61 }
 0x61e   : > { %v3801_v14 = vpack.c.bf16 %v3785_v39, %v3784_v44 }
 0x622   : > { %5183 = vmatmul.mubr.bf16.gmra.mrb[164].mxu0 %v3797_v42 }
 0x623   : > { %5186 = vmatprep.mubr.bf16.mxu0 %v3798_v17 }
 0x62a   : > { %5187 = vmatmul.mubr.bf16.gmra.mrb[168].mxu0 %v3799_v34 }
 0x62b   : > { %5190 = vmatprep.mubr.bf16.mxu0 %v3800_v46  ;;  %v4474_v46 = vunpack.c.h.bf16 %v4519_v49 }
 0x632   : > { %5191 = vmatmul.mubr.bf16.gmra.mrb[172].mxu0 %v3801_v14  ;;  %v4470_v14 = vunpack.c.h.bf16 %v4518_v61 }
 0x6cd   : > { %v5164_v18 = vpop.f32.mrb[144].mxu0 }
 0x6ce   : > { %v3916_v22 = vadd.f32 %v5164_v18, %v7665_v36  ;;  %v3907_v35 = vpop.f32.mrb[145].mxu0  ;;  %v4521_v18 = vld [vmem:[%s5992_s12 + $0x38] sm:$0xff]  }
 0x6cf   : > { %v3908_v30 = vadd.f32 %v7665_v36, %v3907_v35  ;;  %v5165_v7 = vpop.f32.mrb[146].mxu0 }
 0x6d0   : > { %v4043_v48 = vmul.f32 %v7672_v56, %v3916_v22  ;;  %v3919_v2 = vadd.f32 %v5165_v7, %v7665_v36  ;;  %v3910_v27 = vpop.f32.mrb[147].mxu0  ;;  %v4481_v7 = vunpack.c.l.bf16 %v4521_v18 }
 0x6d1   : > { %v4041_v31 = vmul.f32 %v7672_v56, %v3908_v30  ;;  %v3911_v50 = vadd.f32 %v7665_v36, %v3910_v27 }
 0x6d2   : > { %v4139_v20 = vadd.f32 %v4457_v53, %v4043_v48  ;;  %v4044_v1 = vmul.f32 %v7672_v56, %v3919_v2  ;;  %v4520_v53 = vld [vmem:[%s5992_s12 + $0x30] sm:$0xff]  }
 0x6d3   : > { %v4137_v33 = vadd.f32 %v4453_v26, %v4041_v31  ;;  %v4042_v16 = vmul.f32 %v7672_v56, %v3911_v50 }
 0x6d4   : > { %4171 = vst [vmem:[%s7684_s26 + $0x10] sm:$0xff] %v4139_v20  ;;  %v4140_v51 = vadd.f32 %v4458_v19, %v4044_v1  ;;  %v4477_v19 = vunpack.c.l.bf16 %v4520_v53 }
 0x6d5   : > { %4169 = vst [vmem:[%s7684_s26] sm:$0xff] %v4137_v33  ;;  %v4138_v54 = vadd.f32 %v4454_v60, %v4042_v16  ;;  %v5168_v40 = vpop.f32.mrb[148].mxu0  ;;  %v4482_v60 = vunpack.c.h.bf16 %v4521_v18  ;;  %v4478_v16 = vunpack.c.h.bf16 %v4520_v53 }
 0x6d6   : > { %4172 = vst [vmem:[%s7684_s26 + $0x18] sm:$0xff] %v4140_v51  ;;  %v3932_v62 = vadd.f32 %v5168_v40, %v7665_v36  ;;  %v3923_v47 = vpop.f32.mrb[149].mxu0  ;;  %v4523_v40 = vld [vmem:[%s5992_s12 + $0x48] sm:$0xff]  }
 0x6d7   : > { %4170 = vst [vmem:[%s7684_s26 + $0x8] sm:$0xff] %v4138_v54  ;;  %v3924_v37 = vadd.f32 %v7665_v36, %v3923_v47  ;;  %v5169_v3 = vpop.f32.mrb[150].mxu0 }
 0x6d8   : > { %v4047_v32 = vmul.f32 %v7672_v56, %v3932_v62  ;;  %v3935_v63 = vadd.f32 %v5169_v3, %v7665_v36  ;;  %v3926_v28 = vpop.f32.mrb[151].mxu0  ;;  %v4489_v3 = vunpack.c.l.bf16 %v4523_v40 }
 0x6d9   : > { %v4045_v52 = vmul.f32 %v7672_v56, %v3924_v37  ;;  %v3927_v11 = vadd.f32 %v7665_v36, %v3926_v28 }
 0x6da   : > { %v4143_v57 = vadd.f32 %v4465_v9, %v4047_v32  ;;  %v4048_v10 = vmul.f32 %v7672_v56, %v3935_v63  ;;  %v4522_v9 = vld [vmem:[%s5992_s12 + $0x40] sm:$0xff]  }
 0x6db   : > { %v4141_v8 = vadd.f32 %v4461_v58, %v4045_v52  ;;  %v4046_v13 = vmul.f32 %v7672_v56, %v3927_v11 }
 0x6dc   : > { %4175 = vst [vmem:[%s7684_s26 + $0x30] sm:$0xff] %v4143_v57  ;;  %v4144_v24 = vadd.f32 %v4466_v25, %v4048_v10  ;;  %v4485_v25 = vunpack.c.l.bf16 %v4522_v9 }
 0x6dd   : > { %4173 = vst [vmem:[%s7684_s26 + $0x20] sm:$0xff] %v4141_v8  ;;  %v4142_v6 = vadd.f32 %v4462_v45, %v4046_v13  ;;  %v5172_v34 = vpop.f32.mrb[152].mxu0  ;;  %v4490_v45 = vunpack.c.h.bf16 %v4523_v40  ;;  %v4486_v13 = vunpack.c.h.bf16 %v4522_v9 }
 0x6de   : > { %4176 = vst [vmem:[%s7684_s26 + $0x38] sm:$0xff] %v4144_v24  ;;  %v3948_v43 = vadd.f32 %v5172_v34, %v7665_v36  ;;  %v3939_v23 = vpop.f32.mrb[153].mxu0  ;;  %v4525_v34 = vld [vmem:[%s5992_s12 + $0x58] sm:$0xff]  }
 0x6df   : > { %4174 = vst [vmem:[%s7684_s26 + $0x28] sm:$0xff] %v4142_v6  ;;  %v3940_v55 = vadd.f32 %v7665_v36, %v3939_v23  ;;  %v5173_v44 = vpop.f32.mrb[154].mxu0 }
 0x6e0   : > { %v4051_v12 = vmul.f32 %v7672_v56, %v3948_v43  ;;  %v3951_v29 = vadd.f32 %v5173_v44, %v7665_v36  ;;  %v3942_v39 = vpop.f32.mrb[155].mxu0  ;;  %v4497_v44 = vunpack.c.l.bf16 %v4525_v34 }
 0x6e1   : > { %v4049_v41 = vmul.f32 %v7672_v56, %v3940_v55  ;;  %v3943_v15 = vadd.f32 %v7665_v36, %v3942_v39 }
 0x6e2   : > { %v4147_v42 = vadd.f32 %v4473_v21, %v4051_v12  ;;  %v4052_v17 = vmul.f32 %v7672_v56, %v3951_v29  ;;  %v4524_v21 = vld [vmem:[%s5992_s12 + $0x50] sm:$0xff]  }
 0x6e3   : > { %v4145_v0 = vadd.f32 %v4469_v5, %v4049_v41  ;;  %v4050_v4 = vmul.f32 %v7672_v56, %v3943_v15 }
 0x6e4   : > { %4179 = vst [vmem:[%s7684_s26 + $0x50] sm:$0xff] %v4147_v42  ;;  %v4148_v22 = vadd.f32 %v4474_v46, %v4052_v17  ;;  %v4493_v46 = vunpack.c.l.bf16 %v4524_v21 }
 0x6e5   : > { %4177 = vst [vmem:[%s7684_s26 + $0x40] sm:$0xff] %v4145_v0  ;;  %v4146_v35 = vadd.f32 %v4470_v14, %v4050_v4  ;;  %v5176_v30 = vpop.f32.mrb[156].mxu0  ;;  %v4498_v14 = vunpack.c.h.bf16 %v4525_v34  ;;  %v4494_v4 = vunpack.c.h.bf16 %v4524_v21 }
 0x6e6   : > { %4180 = vst [vmem:[%s7684_s26 + $0x58] sm:$0xff] %v4148_v22  ;;  %v3964_v26 = vadd.f32 %v5176_v30, %v7665_v36  ;;  %v3955_v48 = vpop.f32.mrb[157].mxu0  ;;  %v4527_v30 = vld [vmem:[%s5992_s12 + $0x68] sm:$0xff]  }
 0x6e7   : > { %4178 = vst [vmem:[%s7684_s26 + $0x48] sm:$0xff] %v4146_v35  ;;  %v3956_v2 = vadd.f32 %v7665_v36, %v3955_v48  ;;  %v5177_v27 = vpop.f32.mrb[158].mxu0 }
 0x6e8   : > { %v4055_v31 = vmul.f32 %v7672_v56, %v3964_v26  ;;  %v3967_v50 = vadd.f32 %v5177_v27, %v7665_v36  ;;  %v3958_v20 = vpop.f32.mrb[159].mxu0  ;;  %v4505_v27 = vunpack.c.l.bf16 %v4527_v30 }
 0x6e9   : > { %v4053_v1 = vmul.f32 %v7672_v56, %v3956_v2  ;;  %v3959_v33 = vadd.f32 %v7665_v36, %v3958_v20 }
 0x6ea   : > { %v4151_v38 = vadd.f32 %v4481_v7, %v4055_v31  ;;  %v4056_v51 = vmul.f32 %v7672_v56, %v3967_v50  ;;  %v4526_v7 = vld [vmem:[%s5992_s12 + $0x60] sm:$0xff]  }
 0x6eb   : > { %v4149_v59 = vadd.f32 %v4477_v19, %v4053_v1  ;;  %v4054_v54 = vmul.f32 %v7672_v56, %v3959_v33 }
 0x6ec   : > { %4183 = vst [vmem:[%s7684_s26 + $0x70] sm:$0xff] %v4151_v38  ;;  %v4152_v62 = vadd.f32 %v4482_v60, %v4056_v51  ;;  %v4501_v60 = vunpack.c.l.bf16 %v4526_v7 }
 0x6ed   : > { %4181 = vst [vmem:[%s7684_s26 + $0x60] sm:$0xff] %v4149_v59  ;;  %v4150_v47 = vadd.f32 %v4478_v16, %v4054_v54  ;;  %v5180_v37 = vpop.f32.mrb[160].mxu0  ;;  %v4506_v16 = vunpack.c.h.bf16 %v4527_v30  ;;  %v4502_v54 = vunpack.c.h.bf16 %v4526_v7 }
 0x6ee   : > { %4184 = vst [vmem:[%s7684_s26 + $0x78] sm:$0xff] %v4152_v62  ;;  %v3980_v58 = vadd.f32 %v5180_v37, %v7665_v36  ;;  %v3971_v32 = vpop.f32.mrb[161].mxu0  ;;  %v4529_v37 = vld [vmem:[%s5992_s12 + $0x78] sm:$0xff]  }
 0x6ef   : > { %4182 = vst [vmem:[%s7684_s26 + $0x68] sm:$0xff] %v4150_v47  ;;  %v3972_v63 = vadd.f32 %v7665_v36, %v3971_v32  ;;  %v5181_v28 = vpop.f32.mrb[162].mxu0 }
 0x6f0   : > { %v4059_v52 = vmul.f32 %v7672_v56, %v3980_v58  ;;  %v3983_v11 = vadd.f32 %v5181_v28, %v7665_v36  ;;  %v3974_v57 = vpop.f32.mrb[163].mxu0  ;;  %v4513_v28 = vunpack.c.l.bf16 %v4529_v37 }
 0x6f1   : > { %v4057_v10 = vmul.f32 %v7672_v56, %v3972_v63  ;;  %v3975_v8 = vadd.f32 %v7665_v36, %v3974_v57 }
 0x6f2   : > { %v4155_v49 = vadd.f32 %v4489_v3, %v4059_v52  ;;  %v4060_v24 = vmul.f32 %v7672_v56, %v3983_v11  ;;  %v4528_v3 = vld [vmem:[%s5992_s12 + $0x70] sm:$0xff]   ;;  %s4450_s12 = sshll.u32 %s5804_s17, 12  ;;  %s4202_s17 = scalar_lea.sflag [#allocation5], %s5988_s10 }
 0x6f3   : > { %v4153_v61 = vadd.f32 %v4485_v25, %v4057_v10  ;;  %v4058_v6 = vmul.f32 %v7672_v56, %v3975_v8  ;;  %s7789_s27 = scalar_lea.hbm %s7949_s28, %s4450_s12 }
 0x6f4   : > { %4187 = vst [vmem:[%s7684_s26 + $0x90] sm:$0xff] %v4155_v49  ;;  %v4156_v43 = vadd.f32 %v4490_v45, %v4060_v24  ;;  %v4509_v45 = vunpack.c.l.bf16 %v4528_v3 }
 0x6f5   : > { %4185 = vst [vmem:[%s7684_s26 + $0x80] sm:$0xff] %v4153_v61  ;;  %v4154_v23 = vadd.f32 %v4486_v13, %v4058_v6  ;;  %v5184_v55 = vpop.f32.mrb[164].mxu0  ;;  %v4514_v13 = vunpack.c.h.bf16 %v4529_v37  ;;  %v4510_v6 = vunpack.c.h.bf16 %v4528_v3 }
 0x6f6   : > { %4188 = vst [vmem:[%s7684_s26 + $0x98] sm:$0xff] %v4156_v43  ;;  %v3996_v5 = vadd.f32 %v5184_v55, %v7665_v36  ;;  %v3987_v12 = vpop.f32.mrb[165].mxu0 }
 0x6f7   : > { %4186 = vst [vmem:[%s7684_s26 + $0x88] sm:$0xff] %v4154_v23  ;;  %v3988_v29 = vadd.f32 %v7665_v36, %v3987_v12  ;;  %v5185_v39 = vpop.f32.mrb[166].mxu0 }
 0x6f8   : > { %v4063_v41 = vmul.f32 %v7672_v56, %v3996_v5  ;;  %v3999_v15 = vadd.f32 %v5185_v39, %v7665_v36  ;;  %v3990_v42 = vpop.f32.mrb[167].mxu0 }
 0x6f9   : > { %v4061_v17 = vmul.f32 %v7672_v56, %v3988_v29  ;;  %v3991_v0 = vadd.f32 %v7665_v36, %v3990_v42 }
 0x6fa   : > { %v4159_v18 = vadd.f32 %v4497_v44, %v4063_v41  ;;  %v4064_v22 = vmul.f32 %v7672_v56, %v3999_v15 }
 0x6fb   : > { %v4157_v53 = vadd.f32 %v4493_v46, %v4061_v17  ;;  %v4062_v35 = vmul.f32 %v7672_v56, %v3991_v0 }
 0x6fc   : > { %4191 = vst [vmem:[%s7684_s26 + $0xb0] sm:$0xff] %v4159_v18  ;;  %v4160_v26 = vadd.f32 %v4498_v14, %v4064_v22 }
 0x6fd   : > { %4189 = vst [vmem:[%s7684_s26 + $0xa0] sm:$0xff] %v4157_v53  ;;  %v4158_v48 = vadd.f32 %v4494_v4, %v4062_v35  ;;  %v5188_v2 = vpop.f32.mrb[168].mxu0 }
 0x6fe   : > { %4192 = vst [vmem:[%s7684_s26 + $0xb8] sm:$0xff] %v4160_v26  ;;  %v4012_v19 = vadd.f32 %v5188_v2, %v7665_v36  ;;  %v4003_v31 = vpop.f32.mrb[169].mxu0 }
 0x6ff   : > { %4190 = vst [vmem:[%s7684_s26 + $0xa8] sm:$0xff] %v4158_v48  ;;  %v4004_v50 = vadd.f32 %v7665_v36, %v4003_v31  ;;  %v5189_v20 = vpop.f32.mrb[170].mxu0 }
 0x700   : > { %v4067_v1 = vmul.f32 %v7672_v56, %v4012_v19  ;;  %v4015_v33 = vadd.f32 %v5189_v20, %v7665_v36  ;;  %v4006_v38 = vpop.f32.mrb[171].mxu0 }
 0x701   : > { %v4065_v51 = vmul.f32 %v7672_v56, %v4004_v50  ;;  %v4007_v59 = vadd.f32 %v7665_v36, %v4006_v38 }
 0x702   : > { %v4163_v40 = vadd.f32 %v4505_v27, %v4067_v1  ;;  %v4068_v62 = vmul.f32 %v7672_v56, %v4015_v33 }
 0x703   : > { %v4161_v9 = vadd.f32 %v4501_v60, %v4065_v51  ;;  %v4066_v47 = vmul.f32 %v7672_v56, %v4007_v59 }
 0x704   : > { %4195 = vst [vmem:[%s7684_s26 + $0xd0] sm:$0xff] %v4163_v40  ;;  %v4164_v58 = vadd.f32 %v4506_v16, %v4068_v62 }
 0x705   : > { %4193 = vst [vmem:[%s7684_s26 + $0xc0] sm:$0xff] %v4161_v9  ;;  %v4162_v32 = vadd.f32 %v4502_v54, %v4066_v47  ;;  %v5192_v63 = vpop.f32.mrb[172].mxu0 }
 0x706   : > { %4196 = vst [vmem:[%s7684_s26 + $0xd8] sm:$0xff] %v4164_v58  ;;  %v4028_v25 = vadd.f32 %v5192_v63, %v7665_v36  ;;  %v4019_v52 = vpop.f32.mrb[173].mxu0 }
 0x707   : > { %4194 = vst [vmem:[%s7684_s26 + $0xc8] sm:$0xff] %v4162_v32  ;;  %v4020_v11 = vadd.f32 %v7665_v36, %v4019_v52  ;;  %v5193_v57 = vpop.f32.mrb[174].mxu0 }
 0x708   : > { %v4071_v10 = vmul.f32 %v7672_v56, %v4028_v25  ;;  %v4031_v8 = vadd.f32 %v5193_v57, %v7665_v36  ;;  %v4022_v49 = vpop.f32.mrb[175].mxu0 }
 0x709   : > { %v4069_v24 = vmul.f32 %v7672_v56, %v4020_v11  ;;  %v4023_v61 = vadd.f32 %v7665_v36, %v4022_v49 }
 0x70a   : > { %v4167_v34 = vadd.f32 %v4513_v28, %v4071_v10  ;;  %v4072_v43 = vmul.f32 %v7672_v56, %v4031_v8 }
 0x70b   : > { %v4165_v21 = vadd.f32 %v4509_v45, %v4069_v24  ;;  %v4070_v23 = vmul.f32 %v7672_v56, %v4023_v61 }
 0x70c   : > { %4199 = vst [vmem:[%s7684_s26 + $0xf0] sm:$0xff] %v4167_v34  ;;  %v4168_v55 = vadd.f32 %v4514_v13, %v4072_v43 }
 0x70d   : > { %4197 = vst [vmem:[%s7684_s26 + $0xe0] sm:$0xff] %v4165_v21  ;;  %v4166_v36 = vadd.f32 %v4510_v6, %v4070_v23 }
 0x70e   : > { %4200 = vst [vmem:[%s7684_s26 + $0xf8] sm:$0xff] %v4168_v55 }
 0x70f   : > { %4198 = vst [vmem:[%s7684_s26 + $0xe8] sm:$0xff] %v4166_v36 }
 0x710   : > { %5655 = shalt.err (!%p5652_p4)
}
 0x711   : > { %s5656_s30 = scalar_lea.hbm %s7789_s27, 4096  ;;  %s5660_s26 = scalar_lea.hbm %s7949_s28, 8192 }
 0x712   : > { %p5657_p9 = scmp.ne.s32.totalorder %s7789_s27, %s5656_s30  ;;  %p5661_p8 = scmp.lt.u32.totalorder %s7789_s27, %s7949_s28 }
 0x713   : > { %p5662_p13 = scmp.lt.u32.totalorder %s5660_s26, %s5656_s30  ;;  %p5664_p10 = scmp.lt.u32.totalorder %s5656_s30, %s7789_s27 }
 0x714   : > { %p5658_p0 = pnand %p5657_p9, %p5937_p5 }
 0x715   : > { %p5663_p6 = por %p5662_p13, %p5661_p8 }
 0x716   : > { %p5659_p11 = pneg %p5658_p0 }
 0x717   : > { %p5665_p3 = por %p5664_p10, %p5663_p6 }
 0x719   : > { %p5666_p7 = pnand %p5665_p3, %p5659_p11 }
 0x71b   : > { %5669 = shalt.err (!%p5666_p7)
}
 0x71c   : > { %s5726_s18 = smov 128   ;;  %s5727_s25 = smov 8  }
 0x71d   : > { %5224 = dma.vmem_to_hbm [thread:$0]  (%p5937_p5), %s7791_s9, 4096, %s7789_s27, %s4202_s17, %s5726_s18, %s5726_s18, %s5727_s25  }
 0x71e PF: > { %s7950_s23 = sld [smem:[#allocation16_spill]]  ;;  %s7951_s19 = sld [smem:[#allocation17_spill]] }
 0x71f   : > { %p7953_p1 = scmp.ge.s32.totalorder %s5716_s16, 2 }
 0x724   : > { %s4230_s21 = sand.u32 1, %s7950_s23   ;;  %p7952_p12 = scmp.ne.s32.totalorder %s7951_s19, 0 }
 0x725   : > { %s4231_s30 = scalar_lea.sflag [#allocation5], %s4230_s21 }
 0x726   : > { %p5241_p2 = pnand %p7953_p1, %p7952_p12 }
 0x728   : > { %5699 = dma.done.wait (!%p5241_p2), %s4231_s30, 4096  }
 0x729   : > { %5701 = vsyncadd (!%p5241_p2), %s4231_s30, 4294963200  ;;  %s7954_s11 = smov %s5933_s13  ;;  %p25_p4 = scmp.ge.s32.totalorder %s5923_s22, 4  }
 0x72a   : > { %s7955_s13 = smov %s5708_s14  ;;  %s7956_s14 = smov %s5712_s15 }
 0x72b   : > { %s7957_s15 = smov %s7954_s11  ;;  %s7958_s16 = smov %s5923_s22 }
 0x72c   :  { %27 = sbr.rel (!%p25_p4) target bundleno = 10 (0xa), region = 117 }
 0x733   :  { %4236 = vsyncpa [#allocation4], 1 }
 0x734   :  { %4238 = vsyncpa [#allocation4 + $0x1], 1 }
 0x735   :  { %4239 = vsyncpa [#allocation7], 1 }
 0x736   :  { %4240 = vsyncpa [#allocation10], 1 }
 0x737   :  { %4241 = vsyncpa [#allocation5], 1 }
 0x738   :  { %4243 = vsyncpa [#allocation5 + $0x1], 1 }

</bundles_post_ra>
